<compile_context>
chip_gen: v7x
topology: tpu7x:2x2x1
jax: 0.10.0
libtpu: 0.0.40
codegen_flags: <defaults>
</compile_context>

<pallas_src>
import jax
import jax.numpy as jnp
from jax.experimental import pallas as pl
from jax.experimental.pallas import tpu as pltpu

ACTION_DIM = 2
ENVIRONMENT_DIM = 24
ROBOT_DIM = 4
STATE_DIM = ENVIRONMENT_DIM + ROBOT_DIM  # 28

H1 = 800
H2 = 600

# Padded (lane/sublane-friendly) sizes used by the packed kernel.
H1P = 896            # 800 -> 7*128
H2P = 640            # 600 -> 5*128
IN_P = 64            # packed input width: [s(28) | 1.0 | pad | a(2) | pad]
A_OFF = 32           # column offset of the action inside the packed input
N_OUT = 2 * H1P + 2 * H2P   # 3072 = columns of the fused input-side weight

TILE_B = 256


def _round_up(x, m):
    return ((x + m - 1) // m) * m


def _critic_kernel(
    x_ref,                       # packed [tb, 64] bf16: state | 1 | action
    w_in_ref,                    # fused layer_1|layer_4|layer_2_a|layer_5_a (+biases) [64, 3072] bf16
    w2s_ref, w5s_ref,            # layer_2_s / layer_5_s                     [H1P, H2P] bf16 each
    w3_ref, w6_ref, b36_ref,     # fused output layers                       [H2P, 2] bf16 each, [1, 2] f32
    q_ref,                       # output                                    [tb, 2] f32
):
    x = x_ref[...]                                                     # [tb, 64] bf16

    # One fused matmul: columns [0:1792) = layer_1|layer_4 pre-activations (bias
    # folded via the ones column), columns [1792:3072) = action-path terms
    # (a @ w2a + b2a | a @ w5a + b5a), also bias-folded.
    zf = jnp.dot(x, w_in_ref[...], preferred_element_type=jnp.float32)  # [tb, 3072]
    y = jnp.maximum(zf[:, : 2 * H1P], 0.0).astype(jnp.bfloat16)         # [tb, 1792]
    za = zf[:, 2 * H1P:]                                                # [tb, 1280] f32

    # Layer 2 per head (state path) + action path + relu.
    h1 = jnp.maximum(
        jnp.dot(y[:, 0:H1P], w2s_ref[...], preferred_element_type=jnp.float32)
        + za[:, 0:H2P],
        0.0,
    ).astype(jnp.bfloat16)
    h2 = jnp.maximum(
        jnp.dot(y[:, H1P:2 * H1P], w5s_ref[...], preferred_element_type=jnp.float32)
        + za[:, H2P:2 * H2P],
        0.0,
    ).astype(jnp.bfloat16)

    # Fused output layers: q[:, 0] = q1, q[:, 1] = q2 (b3/b6 kept f32).
    q_ref[...] = (
        jnp.dot(h1, w3_ref[...], preferred_element_type=jnp.float32)
        + jnp.dot(h2, w6_ref[...], preferred_element_type=jnp.float32)
        + b36_ref[...]
    )


_W_ORDER = ("w_in", "w2s", "w5s", "w3", "w6", "b36")


@jax.jit
def critic_forward(s, a, packed):
    """s: [B, STATE_DIM] f32, a: [B, ACTION_DIM] f32 -> (q1, q2) each [B, 1] f32."""
    B = s.shape[0]

    # Pad batch to a multiple of 16 (bf16 sublane packing).  For non-tiny
    # batches make sure the grid has at least 2 steps (v7x has 2 TensorCores;
    # the "parallel" batch axis is how they both get work).
    Bp = max(16, _round_up(B, 16))
    if Bp <= 32:
        tb = Bp
    else:
        tb = min(TILE_B, _round_up((Bp + 1) // 2, 16))
        Bp = _round_up(Bp, tb)
    grid = (Bp // tb,)

    # Pack [state | 1.0 | pad | action | pad] into one bf16 input inside the
    # same jit as the pallas_call (no separate tiny host-side XLA launches).
    x = jnp.zeros((Bp, IN_P), jnp.bfloat16)
    x = x.at[:B, :STATE_DIM].set(s.astype(jnp.bfloat16))
    x = x.at[:B, STATE_DIM].set(jnp.bfloat16(1.0))          # bias carrier column
    x = x.at[:B, A_OFF:A_OFF + ACTION_DIM].set(a.astype(jnp.bfloat16))

    w_inputs = [packed[k] for k in _W_ORDER]
    # Weights: full-array blocks with constant index_map -> fetched once,
    # stay VMEM-resident across all batch tiles.
    w_specs = [pl.BlockSpec(w.shape, lambda i: (0, 0)) for w in w_inputs]

    q = pl.pallas_call(
        _critic_kernel,
        out_shape=jax.ShapeDtypeStruct((Bp, 2), jnp.float32),
        grid_spec=pltpu.PrefetchScalarGridSpec(
            num_scalar_prefetch=0,
            grid=grid,
            in_specs=[pl.BlockSpec((tb, IN_P), lambda i: (i, 0))] + w_specs,
            out_specs=pl.BlockSpec((tb, 2), lambda i: (i, 0)),
        ),
        compiler_params=pltpu.CompilerParams(
            dimension_semantics=("parallel",),
            vmem_limit_bytes=32 << 20,
        ),
    )(x, *w_inputs)

    return q[:B, 0:1], q[:B, 1:2]


def init_params(key):
    """Deterministic synthetic parameters. Weights stored as [in, out] (pre-transposed)."""
    ks = jax.random.split(key, 16)

    def lin(kw, kb, fan_in, fan_out):
        bound = 1.0 / jnp.sqrt(jnp.float32(fan_in))
        w = jax.random.uniform(kw, (fan_in, fan_out), jnp.float32, -bound, bound)
        b = jax.random.uniform(kb, (1, fan_out), jnp.float32, -bound, bound)
        return w, b

    w1, b1 = lin(ks[0], ks[1], STATE_DIM, H1)
    w2s, _b2s = lin(ks[2], ks[3], H1, H2)        # b2s exists but unused (matches torch code)
    w2a, b2a = lin(ks[4], ks[5], ACTION_DIM, H2)
    w3, b3 = lin(ks[6], ks[7], H2, 1)
    w4, b4 = lin(ks[8], ks[9], STATE_DIM, H1)
    w5s, _b5s = lin(ks[10], ks[11], H1, H2)      # b5s unused (matches torch code)
    w5a, b5a = lin(ks[12], ks[13], ACTION_DIM, H2)
    w6, b6 = lin(ks[14], ks[15], H2, 1)

    return {
        "w1": w1, "b1": b1,
        "w2s": w2s, "w2a": w2a, "b2a": b2a,
        "w3": w3, "b3": b3,
        "w4": w4, "b4": b4,
        "w5s": w5s, "w5a": w5a, "b5a": b5a,
        "w6": w6, "b6": b6,
    }


def pack_params(p):
    """Host-side packing: fuse twin heads + action path, fold biases via ones-column,
    zero-pad to lane sizes, cast weights to bf16."""
    f32, bf16 = jnp.float32, jnp.bfloat16

    # Fused input-side weight [64, 3072]:
    #   cols [0:896)     -> layer_1   (q1 state path)
    #   cols [896:1792)  -> layer_4   (q2 state path)
    #   cols [1792:2432) -> layer_2_a (q1 action path)
    #   cols [2432:3072) -> layer_5_a (q2 action path)
    # Row STATE_DIM (28) multiplies the packed ones-column -> carries all biases.
    w_in = jnp.zeros((IN_P, N_OUT), f32)
    w_in = w_in.at[:STATE_DIM, 0:H1].set(p["w1"])
    w_in = w_in.at[:STATE_DIM, H1P:H1P + H1].set(p["w4"])
    w_in = w_in.at[STATE_DIM, 0:H1].set(p["b1"][0])
    w_in = w_in.at[STATE_DIM, H1P:H1P + H1].set(p["b4"][0])
    w_in = w_in.at[STATE_DIM, 2 * H1P:2 * H1P + H2].set(p["b2a"][0])
    w_in = w_in.at[STATE_DIM, 2 * H1P + H2P:2 * H1P + H2P + H2].set(p["b5a"][0])
    w_in = w_in.at[A_OFF:A_OFF + ACTION_DIM, 2 * H1P:2 * H1P + H2].set(p["w2a"])
    w_in = w_in.at[A_OFF:A_OFF + ACTION_DIM, 2 * H1P + H2P:2 * H1P + H2P + H2].set(p["w5a"])

    # Layer 2 state paths: [H1P, H2P] each.
    w2s = jnp.zeros((H1P, H2P), f32).at[:H1, :H2].set(p["w2s"])
    w5s = jnp.zeros((H1P, H2P), f32).at[:H1, :H2].set(p["w5s"])

    # Fused output layers into a single [*, 2] projection: col 0 -> q1, col 1 -> q2.
    w3 = jnp.zeros((H2P, 2), f32).at[:H2, 0:1].set(p["w3"])
    w6 = jnp.zeros((H2P, 2), f32).at[:H2, 1:2].set(p["w6"])
    b36 = jnp.concatenate([p["b3"], p["b6"]], axis=1)  # [1, 2] f32

    return {
        "w_in": w_in.astype(bf16),
        "w2s": w2s.astype(bf16), "w5s": w5s.astype(bf16),
        "w3": w3.astype(bf16), "w6": w6.astype(bf16),
        "b36": b36,
    }


def critic_ref(s, a, p):
    """Pure-JAX f32 reference matching the PyTorch forward exactly."""
    s1 = jax.nn.relu(s @ p["w1"] + p["b1"])
    h1 = jax.nn.relu(s1 @ p["w2s"] + a @ p["w2a"] + p["b2a"])
    q1 = h1 @ p["w3"] + p["b3"]
    s2 = jax.nn.relu(s @ p["w4"] + p["b4"])
    h2 = jax.nn.relu(s2 @ p["w5s"] + a @ p["w5a"] + p["b5a"])
    q2 = h2 @ p["w6"] + p["b6"]
    return q1, q2


def critic_ref_mixed(s, a, pk):
    """Reference that mirrors the kernel's bf16-weight / folded-bias / f32-accum math."""
    B = s.shape[0]
    x = jnp.zeros((B, IN_P), jnp.bfloat16)
    x = x.at[:, :STATE_DIM].set(s.astype(jnp.bfloat16))
    x = x.at[:, STATE_DIM].set(jnp.bfloat16(1.0))
    x = x.at[:, A_OFF:A_OFF + ACTION_DIM].set(a.astype(jnp.bfloat16))

    zf = jnp.dot(x, pk["w_in"], preferred_element_type=jnp.float32)
    y = jnp.maximum(zf[:, : 2 * H1P], 0.0).astype(jnp.bfloat16)
    za = zf[:, 2 * H1P:]
    h1 = jnp.maximum(
        jnp.dot(y[:, :H1P], pk["w2s"], preferred_element_type=jnp.float32)
        + za[:, :H2P], 0.0).astype(jnp.bfloat16)
    h2 = jnp.maximum(
        jnp.dot(y[:, H1P:], pk["w5s"], preferred_element_type=jnp.float32)
        + za[:, H2P:], 0.0).astype(jnp.bfloat16)
    q = (jnp.dot(h1, pk["w3"], preferred_element_type=jnp.float32)
         + jnp.dot(h2, pk["w6"], preferred_element_type=jnp.float32)
         + pk["b36"])
    return q[:, 0:1], q[:, 1:2]


if __name__ == "__main__":
    key = jax.random.PRNGKey(0)
    k_params, k_s, k_a, k_s2, k_a2 = jax.random.split(key, 5)

    params = init_params(k_params)
    packed = pack_params(params)

    # Small demo batch (single grid step).
    B = 4
    s = jax.random.normal(k_s, (B, STATE_DIM), jnp.float32)
    a = jax.random.uniform(k_a, (B, ACTION_DIM), jnp.float32, -1.0, 1.0)

    q1, q2 = critic_forward(s, a, packed)
    q1 = jax.block_until_ready(q1)
    q2 = jax.block_until_ready(q2)
    assert q1.shape == (B, 1) and q2.shape == (B, 1)

    # Tight check vs. a reference that mirrors the kernel's mixed precision.
    q1m, q2m = critic_ref_mixed(s, a, packed)
    assert jnp.allclose(q1, q1m, atol=3e-3, rtol=3e-3)
    assert jnp.allclose(q2, q2m, atol=3e-3, rtol=3e-3)

    # Semantic check vs. the full-f32 PyTorch-equivalent reference (bf16 weights
    # + bf16-folded biases introduce ~0.5% relative error).
    q1f, q2f = critic_ref(s, a, params)
    assert jnp.allclose(q1, q1f, atol=5e-2, rtol=5e-2)
    assert jnp.allclose(q2, q2f, atol=5e-2, rtol=5e-2)

    # Larger, non-multiple-of-tile batch to exercise the multi-tile (>=2 steps) path.
    B2 = 300
    s2 = jax.random.normal(k_s2, (B2, STATE_DIM), jnp.float32)
    a2 = jax.random.uniform(k_a2, (B2, ACTION_DIM), jnp.float32, -1.0, 1.0)
    q1b, q2b = critic_forward(s2, a2, packed)
    q1b = jax.block_until_ready(q1b)
    q2b = jax.block_until_ready(q2b)
    q1bm, q2bm = critic_ref_mixed(s2, a2, packed)
    assert q1b.shape == (B2, 1) and q2b.shape == (B2, 1)
    assert jnp.allclose(q1b, q1bm, atol=3e-3, rtol=3e-3)
    assert jnp.allclose(q2b, q2bm, atol=3e-3, rtol=3e-3)

    print("KERNEL_OK")
</pallas_src>

<mosaic_0001>
module attributes {stable_mosaic.version = 11 : i64} {
  func.func @_critic_kernel(%arg0: i32, %arg1: memref<16x64xbf16, #tpu.memory_space<vmem>>, %arg2: memref<64x3072xbf16, #tpu.memory_space<vmem>>, %arg3: memref<896x640xbf16, #tpu.memory_space<vmem>>, %arg4: memref<896x640xbf16, #tpu.memory_space<vmem>>, %arg5: memref<640x2xbf16, #tpu.memory_space<vmem>>, %arg6: memref<640x2xbf16, #tpu.memory_space<vmem>>, %arg7: memref<1x2xf32, #tpu.memory_space<vmem>>, %arg8: memref<16x2xf32, #tpu.memory_space<vmem>>) attributes {dimension_semantics = [#tpu.dimension_semantics<parallel>], iteration_bounds = array<i64: 1>, scalar_prefetch = 0 : i64, scratch_operands = 0 : i64, tpu.core_type = #tpu.core_type<tc>, window_params = [{transform_indices = @transform_0, window_bounds = array<i64: 16, 64>}, {pipeline_mode = #tpu.pipeline_mode<synchronous>, transform_indices = @transform_1, window_bounds = array<i64: 64, 3072>}, {pipeline_mode = #tpu.pipeline_mode<synchronous>, transform_indices = @transform_2, window_bounds = array<i64: 896, 640>}, {pipeline_mode = #tpu.pipeline_mode<synchronous>, transform_indices = @transform_3, window_bounds = array<i64: 896, 640>}, {pipeline_mode = #tpu.pipeline_mode<synchronous>, transform_indices = @transform_4, window_bounds = array<i64: 640, 2>}, {pipeline_mode = #tpu.pipeline_mode<synchronous>, transform_indices = @transform_5, window_bounds = array<i64: 640, 2>}, {pipeline_mode = #tpu.pipeline_mode<synchronous>, transform_indices = @transform_6, window_bounds = array<i64: 1, 2>}, {transform_indices = @transform_7, window_bounds = array<i64: 16, 2>}]} {
    %c0 = arith.constant 0 : index
    %c0_0 = arith.constant 0 : index
    %0 = vector.load %arg1[%c0, %c0_0] : memref<16x64xbf16, #tpu.memory_space<vmem>>, vector<16x64xbf16>
    %c0_1 = arith.constant 0 : index
    %c0_2 = arith.constant 0 : index
    %1 = vector.load %arg2[%c0_1, %c0_2] : memref<64x3072xbf16, #tpu.memory_space<vmem>>, vector<64x3072xbf16>
    %cst = arith.constant dense<0.000000e+00> : vector<16x3072xf32>
    %2 = tpu.matmul %0, %1, %cst {dimension_numbers = #tpu.dot_dimension_numbers<[1], [0], [0], [1], [0, 0, 1, 1], [], []>} : vector<16x64xbf16>, vector<64x3072xbf16>, vector<16x3072xf32> -> vector<16x3072xf32>
    %3 = vector.extract_strided_slice %2 {offsets = [0, 0], sizes = [16, 1792], strides = [1, 1]} : vector<16x3072xf32> to vector<16x1792xf32>
    %cst_3 = arith.constant 0.000000e+00 : f32
    %4 = vector.broadcast %cst_3 : f32 to vector<16x1792xf32>
    %5 = arith.maximumf %3, %4 : vector<16x1792xf32>
    %6 = arith.truncf %5 : vector<16x1792xf32> to vector<16x1792xbf16>
    %7 = vector.extract_strided_slice %2 {offsets = [0, 1792], sizes = [16, 1280], strides = [1, 1]} : vector<16x3072xf32> to vector<16x1280xf32>
    %8 = vector.extract_strided_slice %6 {offsets = [0, 0], sizes = [16, 896], strides = [1, 1]} : vector<16x1792xbf16> to vector<16x896xbf16>
    %c0_4 = arith.constant 0 : index
    %c0_5 = arith.constant 0 : index
    %9 = vector.load %arg3[%c0_4, %c0_5] : memref<896x640xbf16, #tpu.memory_space<vmem>>, vector<896x640xbf16>
    %cst_6 = arith.constant dense<0.000000e+00> : vector<16x640xf32>
    %10 = tpu.matmul %8, %9, %cst_6 {dimension_numbers = #tpu.dot_dimension_numbers<[1], [0], [0], [1], [0, 0, 1, 1], [], []>} : vector<16x896xbf16>, vector<896x640xbf16>, vector<16x640xf32> -> vector<16x640xf32>
    %11 = vector.extract_strided_slice %7 {offsets = [0, 0], sizes = [16, 640], strides = [1, 1]} : vector<16x1280xf32> to vector<16x640xf32>
    %12 = arith.addf %10, %11 : vector<16x640xf32>
    %cst_7 = arith.constant 0.000000e+00 : f32
    %13 = vector.broadcast %cst_7 : f32 to vector<16x640xf32>
    %14 = arith.maximumf %12, %13 : vector<16x640xf32>
    %15 = arith.truncf %14 : vector<16x640xf32> to vector<16x640xbf16>
    %16 = vector.extract_strided_slice %6 {offsets = [0, 896], sizes = [16, 896], strides = [1, 1]} : vector<16x1792xbf16> to vector<16x896xbf16>
    %c0_8 = arith.constant 0 : index
    %c0_9 = arith.constant 0 : index
    %17 = vector.load %arg4[%c0_8, %c0_9] : memref<896x640xbf16, #tpu.memory_space<vmem>>, vector<896x640xbf16>
    %cst_10 = arith.constant dense<0.000000e+00> : vector<16x640xf32>
    %18 = tpu.matmul %16, %17, %cst_10 {dimension_numbers = #tpu.dot_dimension_numbers<[1], [0], [0], [1], [0, 0, 1, 1], [], []>} : vector<16x896xbf16>, vector<896x640xbf16>, vector<16x640xf32> -> vector<16x640xf32>
    %19 = vector.extract_strided_slice %7 {offsets = [0, 640], sizes = [16, 640], strides = [1, 1]} : vector<16x1280xf32> to vector<16x640xf32>
    %20 = arith.addf %18, %19 : vector<16x640xf32>
    %cst_11 = arith.constant 0.000000e+00 : f32
    %21 = vector.broadcast %cst_11 : f32 to vector<16x640xf32>
    %22 = arith.maximumf %20, %21 : vector<16x640xf32>
    %23 = arith.truncf %22 : vector<16x640xf32> to vector<16x640xbf16>
    %c0_12 = arith.constant 0 : index
    %c0_13 = arith.constant 0 : index
    %24 = vector.load %arg5[%c0_12, %c0_13] : memref<640x2xbf16, #tpu.memory_space<vmem>>, vector<640x2xbf16>
    %cst_14 = arith.constant dense<0.000000e+00> : vector<16x2xf32>
    %25 = tpu.matmul %15, %24, %cst_14 {dimension_numbers = #tpu.dot_dimension_numbers<[1], [0], [0], [1], [0, 0, 1, 1], [], []>} : vector<16x640xbf16>, vector<640x2xbf16>, vector<16x2xf32> -> vector<16x2xf32>
    %c0_15 = arith.constant 0 : index
    %c0_16 = arith.constant 0 : index
    %26 = vector.load %arg6[%c0_15, %c0_16] : memref<640x2xbf16, #tpu.memory_space<vmem>>, vector<640x2xbf16>
    %cst_17 = arith.constant dense<0.000000e+00> : vector<16x2xf32>
    %27 = tpu.matmul %23, %26, %cst_17 {dimension_numbers = #tpu.dot_dimension_numbers<[1], [0], [0], [1], [0, 0, 1, 1], [], []>} : vector<16x640xbf16>, vector<640x2xbf16>, vector<16x2xf32> -> vector<16x2xf32>
    %28 = arith.addf %25, %27 : vector<16x2xf32>
    %c0_18 = arith.constant 0 : index
    %c0_19 = arith.constant 0 : index
    %29 = vector.load %arg7[%c0_18, %c0_19] : memref<1x2xf32, #tpu.memory_space<vmem>>, vector<1x2xf32>
    %30 = vector.broadcast %29 : vector<1x2xf32> to vector<16x2xf32>
    %31 = arith.addf %28, %30 : vector<16x2xf32>
    %c0_20 = arith.constant 0 : index
    %c0_21 = arith.constant 0 : index
    %32 = vector.load %arg8[%c0_20, %c0_21] : memref<16x2xf32, #tpu.memory_space<vmem>>, vector<16x2xf32>
    tpu.vector_store %arg8[%c0_20, %c0_21], %31 {strides = array<i32>} : memref<16x2xf32, #tpu.memory_space<vmem>>, vector<16x2xf32>,
    return
  }
  func.func @transform_0(%arg0: i32) -> (i32, i32) {
    %c0_i32 = arith.constant 0 : i32
    %c0_i32_0 = arith.constant 0 : i32
    return %arg0, %c0_i32 : i32, i32
  }
  func.func @transform_1(%arg0: i32) -> (i32, i32) {
    %c0_i32 = arith.constant 0 : i32
    %c0_i32_0 = arith.constant 0 : i32
    %c0_i32_1 = arith.constant 0 : i32
    return %c0_i32, %c0_i32_0 : i32, i32
  }
  func.func @transform_2(%arg0: i32) -> (i32, i32) {
    %c0_i32 = arith.constant 0 : i32
    %c0_i32_0 = arith.constant 0 : i32
    %c0_i32_1 = arith.constant 0 : i32
    return %c0_i32, %c0_i32_0 : i32, i32
  }
  func.func @transform_3(%arg0: i32) -> (i32, i32) {
    %c0_i32 = arith.constant 0 : i32
    %c0_i32_0 = arith.constant 0 : i32
    %c0_i32_1 = arith.constant 0 : i32
    return %c0_i32, %c0_i32_0 : i32, i32
  }
  func.func @transform_4(%arg0: i32) -> (i32, i32) {
    %c0_i32 = arith.constant 0 : i32
    %c0_i32_0 = arith.constant 0 : i32
    %c0_i32_1 = arith.constant 0 : i32
    return %c0_i32, %c0_i32_0 : i32, i32
  }
  func.func @transform_5(%arg0: i32) -> (i32, i32) {
    %c0_i32 = arith.constant 0 : i32
    %c0_i32_0 = arith.constant 0 : i32
    %c0_i32_1 = arith.constant 0 : i32
    return %c0_i32, %c0_i32_0 : i32, i32
  }
  func.func @transform_6(%arg0: i32) -> (i32, i32) {
    %c0_i32 = arith.constant 0 : i32
    %c0_i32_0 = arith.constant 0 : i32
    %c0_i32_1 = arith.constant 0 : i32
    return %c0_i32, %c0_i32_0 : i32, i32
  }
  func.func @transform_7(%arg0: i32) -> (i32, i32) {
    %c0_i32 = arith.constant 0 : i32
    %c0_i32_0 = arith.constant 0 : i32
    return %arg0, %c0_i32 : i32, i32
  }
}

</mosaic_0001>

<bundles_post_ra>
// kernel: critic_forward.1
= control target key start
LH: loop header
LB: loop body
LE: loop exit
PB: predicated region body
PF: predicated region fallthrough
CT: control target
= control target key end

     0   :  { %12 = vsyncpa [#allocation3], 0  ;;  %s9459_s0 = inlined_call_operand.vmem [shape: bf16[16,64], index: 0, kind: input, shape index: {}]   ;;  %s9460_s1 = inlined_call_operand.hbm [shape: bf16[64,3072], index: 1, kind: input, shape index: {}]   ;;  %s9461_s2 = inlined_call_operand.hbm [shape: bf16[896,640], index: 2, kind: input, shape index: {}]   ;;  %s9462_s3 = inlined_call_operand.hbm [shape: bf16[896,640], index: 3, kind: input, shape index: {}]   ;;  %s9463_s4 = inlined_call_operand.vmem [shape: bf16[640,2], index: 4, kind: input, shape index: {}]   ;;  %s9464_s5 = inlined_call_operand.vmem [shape: bf16[640,2], index: 5, kind: input, shape index: {}]   ;;  %s9465_s6 = inlined_call_operand.hbm [shape: f32[1,2], index: 6, kind: input, shape index: {}]   ;;  %s9466_s7 = inlined_call_operand.vmem [shape: f32[16,2], index: 7, kind: output, shape index: {}]  }
   0x1   :  { %13 = vsyncpa [#allocation5], 0 }
   0x2   :  { %14 = vsyncpa [#allocation8], 0  ;;  %s8872_s24 = smov [#allocation4]   ;;  %s8778_s28 = scalar_lea.hbm %s9461_s2, 35840 }
   0x3   :  { %s34_s25 = sshll.u32 %s8872_s24, 4  ;;  %p8779_p0 = scmp.ne.s32.totalorder %s9461_s2, %s8778_s28  ;;  %s35_s25 = int_to_ptr.vmem [resolvable:$true] %s34_s25 }
   0x4   :  { %p8782_p1 = scmp.lt.u32.totalorder %s8778_s28, %s9461_s2 }
   0x6   :  { %p8784_p2 = pnand %p8782_p1, %p8779_p0 }
   0x8   :  { %8787 = shalt.err (!%p8784_p2)
}
   0x9   :  { %s8788_s10 = scalar_lea.vmem %s35_s25, 35840  ;;  %p8793_p4 = scmp.lt.s32.totalorder %s35_s25, %s35_s25 }
   0xa   :  { %p8789_p3 = scmp.ne.s32.totalorder %s35_s25, %s8788_s10  ;;  %p8794_p5 = scmp.lt.s32.totalorder %s8788_s10, %s8788_s10 }
   0xc   :  { %p8795_p6 = por %p8794_p5, %p8793_p4 }
   0xe   :  { %p8796_p7 = pnand %p8795_p6, %p8789_p3 }
  0x10   :  { %8799 = shalt.err (!%p8796_p7)
}
  0x11   :  { %s8873_s11 = smov 320   ;;  %s8874_s12 = smov 20  }
  0x12   :  { %40 = dma.hbm_to_vmem [thread:$0]  %s9461_s2, 35840, %s35_s25, [#allocation5], %s8873_s11, %s8873_s11, %s8874_s12  }
  0x13   :  { %s8875_s15 = smov [#allocation2]   ;;  %s8800_s19 = scalar_lea.hbm %s9460_s1, 12288 }
  0x14   :  { %s22_s16 = sshll.u32 %s8875_s15, 4  ;;  %p8801_p8 = scmp.ne.s32.totalorder %s9460_s1, %s8800_s19  ;;  %s23_s16 = int_to_ptr.vmem [resolvable:$true] %s22_s16 }
  0x15   :  { %p8804_p9 = scmp.lt.u32.totalorder %s8800_s19, %s9460_s1 }
  0x17   :  { %p8806_p10 = pnand %p8804_p9, %p8801_p8 }
  0x19   :  { %8809 = shalt.err (!%p8806_p10)
}
  0x1a   :  { %s8810_s24 = scalar_lea.vmem %s23_s16, 12288  ;;  %p8815_p12 = scmp.lt.s32.totalorder %s23_s16, %s23_s16 }
  0x1b   :  { %p8811_p11 = scmp.ne.s32.totalorder %s23_s16, %s8810_s24  ;;  %p8816_p13 = scmp.lt.s32.totalorder %s8810_s24, %s8810_s24 }
  0x1d   :  { %p8817_p0 = por %p8816_p13, %p8815_p12 }
  0x1f   :  { %p8818_p1 = pnand %p8817_p0, %p8811_p11 }
  0x21   :  { %8821 = shalt.err (!%p8818_p1)
}
  0x22   :  { %s8876_s2 = smov 1536   ;;  %s8877_s25 = smov 96  }
  0x23   :  { %28 = dma.hbm_to_vmem [thread:$0]  %s9460_s1, 12288, %s23_s16, [#allocation3], %s8876_s2, %s8876_s2, %s8877_s25  }
  0x24   :  { %s8878_s28 = smov [#allocation6]   ;;  %s8879_s30 = smov [#allocation7]  }
  0x25   :  { %s46_s29 = sshll.u32 %s8878_s28, 4  ;;  %s63_s8 = sshll.u32 %s8879_s30, 4  ;;  %s47_s29 = int_to_ptr.vmem [resolvable:$true] %s46_s29  ;;  %s64_s8 = int_to_ptr.vmem [resolvable:$true] %s63_s8 }
  0x26   :  { %s8822_s13 = scalar_lea.hbm %s9462_s3, 35840 }
  0x27   :  { %p8823_p2 = scmp.ne.s32.totalorder %s9462_s3, %s8822_s13  ;;  %p8826_p3 = scmp.lt.u32.totalorder %s8822_s13, %s9462_s3 }
  0x29   :  { %p8828_p4 = pnand %p8826_p3, %p8823_p2 }
  0x2b   :  { %8831 = shalt.err (!%p8828_p4)
}
  0x2c   :  { %s8832_s1 = scalar_lea.vmem %s47_s29, 35840  ;;  %p8837_p6 = scmp.lt.s32.totalorder %s47_s29, %s47_s29 }
  0x2d   :  { %p8833_p5 = scmp.ne.s32.totalorder %s47_s29, %s8832_s1  ;;  %p8838_p7 = scmp.lt.s32.totalorder %s8832_s1, %s8832_s1 }
  0x2f   :  { %p8839_p8 = por %p8838_p7, %p8837_p6 }
  0x31   :  { %p8840_p9 = pnand %p8839_p8, %p8833_p5 }
  0x33   :  { %8843 = shalt.err (!%p8840_p9)
}
  0x34   :  { %52 = dma.hbm_to_vmem [thread:$0]  %s9462_s3, 35840, %s47_s29, [#allocation5], %s8873_s11, %s8873_s11, %s8874_s12  }
  0x35   :  { %s8844_s22 = scalar_lea.hbm %s9465_s6, 16 }
  0x36   :  { %p8845_p10 = scmp.ne.s32.totalorder %s9465_s6, %s8844_s22  ;;  %p8848_p11 = scmp.lt.u32.totalorder %s8844_s22, %s9465_s6 }
  0x38   :  { %p8850_p12 = pnand %p8848_p11, %p8845_p10 }
  0x3a   :  { %8853 = shalt.err (!%p8850_p12)
}
  0x3b   :  { %s8854_s26 = scalar_lea.vmem %s64_s8, 16  ;;  %s8858_s27 = scalar_lea.vmem %s64_s8, 32 }
  0x3c   :  { %p8855_p13 = scmp.ne.s32.totalorder %s64_s8, %s8854_s26  ;;  %p8859_p0 = scmp.lt.s32.totalorder %s64_s8, %s64_s8 }
  0x3d   :  { %p8860_p1 = scmp.lt.s32.totalorder %s8858_s27, %s8854_s26 }
  0x3f   :  { %p8861_p2 = por %p8860_p1, %p8859_p0 }
  0x41   :  { %p8862_p3 = pnand %p8861_p2, %p8855_p13 }
  0x43   :  { %8865 = shalt.err (!%p8862_p3)
}
  0x44   :  { %66 = dma.hbm_to_vmem [thread:$0]  %s9465_s6, 16, %s64_s8, [#allocation8]  }
  0x45   :  { %8866 = dma.done.wait [#allocation3], 12288  }
  0x46   :  { %8867 = vsyncadd [#allocation3], 4294955008 }
  0x47   :  { %8868 = dma.done.wait [#allocation5], 71680  }
  0x48   :  { %8869 = vsyncadd [#allocation5], 4294895616 }
  0x49   :  { %8870 = dma.done.wait [#allocation8], 16  }
  0x4a   :  { %8871 = vsyncadd [#allocation8], 4294967280  ;;  %v8880_v0 = vmov 0   ;;  %v82_v1 = vld [vmem:[#allocation2] sm:$0xff]  ;;  %v83_v10 = vld [vmem:[#allocation2 + $0x8] sm:$0xff]  ;;  %vm663_vm0 = vcmask 523264  }
  0x4b   :  { %699 = vmatprep.mubr.bf16.mxu0 %v8880_v0  ;;  %742 = vmatprep.mubr.bf16.mxu1 %v8880_v0  ;;  %v94_v2 = vld [vmem:[#allocation2 + $0x60] sm:$0xff]  ;;  %v95_v12 = vld [vmem:[#allocation2 + $0x68] sm:$0xff]  ;;  %v84_v29 = vld [vmem:[#allocation2 + $0x10] sm:$0xff]  ;;  %vm8882_vm1 = vmmov 0   ;;  %vm6750_vm2 = vcmask 15360  }
  0x4c   :  { %v106_v3 = vld [vmem:[#allocation2 + $0xc0] sm:$0xff]  ;;  %v6762_v4 = vcombine.high %v82_v1, %v94_v2  ;;  %v6761_v5 = vcombine.low %v82_v1, %v94_v2  ;;  %v107_v13 = vld [vmem:[#allocation2 + $0xc8] sm:$0xff]  ;;  %v6764_v17 = vcombine.high %v83_v10, %v95_v12  ;;  %v6763_v18 = vcombine.low %v83_v10, %v95_v12  ;;  %v96_v30 = vld [vmem:[#allocation2 + $0x70] sm:$0xff] }
  0x4d   :  { %v118_v6 = vld [vmem:[#allocation2 + $0x120] sm:$0xff]  ;;  %v119_v14 = vld [vmem:[#allocation2 + $0x128] sm:$0xff]  ;;  %v6766_v34 = vcombine.high %v84_v29, %v96_v30  ;;  %v85_v35 = vld [vmem:[#allocation2 + $0x18] sm:$0xff]  ;;  %v6765_v41 = vcombine.low %v84_v29, %v96_v30 }
  0x4e   :  { %v6786_v7 = vcombine.high %v106_v3, %v118_v6  ;;  %v130_v8 = vld [vmem:[#allocation2 + $0x180] sm:$0xff]  ;;  %667 = vmatprep.subr.bf16.mxu0 %v6762_v4  ;;  %v6785_v11 = vcombine.low %v106_v3, %v118_v6  ;;  %v6788_v19 = vcombine.high %v107_v13, %v119_v14  ;;  %v131_v21 = vld [vmem:[#allocation2 + $0x188] sm:$0xff]  ;;  %710 = vmatprep.subr.bf16.mxu1 %v6764_v17  ;;  %v97_v36 = vld [vmem:[#allocation2 + $0x78] sm:$0xff] }
  0x4f   :  { %v142_v9 = vld [vmem:[#allocation2 + $0x1e0] sm:$0xff]  ;;  %668 = vmatpush1.bf16.msra.mxu0 %v6761_v5  ;;  %v143_v22 = vld [vmem:[#allocation2 + $0x1e8] sm:$0xff]  ;;  %711 = vmatpush1.bf16.msra.mxu1 %v6763_v18  ;;  %v6787_v24 = vcombine.low %v107_v13, %v119_v14  ;;  %v108_v37 = vld [vmem:[#allocation2 + $0xd0] sm:$0xff]  ;;  %v6768_v42 = vcombine.high %v85_v35, %v97_v36  ;;  %v6767_v48 = vcombine.low %v85_v35, %v97_v36 }
  0x50   :  { %669 = vmatprep.subr.bf16.mxu0 %v6786_v7  ;;  %v6810_v15 = vcombine.high %v130_v8, %v142_v9  ;;  %v154_v16 = vld [vmem:[#allocation2 + $0x240] sm:$0xff]  ;;  %v6809_v23 = vcombine.low %v130_v8, %v142_v9  ;;  %712 = vmatprep.subr.bf16.mxu1 %v6788_v19  ;;  %v6812_v26 = vcombine.high %v131_v21, %v143_v22  ;;  %v155_v27 = vld [vmem:[#allocation2 + $0x248] sm:$0xff]  ;;  %v120_v38 = vld [vmem:[#allocation2 + $0x130] sm:$0xff] }
  0x51   :  { %v166_v20 = vld [vmem:[#allocation2 + $0x2a0] sm:$0xff]  ;;  %v167_v28 = vld [vmem:[#allocation2 + $0x2a8] sm:$0xff]  ;;  %v6811_v32 = vcombine.low %v131_v21, %v143_v22  ;;  %v6790_v43 = vcombine.high %v108_v37, %v120_v38  ;;  %v109_v44 = vld [vmem:[#allocation2 + $0xd8] sm:$0xff]  ;;  %v6789_v49 = vcombine.low %v108_v37, %v120_v38 }
  0x52   :  { %v6834_v25 = vcombine.high %v154_v16, %v166_v20  ;;  %v6833_v31 = vcombine.low %v154_v16, %v166_v20  ;;  %v6836_v33 = vcombine.high %v155_v27, %v167_v28  ;;  %v8982_v39 = vld [vmem:[%s9459_s0] sm:$0xff]   ;;  %v6835_v40 = vcombine.low %v155_v27, %v167_v28  ;;  %v121_v45 = vld [vmem:[#allocation2 + $0x138] sm:$0xff]  ;;  %v132_v46 = vld [vmem:[#allocation2 + $0x190] sm:$0xff] }
  0x53   :  { %670 = vmatpush1.bf16.msra.mxu0 %v6785_v11  ;;  %713 = vmatpush1.bf16.msra.mxu1 %v6787_v24  ;;  %v144_v47 = vld [vmem:[#allocation2 + $0x1f0] sm:$0xff]  ;;  %v6792_v50 = vcombine.high %v109_v44, %v121_v45  ;;  %v133_v52 = vld [vmem:[#allocation2 + $0x198] sm:$0xff]  ;;  %v6791_v56 = vcombine.low %v109_v44, %v121_v45  ;;  %v86_v62 = vld [vmem:[#allocation2 + $0x20] sm:$0xff] }
  0x54   :  { %671 = vmatprep.subr.bf16.mxu0 %v6810_v15  ;;  %714 = vmatprep.subr.bf16.mxu1 %v6812_v26  ;;  %v6814_v51 = vcombine.high %v132_v46, %v144_v47  ;;  %v145_v53 = vld [vmem:[#allocation2 + $0x1f8] sm:$0xff]  ;;  %v156_v54 = vld [vmem:[#allocation2 + $0x250] sm:$0xff]  ;;  %v6813_v57 = vcombine.low %v132_v46, %v144_v47  ;;  %v98_v63 = vld [vmem:[#allocation2 + $0x80] sm:$0xff] }
  0x55   :  { %v168_v55 = vld [vmem:[#allocation2 + $0x2b0] sm:$0xff]  ;;  %v6816_v58 = vcombine.high %v133_v52, %v145_v53  ;;  %v157_v60 = vld [vmem:[#allocation2 + $0x258] sm:$0xff]  ;;  %v6815_v1 = vcombine.low %v133_v52, %v145_v53  ;;  %v6770_v4 = vcombine.high %v86_v62, %v98_v63  ;;  %v87_v5 = vld [vmem:[#allocation2 + $0x28] sm:$0xff]  ;;  %v6769_v10 = vcombine.low %v86_v62, %v98_v63 }
  0x56   :  { %v6838_v59 = vcombine.high %v156_v54, %v168_v55  ;;  %v169_v61 = vld [vmem:[#allocation2 + $0x2b8] sm:$0xff]  ;;  %v6837_v2 = vcombine.low %v156_v54, %v168_v55  ;;  %v99_v6 = vld [vmem:[#allocation2 + $0x88] sm:$0xff]  ;;  %v110_v7 = vld [vmem:[#allocation2 + $0xe0] sm:$0xff] }
  0x57   :  { %672 = vmatpush1.bf16.msra.mxu0 %v6809_v23  ;;  %715 = vmatpush1.bf16.msra.mxu1 %v6811_v32  ;;  %v6840_v3 = vcombine.high %v157_v60, %v169_v61  ;;  %v122_v8 = vld [vmem:[#allocation2 + $0x140] sm:$0xff]  ;;  %v6839_v9 = vcombine.low %v157_v60, %v169_v61  ;;  %v111_v11 = vld [vmem:[#allocation2 + $0xe8] sm:$0xff]  ;;  %v6772_v13 = vcombine.high %v87_v5, %v99_v6  ;;  %v100_v32 = vld [vmem:[#allocation2 + $0x90] sm:$0xff] }
  0x58   :  { %673 = vmatprep.subr.bf16.mxu0 %v6834_v25  ;;  %716 = vmatprep.subr.bf16.mxu1 %v6836_v33  ;;  %v123_v12 = vld [vmem:[#allocation2 + $0x148] sm:$0xff]  ;;  %v6794_v14 = vcombine.high %v110_v7, %v122_v8  ;;  %v134_v15 = vld [vmem:[#allocation2 + $0x1a0] sm:$0xff]  ;;  %v6771_v17 = vcombine.low %v87_v5, %v99_v6  ;;  %v6793_v18 = vcombine.low %v110_v7, %v122_v8  ;;  %v89_v35 = vld [vmem:[#allocation2 + $0x38] sm:$0xff] }
  0x59   :  { %v146_v16 = vld [vmem:[#allocation2 + $0x200] sm:$0xff]  ;;  %v135_v19 = vld [vmem:[#allocation2 + $0x1a8] sm:$0xff]  ;;  %v6796_v21 = vcombine.high %v111_v11, %v123_v12  ;;  %v6795_v25 = vcombine.low %v111_v11, %v123_v12  ;;  %v101_v36 = vld [vmem:[#allocation2 + $0x98] sm:$0xff] }
  0x5a   :  { %v147_v20 = vld [vmem:[#allocation2 + $0x208] sm:$0xff]  ;;  %v6818_v22 = vcombine.high %v134_v15, %v146_v16  ;;  %v158_v23 = vld [vmem:[#allocation2 + $0x260] sm:$0xff]  ;;  %v6817_v26 = vcombine.low %v134_v15, %v146_v16  ;;  %v113_v44 = vld [vmem:[#allocation2 + $0xf8] sm:$0xff]  ;;  %v6776_v46 = vcombine.high %v89_v35, %v101_v36 }
  0x5b   :  { %674 = vmatpush1.bf16.msra.mxu0 %v6833_v31  ;;  %717 = vmatpush1.bf16.msra.mxu1 %v6835_v40  ;;  %v170_v24 = vld [vmem:[#allocation2 + $0x2c0] sm:$0xff]  ;;  %v159_v27 = vld [vmem:[#allocation2 + $0x268] sm:$0xff]  ;;  %v6820_v29 = vcombine.high %v135_v19, %v147_v20  ;;  %v88_v31 = vld [vmem:[#allocation2 + $0x30] sm:$0xff]  ;;  %v6819_v33 = vcombine.low %v135_v19, %v147_v20 }
  0x5c   :  { %753 = vmatprep.subr.bf16.mxu0 %v6766_v34  ;;  %796 = vmatprep.subr.bf16.mxu1 %v6768_v42  ;;  %v171_v28 = vld [vmem:[#allocation2 + $0x2c8] sm:$0xff]  ;;  %v6842_v30 = vcombine.high %v158_v23, %v170_v24  ;;  %v6841_v34 = vcombine.low %v158_v23, %v170_v24  ;;  %v6774_v38 = vcombine.high %v88_v31, %v100_v32  ;;  %v112_v40 = vld [vmem:[#allocation2 + $0xf0] sm:$0xff]  ;;  %v125_v45 = vld [vmem:[#allocation2 + $0x158] sm:$0xff] }
  0x5d   :  { %v6844_v37 = vcombine.high %v159_v27, %v171_v28  ;;  %v6843_v42 = vcombine.low %v159_v27, %v171_v28  ;;  %v137_v52 = vld [vmem:[#allocation2 + $0x1b8] sm:$0xff]  ;;  %v6800_v54 = vcombine.high %v113_v44, %v125_v45  ;;  %v91_v5 = vld [vmem:[#allocation2 + $0x48] sm:$0xff] }
  0x5e   :  { %6857 = vmatmul.mubr.msk.bf16.vlgmr.msra.gmra.mrb[0].mxu0 %vm663_vm0, %v8982_v39  ;;  %6858 = vmatmul.mubr.msk.bf16.vlgmr.msra.gmra.mrb[0].mxu1 %vm663_vm0, %v8982_v39  ;;  %v149_v53 = vld [vmem:[#allocation2 + $0x218] sm:$0xff]  ;;  %v103_v6 = vld [vmem:[#allocation2 + $0xa8] sm:$0xff] }
  0x5f   :  { %754 = vmatpush1.bf16.msra.mxu0 %v6765_v41  ;;  %785 = vmatprep.mubr.bf16.mxu0 %v8880_v0  ;;  %v124_v41 = vld [vmem:[#allocation2 + $0x150] sm:$0xff]  ;;  %v161_v60 = vld [vmem:[#allocation2 + $0x278] sm:$0xff]  ;;  %v6824_v62 = vcombine.high %v137_v52, %v149_v53  ;;  %v6780_v15 = vcombine.high %v91_v5, %v103_v6  ;;  %v6779_v19 = vcombine.low %v91_v5, %v103_v6 }
  0x60   :  { %755 = vmatprep.subr.bf16.mxu0 %v6790_v43  ;;  %797 = vmatpush1.bf16.msra.mxu1 %v6767_v48  ;;  %v6773_v43 = vcombine.low %v88_v31, %v100_v32  ;;  %v6798_v47 = vcombine.high %v112_v40, %v124_v41  ;;  %v136_v48 = vld [vmem:[#allocation2 + $0x1b0] sm:$0xff]  ;;  %v173_v61 = vld [vmem:[#allocation2 + $0x2d8] sm:$0xff] }
  0x61   :  { %798 = vmatprep.subr.bf16.mxu1 %v6792_v50  ;;  %828 = vmatprep.mubr.bf16.mxu1 %v8880_v0  ;;  %v6775_v50 = vcombine.low %v89_v35, %v101_v36  ;;  %v6848_v7 = vcombine.high %v161_v60, %v173_v61  ;;  %v6847_v11 = vcombine.low %v161_v60, %v173_v61  ;;  %v92_v31 = vld [vmem:[#allocation2 + $0x50] sm:$0xff] }
  0x62   :  { %v104_v32 = vld [vmem:[#allocation2 + $0xb0] sm:$0xff] }
  0x63   :  { %756 = vmatpush1.bf16.msra.mxu0 %v6789_v49  ;;  %v148_v49 = vld [vmem:[#allocation2 + $0x210] sm:$0xff] }
  0x64   :  { %757 = vmatprep.subr.bf16.mxu0 %v6814_v51  ;;  %799 = vmatpush1.bf16.msra.mxu1 %v6791_v56  ;;  %v6797_v51 = vcombine.low %v112_v40, %v124_v41  ;;  %v6822_v55 = vcombine.high %v136_v48, %v148_v49  ;;  %v160_v56 = vld [vmem:[#allocation2 + $0x270] sm:$0xff] }
  0x65   :  { %800 = vmatprep.subr.bf16.mxu1 %v6816_v58  ;;  %v6799_v58 = vcombine.low %v113_v44, %v125_v45  ;;  %v116_v40 = vld [vmem:[#allocation2 + $0x110] sm:$0xff]  ;;  %v6781_v45 = vcombine.low %v92_v31, %v104_v32 }
  0x66   :  { %v128_v41 = vld [vmem:[#allocation2 + $0x170] sm:$0xff] }
  0x67   :  { %758 = vmatpush1.bf16.msra.mxu0 %v6813_v57  ;;  %v172_v57 = vld [vmem:[#allocation2 + $0x2d0] sm:$0xff] }
  0x68   :  { %759 = vmatprep.subr.bf16.mxu0 %v6838_v59  ;;  %801 = vmatpush1.bf16.msra.mxu1 %v6815_v1  ;;  %v6821_v59 = vcombine.low %v136_v48, %v148_v49  ;;  %v6846_v63 = vcombine.high %v160_v56, %v172_v57  ;;  %v90_v1 = vld [vmem:[#allocation2 + $0x40] sm:$0xff]  ;;  %v140_v48 = vld [vmem:[#allocation2 + $0x1d0] sm:$0xff] }
  0x69   :  { %802 = vmatprep.subr.bf16.mxu1 %v6840_v3  ;;  %v6823_v3 = vcombine.low %v137_v52, %v149_v53  ;;  %v152_v49 = vld [vmem:[#allocation2 + $0x230] sm:$0xff]  ;;  %v6805_v53 = vcombine.low %v116_v40, %v128_v41 }
  0x6a   :  { %v6829_v61 = vcombine.low %v140_v48, %v152_v49 }
  0x6b   :  { %760 = vmatpush1.bf16.msra.mxu0 %v6837_v2  ;;  %v102_v2 = vld [vmem:[#allocation2 + $0xa0] sm:$0xff] }
  0x6c   :  { %839 = vmatprep.subr.bf16.mxu0 %v6770_v4  ;;  %803 = vmatpush1.bf16.msra.mxu1 %v6839_v9  ;;  %v6845_v4 = vcombine.low %v160_v56, %v172_v57  ;;  %v6778_v8 = vcombine.high %v90_v1, %v102_v2  ;;  %v114_v9 = vld [vmem:[#allocation2 + $0x100] sm:$0xff]  ;;  %v6777_v12 = vcombine.low %v90_v1, %v102_v2  ;;  %v164_v56 = vld [vmem:[#allocation2 + $0x290] sm:$0xff] }
  0x6d   :  { %882 = vmatprep.subr.bf16.mxu1 %v6772_v13  ;;  %v115_v13 = vld [vmem:[#allocation2 + $0x108] sm:$0xff]  ;;  %v176_v57 = vld [vmem:[#allocation2 + $0x2f0] sm:$0xff] }
  0x6e   :  { %6859 = vmatmul.mubr.msk.bf16.vlgmr.msra.gmra.mrb[4].mxu0 %vm663_vm0, %v8982_v39  ;;  %v6854_v2 = vcombine.high %v164_v56, %v176_v57  ;;  %v6853_v5 = vcombine.low %v164_v56, %v176_v57  ;;  %v7989_v56 = vld [vmem:[#allocation4 + $0x1e8] ss:$20 sps:$4 sm:$0xff]   ;;  %v7988_v57 = vld [vmem:[#allocation4 + $0x1e4] ss:$20 sps:$4 sm:$0xff]  }
  0x6f   :  { %840 = vmatpush1.bf16.msra.mxu0 %v6769_v10  ;;  %871 = vmatprep.mubr.bf16.mxu0 %v8880_v0  ;;  %v126_v10 = vld [vmem:[#allocation2 + $0x160] sm:$0xff] }
  0x70   :  { %841 = vmatprep.subr.bf16.mxu0 %v6794_v14  ;;  %6860 = vmatmul.mubr.msk.bf16.vlgmr.msra.gmra.mrb[4].mxu1 %vm663_vm0, %v8982_v39  ;;  %v127_v14 = vld [vmem:[#allocation2 + $0x168] sm:$0xff]  ;;  %v6802_v16 = vcombine.high %v114_v9, %v126_v10  ;;  %v6801_v20 = vcombine.low %v114_v9, %v126_v10 }
  0x71   :  { %883 = vmatpush1.bf16.msra.mxu1 %v6771_v17  ;;  %914 = vmatprep.mubr.bf16.mxu1 %v8880_v0  ;;  %v138_v17 = vld [vmem:[#allocation2 + $0x1c0] sm:$0xff]  ;;  %v6804_v23 = vcombine.high %v115_v13, %v127_v14  ;;  %v6803_v27 = vcombine.low %v115_v13, %v127_v14  ;;  %v7925_v9 = vld [vmem:[#allocation4 + $0x34] ss:$20 sps:$4 sm:$0xff]   ;;  %v7931_v14 = vld [vmem:[#allocation4 + $0x5c] ss:$20 sps:$4 sm:$0xff]  }
  0x72   :  { %884 = vmatprep.subr.bf16.mxu1 %v6796_v21  ;;  %v139_v21 = vld [vmem:[#allocation2 + $0x1c8] sm:$0xff] }
  0x73   :  { %842 = vmatpush1.bf16.msra.mxu0 %v6793_v18  ;;  %v150_v18 = vld [vmem:[#allocation2 + $0x220] sm:$0xff] }
  0x74   :  { %843 = vmatprep.subr.bf16.mxu0 %v6818_v22  ;;  %v151_v22 = vld [vmem:[#allocation2 + $0x228] sm:$0xff]  ;;  %v6826_v24 = vcombine.high %v138_v17, %v150_v18  ;;  %v6825_v28 = vcombine.low %v138_v17, %v150_v18  ;;  %v7937_v18 = vld [vmem:[#allocation4 + $0x84] ss:$20 sps:$4 sm:$0xff]  }
  0x75   :  { %885 = vmatpush1.bf16.msra.mxu1 %v6795_v25  ;;  %v162_v25 = vld [vmem:[#allocation2 + $0x280] sm:$0xff]  ;;  %v6827_v35 = vcombine.low %v139_v21, %v151_v22  ;;  %v7928_v17 = vld [vmem:[#allocation4 + $0x54] ss:$20 sps:$4 sm:$0xff]  }
  0x76   :  { %886 = vmatprep.subr.bf16.mxu1 %v6820_v29  ;;  %v163_v29 = vld [vmem:[#allocation2 + $0x288] sm:$0xff] }
  0x77   :  { %844 = vmatpush1.bf16.msra.mxu0 %v6817_v26  ;;  %v174_v26 = vld [vmem:[#allocation2 + $0x2e0] sm:$0xff] }
  0x78   :  { %845 = vmatprep.subr.bf16.mxu0 %v6842_v30  ;;  %v175_v30 = vld [vmem:[#allocation2 + $0x2e8] sm:$0xff]  ;;  %v6849_v36 = vcombine.low %v162_v25, %v174_v26 }
  0x79   :  { %887 = vmatpush1.bf16.msra.mxu1 %v6819_v33  ;;  %v6828_v33 = vcombine.high %v139_v21, %v151_v22  ;;  %v6851_v44 = vcombine.low %v163_v29, %v175_v30  ;;  %v7922_v13 = vld [vmem:[#allocation4 + $0x2c] ss:$20 sps:$4 sm:$0xff]   ;;  %v7934_v21 = vld [vmem:[#allocation4 + $0x7c] ss:$20 sps:$4 sm:$0xff]  }
  0x7a   :  { %888 = vmatprep.subr.bf16.mxu1 %v6844_v37  ;;  %v93_v37 = vld [vmem:[#allocation2 + $0x58] sm:$0xff]  ;;  %v7943_v22 = vld [vmem:[#allocation4 + $0xac] ss:$20 sps:$4 sm:$0xff]  }
  0x7b   :  { %846 = vmatpush1.bf16.msra.mxu0 %v6841_v34  ;;  %v6850_v34 = vcombine.high %v162_v25, %v174_v26  ;;  %v7949_v25 = vld [vmem:[#allocation4 + $0xd4] ss:$20 sps:$4 sm:$0xff]  }
  0x7c   :  { %925 = vmatprep.subr.bf16.mxu0 %v6774_v38  ;;  %v105_v38 = vld [vmem:[#allocation2 + $0xb8] sm:$0xff]  ;;  %v7938_v26 = vld [vmem:[#allocation4 + $0xa0] ss:$20 sps:$4 sm:$0xff]  }
  0x7d   :  { %889 = vmatpush1.bf16.msra.mxu1 %v6843_v42  ;;  %v6852_v42 = vcombine.high %v163_v29, %v175_v30  ;;  %v6783_v52 = vcombine.low %v93_v37, %v105_v38  ;;  %v7955_v29 = vld [vmem:[#allocation4 + $0xfc] ss:$20 sps:$4 sm:$0xff]  }
  0x7e   :  { %6861 = vmatmul.mubr.msk.bf16.vlgmr.msra.gmra.mrb[8].mxu0 %vm663_vm0, %v8982_v39  ;;  %968 = vmatprep.subr.bf16.mxu1 %v6776_v46  ;;  %v117_v46 = vld [vmem:[#allocation2 + $0x118] sm:$0xff] }
  0x7f   :  { %926 = vmatpush1.bf16.msra.mxu0 %v6773_v43  ;;  %957 = vmatprep.mubr.bf16.mxu0 %v8880_v0  ;;  %v6782_v43 = vcombine.high %v92_v31, %v104_v32  ;;  %v7944_v30 = vld [vmem:[#allocation4 + $0xc8] ss:$20 sps:$4 sm:$0xff]   ;;  %v7953_v31 = vld [vmem:[#allocation4 + $0xf8] ss:$20 sps:$4 sm:$0xff]  }
  0x80   :  { %927 = vmatprep.subr.bf16.mxu0 %v6798_v47  ;;  %6862 = vmatmul.mubr.msk.bf16.vlgmr.msra.gmra.mrb[8].mxu1 %vm663_vm0, %v8982_v39  ;;  %v129_v47 = vld [vmem:[#allocation2 + $0x178] sm:$0xff]  ;;  %v7952_v32 = vld [vmem:[#allocation4 + $0xf4] ss:$20 sps:$4 sm:$0xff]  }
  0x81   :  { %969 = vmatpush1.bf16.msra.mxu1 %v6775_v50  ;;  %1000 = vmatprep.mubr.bf16.mxu1 %v8880_v0  ;;  %v6784_v50 = vcombine.high %v93_v37, %v105_v38  ;;  %v6807_v60 = vcombine.low %v117_v46, %v129_v47  ;;  %v7967_v37 = vld [vmem:[#allocation4 + $0x14c] ss:$20 sps:$4 sm:$0xff]  }
  0x82   :  { %970 = vmatprep.subr.bf16.mxu1 %v6800_v54  ;;  %v141_v54 = vld [vmem:[#allocation2 + $0x1d8] sm:$0xff] }
  0x83   :  { %928 = vmatpush1.bf16.msra.mxu0 %v6797_v51  ;;  %v6806_v51 = vcombine.high %v116_v40, %v128_v41  ;;  %v7956_v38 = vld [vmem:[#allocation4 + $0x118] ss:$20 sps:$4 sm:$0xff]   ;;  %v7965_v40 = vld [vmem:[#allocation4 + $0x148] ss:$20 sps:$4 sm:$0xff]  }
  0x84   :  { %929 = vmatprep.subr.bf16.mxu0 %v6822_v55  ;;  %v153_v55 = vld [vmem:[#allocation2 + $0x238] sm:$0xff] }
  0x85   :  { %971 = vmatpush1.bf16.msra.mxu1 %v6799_v58  ;;  %v6808_v58 = vcombine.high %v117_v46, %v129_v47  ;;  %v6832_v1 = vcombine.high %v141_v54, %v153_v55  ;;  %v7964_v41 = vld [vmem:[#allocation4 + $0x144] ss:$20 sps:$4 sm:$0xff]   ;;  %v7979_v46 = vld [vmem:[#allocation4 + $0x19c] ss:$20 sps:$4 sm:$0xff]  }
  0x86   :  { %972 = vmatprep.subr.bf16.mxu1 %v6824_v62  ;;  %v165_v62 = vld [vmem:[#allocation2 + $0x298] sm:$0xff] }
  0x87   :  { %930 = vmatpush1.bf16.msra.mxu0 %v6821_v59  ;;  %v6830_v59 = vcombine.high %v140_v48, %v152_v49  ;;  %v7968_v47 = vld [vmem:[#allocation4 + $0x168] ss:$20 sps:$4 sm:$0xff]   ;;  %v7977_v48 = vld [vmem:[#allocation4 + $0x198] ss:$20 sps:$4 sm:$0xff]  }
  0x88   :  { %931 = vmatprep.subr.bf16.mxu0 %v6846_v63  ;;  %v177_v63 = vld [vmem:[#allocation2 + $0x2f8] sm:$0xff]  ;;  %v7976_v49 = vld [vmem:[#allocation4 + $0x194] ss:$20 sps:$4 sm:$0xff]  }
  0x89   :  { %973 = vmatpush1.bf16.msra.mxu1 %v6823_v3  ;;  %v7919_v3 = vld [vmem:[#allocation4 + $0xc] ss:$20 sps:$4 sm:$0xff]   ;;  %v6856_v6 = vcombine.high %v165_v62, %v177_v63  ;;  %v6855_v10 = vcombine.low %v165_v62, %v177_v63  ;;  %v8003_v62 = vld [vmem:[#allocation4 + $0x23c] ss:$20 sps:$4 sm:$0xff]  }
  0x8a   :  { %974 = vmatprep.subr.bf16.mxu1 %v6848_v7  ;;  %v7917_v7 = vld [vmem:[#allocation4 + $0x8] ss:$20 sps:$4 sm:$0xff]  }
  0x8b   :  { %932 = vmatpush1.bf16.msra.mxu0 %v6845_v4  ;;  %v6831_v4 = vcombine.low %v141_v54, %v153_v55  ;;  %v7991_v54 = vld [vmem:[#allocation4 + $0x1ec] ss:$20 sps:$4 sm:$0xff]   ;;  %v7992_v63 = vld [vmem:[#allocation4 + $0x208] ss:$20 sps:$4 sm:$0xff]  }
  0x8c   :  { %1011 = vmatprep.subr.bf16.mxu0 %v6778_v8  ;;  %v7916_v8 = vld [vmem:[#allocation4 + $0x4] ss:$20 sps:$4 sm:$0xff]  }
  0x8d   :  { %975 = vmatpush1.bf16.msra.mxu1 %v6847_v11  ;;  %v7914_v11 = vld [vmem:[#allocation4] ss:$20 sps:$4 sm:$0xff]   ;;  %v7980_v55 = vld [vmem:[#allocation4 + $0x1b8] ss:$20 sps:$4 sm:$0xff]  }
  0x8e   :  { %6863 = vmatmul.mubr.msk.bf16.vlgmr.msra.gmra.mrb[12].mxu0 %vm663_vm0, %v8982_v39  ;;  %1054 = vmatprep.subr.bf16.mxu1 %v6780_v15  ;;  %v7920_v15 = vld [vmem:[#allocation4 + $0x28] ss:$20 sps:$4 sm:$0xff]  }
  0x8f   :  { %1012 = vmatpush1.bf16.msra.mxu0 %v6777_v12  ;;  %1043 = vmatprep.mubr.bf16.mxu0 %v8880_v0  ;;  %v7923_v12 = vld [vmem:[#allocation4 + $0x30] ss:$20 sps:$4 sm:$0xff]  }
  0x90   :  { %1013 = vmatprep.subr.bf16.mxu0 %v6802_v16  ;;  %6864 = vmatmul.mubr.msk.bf16.vlgmr.msra.gmra.mrb[12].mxu1 %vm663_vm0, %v8982_v39  ;;  %v7929_v16 = vld [vmem:[#allocation4 + $0x58] ss:$20 sps:$4 sm:$0xff]  }
  0x91   :  { %1055 = vmatpush1.bf16.msra.mxu1 %v6779_v19  ;;  %1086 = vmatprep.mubr.bf16.mxu1 %v8880_v0  ;;  %v7926_v19 = vld [vmem:[#allocation4 + $0x50] ss:$20 sps:$4 sm:$0xff]  }
  0x92   :  { %1056 = vmatprep.subr.bf16.mxu1 %v6804_v23  ;;  %v7932_v23 = vld [vmem:[#allocation4 + $0x78] ss:$20 sps:$4 sm:$0xff]  }
  0x93   :  { %1014 = vmatpush1.bf16.msra.mxu0 %v6801_v20  ;;  %v7935_v20 = vld [vmem:[#allocation4 + $0x80] ss:$20 sps:$4 sm:$0xff]  }
  0x94   :  { %1015 = vmatprep.subr.bf16.mxu0 %v6826_v24  ;;  %v7940_v24 = vld [vmem:[#allocation4 + $0xa4] ss:$20 sps:$4 sm:$0xff]  }
  0x95   :  { %1057 = vmatpush1.bf16.msra.mxu1 %v6803_v27  ;;  %v7947_v27 = vld [vmem:[#allocation4 + $0xd0] ss:$20 sps:$4 sm:$0xff]  }
  0x96   :  { %1058 = vmatprep.subr.bf16.mxu1 %v6828_v33  ;;  %v7961_v33 = vld [vmem:[#allocation4 + $0x124] ss:$20 sps:$4 sm:$0xff]  }
  0x97   :  { %1016 = vmatpush1.bf16.msra.mxu0 %v6825_v28  ;;  %v7946_v28 = vld [vmem:[#allocation4 + $0xcc] ss:$20 sps:$4 sm:$0xff]  }
  0x98   :  { %1017 = vmatprep.subr.bf16.mxu0 %v6850_v34  ;;  %v7950_v34 = vld [vmem:[#allocation4 + $0xf0] ss:$20 sps:$4 sm:$0xff]  }
  0x99   :  { %1059 = vmatpush1.bf16.msra.mxu1 %v6827_v35  ;;  %v7959_v35 = vld [vmem:[#allocation4 + $0x120] ss:$20 sps:$4 sm:$0xff]  }
  0x9a   :  { %1060 = vmatprep.subr.bf16.mxu1 %v6852_v42  ;;  %v7973_v42 = vld [vmem:[#allocation4 + $0x174] ss:$20 sps:$4 sm:$0xff]  }
  0x9b   :  { %1018 = vmatpush1.bf16.msra.mxu0 %v6849_v36  ;;  %v7958_v36 = vld [vmem:[#allocation4 + $0x11c] ss:$20 sps:$4 sm:$0xff]  }
  0x9c   :  { %1097 = vmatprep.subr.bf16.mxu0 %v6782_v43  ;;  %v7962_v43 = vld [vmem:[#allocation4 + $0x140] ss:$20 sps:$4 sm:$0xff]  }
  0x9d   :  { %1061 = vmatpush1.bf16.msra.mxu1 %v6851_v44  ;;  %v7971_v44 = vld [vmem:[#allocation4 + $0x170] ss:$20 sps:$4 sm:$0xff]  }
  0x9e   :  { %6865 = vmatmul.mubr.msk.bf16.vlgmr.msra.gmra.mrb[16].mxu0 %vm663_vm0, %v8982_v39  ;;  %1140 = vmatprep.subr.bf16.mxu1 %v6784_v50  ;;  %v7985_v50 = vld [vmem:[#allocation4 + $0x1c4] ss:$20 sps:$4 sm:$0xff]  }
  0x9f   :  { %1098 = vmatpush1.bf16.msra.mxu0 %v6781_v45  ;;  %1129 = vmatprep.mubr.bf16.mxu0 %v8880_v0  ;;  %v7970_v45 = vld [vmem:[#allocation4 + $0x16c] ss:$20 sps:$4 sm:$0xff]  }
  0xa0   :  { %1099 = vmatprep.subr.bf16.mxu0 %v6806_v51  ;;  %6866 = vmatmul.mubr.msk.bf16.vlgmr.msra.gmra.mrb[16].mxu1 %vm663_vm0, %v8982_v39  ;;  %v7974_v51 = vld [vmem:[#allocation4 + $0x190] ss:$20 sps:$4 sm:$0xff]  }
  0xa1   :  { %1141 = vmatpush1.bf16.msra.mxu1 %v6783_v52  ;;  %1172 = vmatprep.mubr.bf16.mxu1 %v8880_v0  ;;  %v7983_v52 = vld [vmem:[#allocation4 + $0x1c0] ss:$20 sps:$4 sm:$0xff]  }
  0xa2   :  { %1142 = vmatprep.subr.bf16.mxu1 %v6808_v58  ;;  %v7997_v58 = vld [vmem:[#allocation4 + $0x214] ss:$20 sps:$4 sm:$0xff]  }
  0xa3   :  { %1100 = vmatpush1.bf16.msra.mxu0 %v6805_v53  ;;  %v7982_v53 = vld [vmem:[#allocation4 + $0x1bc] ss:$20 sps:$4 sm:$0xff]  }
  0xa4   :  { %1101 = vmatprep.subr.bf16.mxu0 %v6830_v59  ;;  %v7986_v59 = vld [vmem:[#allocation4 + $0x1e0] ss:$20 sps:$4 sm:$0xff]  }
  0xa5   :  { %1143 = vmatpush1.bf16.msra.mxu1 %v6807_v60  ;;  %v7995_v60 = vld [vmem:[#allocation4 + $0x210] ss:$20 sps:$4 sm:$0xff]  }
  0xa6   :  { %1144 = vmatprep.subr.bf16.mxu1 %v6832_v1  ;;  %v8001_v1 = vld [vmem:[#allocation4 + $0x238] ss:$20 sps:$4 sm:$0xff]  }
  0xa7   :  { %1102 = vmatpush1.bf16.msra.mxu0 %v6829_v61  ;;  %v7994_v61 = vld [vmem:[#allocation4 + $0x20c] ss:$20 sps:$4 sm:$0xff]  }
  0xa8   :  { %1103 = vmatprep.subr.bf16.mxu0 %v6854_v2  ;;  %v8000_v2 = vld [vmem:[#allocation4 + $0x234] ss:$20 sps:$4 sm:$0xff]  }
  0xa9   :  { %1145 = vmatpush1.bf16.msra.mxu1 %v6831_v4  ;;  %v7998_v4 = vld [vmem:[#allocation4 + $0x230] ss:$20 sps:$4 sm:$0xff]  }
  0xaa   :  { %1146 = vmatprep.subr.bf16.mxu1 %v6856_v6  ;;  %v8006_v6 = vld [vmem:[#allocation4 + $0x25c] ss:$20 sps:$4 sm:$0xff]  }
  0xab   :  { %1104 = vmatpush1.bf16.msra.mxu0 %v6853_v5  ;;  %v8007_v5 = vld [vmem:[#allocation4 + $0x260] ss:$20 sps:$4 sm:$0xff]  }
  0xac   :  { %3189 = vmatprep.subr.bf16.mxu0 %v7919_v3  ;;  %v8009_v3 = vld [vmem:[#allocation4 + $0x264] ss:$20 sps:$4 sm:$0xff]  }
  0xad   :  { %1147 = vmatpush1.bf16.msra.mxu1 %v6855_v10 }
  0xae   :  { %6867 = vmatmul.mubr.msk.bf16.vlgmr.msra.gmra.mrb[20].mxu0 %vm663_vm0, %v8982_v39  ;;  %3017 = vmatprep.subr.bf16.mxu1 %v7916_v8  ;;  %v8004_v8 = vld [vmem:[#allocation4 + $0x258] ss:$20 sps:$4 sm:$0xff]  }
  0xaf   :  { %3190 = vmatpush1.bf16.msra.mxu0 %v7917_v7  ;;  %v8015_v7 = vld [vmem:[#allocation4 + $0x28c] ss:$20 sps:$4 sm:$0xff]  }
  0xb0   :  { %3191 = vmatprep.subr.bf16.mxu0 %v7925_v9  ;;  %6868 = vmatmul.mubr.msk.bf16.vlgmr.msra.gmra.mrb[20].mxu1 %vm663_vm0, %v8982_v39  ;;  %v7941_v39 = vld [vmem:[#allocation4 + $0xa8] ss:$20 sps:$4 sm:$0xff]   ;;  %v8012_v9 = vld [vmem:[#allocation4 + $0x284] ss:$20 sps:$4 sm:$0xff]  }
  0xb1   :  { %3018 = vmatpush1.bf16.msra.mxu1 %v7914_v11 }
  0xb2   :  { %3019 = vmatprep.subr.bf16.mxu1 %v7922_v13 }
  0xb3   :  { %3192 = vmatpush1.bf16.msra.mxu0 %v7923_v12 }
  0xb4   :  { %3193 = vmatprep.subr.bf16.mxu0 %v7931_v14 }
  0xb5   :  { %3020 = vmatpush1.bf16.msra.mxu1 %v7920_v15 }
  0xb6   :  { %3021 = vmatprep.subr.bf16.mxu1 %v7928_v17 }
  0xb7   :  { %3194 = vmatpush1.bf16.msra.mxu0 %v7929_v16 }
  0xb8   :  { %3195 = vmatprep.subr.bf16.mxu0 %v7937_v18  ;;  %v8010_v18 = vld [vmem:[#allocation4 + $0x280] ss:$20 sps:$4 sm:$0xff]  }
  0xb9   :  { %3022 = vmatpush1.bf16.msra.mxu1 %v7926_v19  ;;  %v8013_v19 = vld [vmem:[#allocation4 + $0x288] ss:$20 sps:$4 sm:$0xff]  }
  0xba   :  { %3023 = vmatprep.subr.bf16.mxu1 %v7934_v21 }
  0xbb   :  { %3196 = vmatpush1.bf16.msra.mxu0 %v7935_v20 }
  0xbc   :  { %3197 = vmatprep.subr.bf16.mxu0 %v7943_v22 }
  0xbd   :  { %3024 = vmatpush1.bf16.msra.mxu1 %v7932_v23 }
  0xbe   :  { %3025 = vmatprep.subr.bf16.mxu1 %v7940_v24 }
  0xbf   :  { %3198 = vmatpush1.bf16.msra.mxu0 %v7941_v39 }
  0xc0   :  { %3199 = vmatprep.subr.bf16.mxu0 %v7949_v25 }
  0xc1   :  { %3026 = vmatpush1.bf16.msra.mxu1 %v7938_v26  ;;  %v8018_v26 = vld [vmem:[#allocation4 + $0x2ac] ss:$20 sps:$4 sm:$0xff]  }
  0xc2   :  { %3027 = vmatprep.subr.bf16.mxu1 %v7946_v28 }
  0xc3   :  { %3200 = vmatpush1.bf16.msra.mxu0 %v7947_v27  ;;  %v8021_v27 = vld [vmem:[#allocation4 + $0x2b4] ss:$20 sps:$4 sm:$0xff]  }
  0xc4   :  { %3201 = vmatprep.subr.bf16.mxu0 %v7955_v29 }
  0xc5   :  { %3028 = vmatpush1.bf16.msra.mxu1 %v7944_v30 }
  0xc6   :  { %3029 = vmatprep.subr.bf16.mxu1 %v7952_v32  ;;  %v8016_v32 = vld [vmem:[#allocation4 + $0x2a8] ss:$20 sps:$4 sm:$0xff]  }
  0xc7   :  { %3202 = vmatpush1.bf16.msra.mxu0 %v7953_v31 }
  0xc8   :  { %3203 = vmatprep.subr.bf16.mxu0 %v7961_v33  ;;  %v8019_v33 = vld [vmem:[#allocation4 + $0x2b0] ss:$20 sps:$4 sm:$0xff]  }
  0xc9   :  { %3030 = vmatpush1.bf16.msra.mxu1 %v7950_v34 }
  0xca   :  { %3031 = vmatprep.subr.bf16.mxu1 %v7958_v36  ;;  %v8027_v36 = vld [vmem:[#allocation4 + $0x2dc] ss:$20 sps:$4 sm:$0xff]  }
  0xcb   :  { %3204 = vmatpush1.bf16.msra.mxu0 %v7959_v35  ;;  %v8024_v35 = vld [vmem:[#allocation4 + $0x2d4] ss:$20 sps:$4 sm:$0xff]  }
  0xcc   :  { %3205 = vmatprep.subr.bf16.mxu0 %v7967_v37  ;;  %v8022_v37 = vld [vmem:[#allocation4 + $0x2d0] ss:$20 sps:$4 sm:$0xff]  }
  0xcd   :  { %3032 = vmatpush1.bf16.msra.mxu1 %v7956_v38  ;;  %v8025_v38 = vld [vmem:[#allocation4 + $0x2d8] ss:$20 sps:$4 sm:$0xff]  }
  0xce   :  { %3033 = vmatprep.subr.bf16.mxu1 %v7964_v41  ;;  %v8033_v41 = vld [vmem:[#allocation4 + $0x304] ss:$20 sps:$4 sm:$0xff]  }
  0xcf   :  { %3206 = vmatpush1.bf16.msra.mxu0 %v7965_v40  ;;  %v8030_v40 = vld [vmem:[#allocation4 + $0x2fc] ss:$20 sps:$4 sm:$0xff]  }
  0xd0   :  { %3207 = vmatprep.subr.bf16.mxu0 %v7973_v42 }
  0xd1   :  { %3034 = vmatpush1.bf16.msra.mxu1 %v7962_v43 }
  0xd2   :  { %3035 = vmatprep.subr.bf16.mxu1 %v7970_v45  ;;  %v8028_v45 = vld [vmem:[#allocation4 + $0x2f8] ss:$20 sps:$4 sm:$0xff]  }
  0xd3   :  { %3208 = vmatpush1.bf16.msra.mxu0 %v7971_v44 }
  0xd4   :  { %3209 = vmatprep.subr.bf16.mxu0 %v7979_v46  ;;  %v8031_v46 = vld [vmem:[#allocation4 + $0x300] ss:$20 sps:$4 sm:$0xff]  }
  0xd5   :  { %3036 = vmatpush1.bf16.msra.mxu1 %v7968_v47 }
  0xd6   :  { %3037 = vmatprep.subr.bf16.mxu1 %v7976_v49  ;;  %v8036_v49 = vld [vmem:[#allocation4 + $0x324] ss:$20 sps:$4 sm:$0xff]  }
  0xd7   :  { %3210 = vmatpush1.bf16.msra.mxu0 %v7977_v48 }
  0xd8   :  { %3211 = vmatprep.subr.bf16.mxu0 %v7985_v50  ;;  %v8039_v50 = vld [vmem:[#allocation4 + $0x32c] ss:$20 sps:$4 sm:$0xff]  }
  0xd9   :  { %3038 = vmatpush1.bf16.msra.mxu1 %v7974_v51 }
  0xda   :  { %3039 = vmatprep.subr.bf16.mxu1 %v7982_v53 }
  0xdb   :  { %3212 = vmatpush1.bf16.msra.mxu0 %v7983_v52 }
  0xdc   :  { %3213 = vmatprep.subr.bf16.mxu0 %v7991_v54 }
  0xdd   :  { %3040 = vmatpush1.bf16.msra.mxu1 %v7980_v55 }
  0xde   :  { %3041 = vmatprep.subr.bf16.mxu1 %v7988_v57 }
  0xdf   :  { %3214 = vmatpush1.bf16.msra.mxu0 %v7989_v56 }
  0xe0   :  { %3215 = vmatprep.subr.bf16.mxu0 %v7997_v58  ;;  %v8034_v58 = vld [vmem:[#allocation4 + $0x320] ss:$20 sps:$4 sm:$0xff]  }
  0xe1   :  { %3042 = vmatpush1.bf16.msra.mxu1 %v7986_v59  ;;  %v8037_v59 = vld [vmem:[#allocation4 + $0x328] ss:$20 sps:$4 sm:$0xff]  }
  0xe2   :  { %3043 = vmatprep.subr.bf16.mxu1 %v7994_v61 }
  0xe3   :  { %3216 = vmatpush1.bf16.msra.mxu0 %v7995_v60 }
  0xe4   :  { %3217 = vmatprep.subr.bf16.mxu0 %v8003_v62 }
  0xe5   :  { %3044 = vmatpush1.bf16.msra.mxu1 %v7992_v63  ;;  %v8042_v63 = vld [vmem:[#allocation4 + $0x34c] ss:$20 sps:$4 sm:$0xff]  }
  0xe6   :  { %3045 = vmatprep.subr.bf16.mxu1 %v8000_v2 }
  0xe7   :  { %3218 = vmatpush1.bf16.msra.mxu0 %v8001_v1  ;;  %v8045_v1 = vld [vmem:[#allocation4 + $0x354] ss:$20 sps:$4 sm:$0xff]  }
  0xe8   :  { %3219 = vmatprep.subr.bf16.mxu0 %v8009_v3 }
  0xe9   :  { %3046 = vmatpush1.bf16.msra.mxu1 %v7998_v4 }
  0xea   :  { %3047 = vmatprep.subr.bf16.mxu1 %v8006_v6  ;;  %v8040_v6 = vld [vmem:[#allocation4 + $0x348] ss:$20 sps:$4 sm:$0xff]  }
  0xeb   :  { %3220 = vmatpush1.bf16.msra.mxu0 %v8007_v5 }
  0xec   :  { %3232 = vmatprep.subr.bf16.mxu0 %v8015_v7  ;;  %v8043_v7 = vld [vmem:[#allocation4 + $0x350] ss:$20 sps:$4 sm:$0xff]  }
  0xed   :  { %3048 = vmatpush1.bf16.msra.mxu1 %v8004_v8 }
  0xee   :  { %3060 = vmatprep.subr.bf16.mxu1 %v8012_v9  ;;  %v8048_v9 = vld [vmem:[#allocation4 + $0x374] ss:$20 sps:$4 sm:$0xff]  }
 0x131   :  { %v701_v10 = vpop.f32.mrb[0].mxu0  ;;  %v744_v20 = vpop.f32.mrb[0].mxu1 }
 0x132   :  { %v703_v11 = vpop.f32.mrb[1].mxu0  ;;  %v1183_v13 = vmax.f32 %v701_v10, 0.0  ;;  %v1185_v22 = vmax.f32 %v744_v20, 0.0  ;;  %v746_v23 = vpop.f32.mrb[1].mxu1  ;;  %v8051_v10 = vld [vmem:[#allocation4 + $0x37c] ss:$20 sps:$4 sm:$0xff]  }
 0x133   :  { %v705_v12 = vpop.f32.mrb[2].mxu0  ;;  %v1184_v16 = vmax.f32 %v703_v11, 0.0  ;;  %v1186_v24 = vmax.f32 %v746_v23, 0.0  ;;  %v748_v25 = vpop.f32.mrb[2].mxu1  ;;  %v8046_v11 = vld [vmem:[#allocation4 + $0x370] ss:$20 sps:$4 sm:$0xff]  }
 0x134   :  { %v1197_v14 = vmax.f32 %v705_v12, 0.0  ;;  %v707_v15 = vpop.f32.mrb[3].mxu0  ;;  %v1199_v28 = vmax.f32 %v748_v25, 0.0  ;;  %v750_v29 = vpop.f32.mrb[3].mxu1  ;;  %v8049_v12 = vld [vmem:[#allocation4 + $0x378] ss:$20 sps:$4 sm:$0xff]  }
 0x135   :  { %v1198_v17 = vmax.f32 %v707_v15, 0.0  ;;  %v1200_v30 = vmax.f32 %v750_v29, 0.0  ;;  %v8060_v23 = vld [vmem:[#allocation4 + $0x3c4] ss:$20 sps:$4 sm:$0xff]  }
 0x136   :  { %v9018_v21 = vpack.c.bf16 %v1197_v14, %v1183_v13  ;;  %v9026_v31 = vpack.c.bf16 %v1199_v28, %v1185_v22  ;;  %v8054_v13 = vld [vmem:[#allocation4 + $0x39c] ss:$20 sps:$4 sm:$0xff]   ;;  %v8057_v14 = vld [vmem:[#allocation4 + $0x3a4] ss:$20 sps:$4 sm:$0xff]  }
 0x137   :  { %v9020_v39 = vpack.c.bf16 %v1198_v17, %v1184_v16  ;;  %v9028_v34 = vpack.c.bf16 %v1200_v30, %v1186_v24  ;;  %v8063_v24 = vld [vmem:[#allocation4 + $0x3cc] ss:$20 sps:$4 sm:$0xff]   ;;  %v8061_v28 = vld [vmem:[#allocation4 + $0x3c8] ss:$20 sps:$4 sm:$0xff]  }
 0x139   :  { %3049 = vmatprep.mubr.bf16.mxu1 %v9020_v39  ;;  %3221 = vmatprep.mubr.bf16.mxu0 %v9020_v39 }
 0x13a   :  { %3050 = vmatmul.mubr.bf16.vlgmr.msra.gmra.mrb[12].mxu1 %v9018_v21  ;;  %3222 = vmatmul.mubr.bf16.vlgmr.msra.gmra.mrb[16].mxu0 %v9018_v21 }
 0x13b   :  { %3061 = vmatpush1.bf16.msra.mxu1 %v8010_v18  ;;  %3233 = vmatpush1.bf16.msra.mxu0 %v8013_v19  ;;  %v8052_v18 = vld [vmem:[#allocation4 + $0x398] ss:$20 sps:$4 sm:$0xff]   ;;  %v8055_v19 = vld [vmem:[#allocation4 + $0x3a0] ss:$20 sps:$4 sm:$0xff]  }
 0x13c   :  { %3062 = vmatprep.subr.bf16.mxu1 %v8018_v26  ;;  %3234 = vmatprep.subr.bf16.mxu0 %v8021_v27  ;;  %v8058_v27 = vld [vmem:[#allocation4 + $0x3c0] ss:$20 sps:$4 sm:$0xff]  }
 0x13d   :  { %3092 = vmatprep.mubr.bf16.mxu1 %v9028_v34  ;;  %3264 = vmatprep.mubr.bf16.mxu0 %v9028_v34 }
 0x13f   :  { %3063 = vmatpush1.bf16.msra.mxu1 %v8016_v32  ;;  %3235 = vmatpush1.bf16.msra.mxu0 %v8019_v33 }
 0x140   :  { %3064 = vmatprep.subr.bf16.mxu1 %v8024_v35  ;;  %3236 = vmatprep.subr.bf16.mxu0 %v8027_v36 }
 0x141   :  { %v787_v42 = vpop.f32.mrb[4].mxu0 }
 0x142   :  { %v1187_v43 = vmax.f32 %v787_v42, 0.0  ;;  %v789_v44 = vpop.f32.mrb[5].mxu0 }
 0x143   :  { %3065 = vmatpush1.bf16.msra.mxu1 %v8022_v37  ;;  %3237 = vmatpush1.bf16.msra.mxu0 %v8025_v38  ;;  %v1188_v47 = vmax.f32 %v789_v44, 0.0  ;;  %v791_v48 = vpop.f32.mrb[6].mxu0  ;;  %v830_v54 = vpop.f32.mrb[4].mxu1  ;;  %v8064_v44 = vld [vmem:[#allocation4 + $0x3e8] ss:$20 sps:$4 sm:$0xff]  }
 0x144   :  { %3066 = vmatprep.subr.bf16.mxu1 %v8030_v40  ;;  %3238 = vmatprep.subr.bf16.mxu0 %v8033_v41  ;;  %v1201_v51 = vmax.f32 %v791_v48, 0.0  ;;  %v793_v52 = vpop.f32.mrb[7].mxu0  ;;  %v1189_v56 = vmax.f32 %v830_v54, 0.0  ;;  %v832_v57 = vpop.f32.mrb[5].mxu1  ;;  %v8066_v40 = vld [vmem:[#allocation4 + $0x3ec] ss:$20 sps:$4 sm:$0xff]  }
 0x145   :  { %v1202_v53 = vmax.f32 %v793_v52, 0.0  ;;  %v1190_v61 = vmax.f32 %v832_v57, 0.0  ;;  %v834_v62 = vpop.f32.mrb[6].mxu1  ;;  %v8069_v41 = vld [vmem:[#allocation4 + $0x3f4] ss:$20 sps:$4 sm:$0xff]  }
 0x146   :  { %v9032_v55 = vpack.c.bf16 %v1201_v51, %v1187_v43  ;;  %v1203_v2 = vmax.f32 %v834_v62, 0.0  ;;  %v836_v3 = vpop.f32.mrb[7].mxu1  ;;  %v8070_v51 = vld [vmem:[#allocation4 + $0x410] ss:$20 sps:$4 sm:$0xff]   ;;  %v8073_v52 = vld [vmem:[#allocation4 + $0x418] ss:$20 sps:$4 sm:$0xff]  }
 0x147   :  { %3067 = vmatpush1.bf16.msra.mxu1 %v8028_v45  ;;  %3239 = vmatpush1.bf16.msra.mxu0 %v8031_v46  ;;  %v9034_v60 = vpack.c.bf16 %v1202_v53, %v1188_v47  ;;  %v1204_v4 = vmax.f32 %v836_v3, 0.0  ;;  %v8067_v45 = vld [vmem:[#allocation4 + $0x3f0] ss:$20 sps:$4 sm:$0xff]   ;;  %v8072_v47 = vld [vmem:[#allocation4 + $0x414] ss:$20 sps:$4 sm:$0xff]  }
 0x148   :  { %3068 = vmatprep.subr.bf16.mxu1 %v8036_v49  ;;  %3240 = vmatprep.subr.bf16.mxu0 %v8039_v50  ;;  %v9036_v5 = vpack.c.bf16 %v1203_v2, %v1189_v56  ;;  %v8075_v50 = vld [vmem:[#allocation4 + $0x41c] ss:$20 sps:$4 sm:$0xff]   ;;  %v8081_v54 = vld [vmem:[#allocation4 + $0x444] ss:$20 sps:$4 sm:$0xff]   ;;  %v8087_v2 = vld [vmem:[#allocation4 + $0x46c] ss:$20 sps:$4 sm:$0xff]  }
 0x149   :  { %v9038_v8 = vpack.c.bf16 %v1204_v4, %v1190_v61  ;;  %v8078_v53 = vld [vmem:[#allocation4 + $0x43c] ss:$20 sps:$4 sm:$0xff]   ;;  %v8076_v56 = vld [vmem:[#allocation4 + $0x438] ss:$20 sps:$4 sm:$0xff]  }
 0x14b   :  { %3069 = vmatpush1.bf16.msra.mxu1 %v8034_v58  ;;  %3241 = vmatpush1.bf16.msra.mxu0 %v8037_v59  ;;  %v8079_v58 = vld [vmem:[#allocation4 + $0x440] ss:$20 sps:$4 sm:$0xff]  }
 0x14c   :  { %3070 = vmatprep.subr.bf16.mxu1 %v8042_v63  ;;  %3242 = vmatprep.subr.bf16.mxu0 %v8045_v1  ;;  %v8084_v1 = vld [vmem:[#allocation4 + $0x464] ss:$20 sps:$4 sm:$0xff]  }
 0x14f   :  { %3071 = vmatpush1.bf16.msra.mxu1 %v8040_v6  ;;  %3243 = vmatpush1.bf16.msra.mxu0 %v8043_v7  ;;  %v8082_v6 = vld [vmem:[#allocation4 + $0x460] ss:$20 sps:$4 sm:$0xff]  }
 0x150   :  { %3072 = vmatprep.subr.bf16.mxu1 %v8048_v9  ;;  %3244 = vmatprep.subr.bf16.mxu0 %v8051_v10  ;;  %v8085_v9 = vld [vmem:[#allocation4 + $0x468] ss:$20 sps:$4 sm:$0xff]  }
 0x151   :  { %v873_v15 = vpop.f32.mrb[8].mxu0 }
 0x152   :  { %v1191_v16 = vmax.f32 %v873_v15, 0.0  ;;  %v875_v17 = vpop.f32.mrb[9].mxu0  ;;  %v8091_v15 = vld [vmem:[#allocation4 + $0x490] ss:$20 sps:$4 sm:$0xff]  }
 0x153   :  { %3073 = vmatpush1.bf16.msra.mxu1 %v8046_v11  ;;  %3245 = vmatpush1.bf16.msra.mxu0 %v8049_v12  ;;  %v1192_v20 = vmax.f32 %v875_v17, 0.0  ;;  %v877_v22 = vpop.f32.mrb[10].mxu0  ;;  %v916_v30 = vpop.f32.mrb[8].mxu1  ;;  %v8090_v12 = vld [vmem:[#allocation4 + $0x48c] ss:$20 sps:$4 sm:$0xff]  }
 0x154   :  { %3074 = vmatprep.subr.bf16.mxu1 %v8054_v13  ;;  %3246 = vmatprep.subr.bf16.mxu0 %v8057_v14  ;;  %v1205_v25 = vmax.f32 %v877_v22, 0.0  ;;  %v879_v26 = vpop.f32.mrb[11].mxu0  ;;  %v1193_v33 = vmax.f32 %v916_v30, 0.0  ;;  %v918_v35 = vpop.f32.mrb[9].mxu1  ;;  %v8093_v13 = vld [vmem:[#allocation4 + $0x494] ss:$20 sps:$4 sm:$0xff]  }
 0x155   :  { %v1206_v29 = vmax.f32 %v879_v26, 0.0  ;;  %v1194_v37 = vmax.f32 %v918_v35, 0.0  ;;  %v920_v38 = vpop.f32.mrb[10].mxu1  ;;  %v8088_v14 = vld [vmem:[#allocation4 + $0x488] ss:$20 sps:$4 sm:$0xff]  }
 0x156   :  { %v9040_v32 = vpack.c.bf16 %v1205_v25, %v1191_v16  ;;  %v1207_v42 = vmax.f32 %v920_v38, 0.0  ;;  %v922_v43 = vpop.f32.mrb[11].mxu1  ;;  %v8096_v16 = vld [vmem:[#allocation4 + $0x4b4] ss:$20 sps:$4 sm:$0xff]   ;;  %v8099_v17 = vld [vmem:[#allocation4 + $0x4bc] ss:$20 sps:$4 sm:$0xff]  }
 0x157   :  { %3075 = vmatpush1.bf16.msra.mxu1 %v8052_v18  ;;  %3247 = vmatpush1.bf16.msra.mxu0 %v8055_v19  ;;  %v9042_v36 = vpack.c.bf16 %v1206_v29, %v1192_v20  ;;  %v1208_v46 = vmax.f32 %v922_v43, 0.0  ;;  %v8094_v18 = vld [vmem:[#allocation4 + $0x4b0] ss:$20 sps:$4 sm:$0xff]   ;;  %v8097_v19 = vld [vmem:[#allocation4 + $0x4b8] ss:$20 sps:$4 sm:$0xff]  }
 0x158   :  { %3076 = vmatprep.subr.bf16.mxu1 %v8060_v23  ;;  %3248 = vmatprep.subr.bf16.mxu0 %v8063_v24  ;;  %v9044_v48 = vpack.c.bf16 %v1207_v42, %v1193_v33  ;;  %v8102_v20 = vld [vmem:[#allocation4 + $0x4dc] ss:$20 sps:$4 sm:$0xff]   ;;  %v8105_v22 = vld [vmem:[#allocation4 + $0x4e4] ss:$20 sps:$4 sm:$0xff]   ;;  %v8103_v24 = vld [vmem:[#allocation4 + $0x4e0] ss:$20 sps:$4 sm:$0xff]  }
 0x159   :  { %v9046_v49 = vpack.c.bf16 %v1208_v46, %v1194_v37  ;;  %v8100_v23 = vld [vmem:[#allocation4 + $0x4d8] ss:$20 sps:$4 sm:$0xff]   ;;  %v8117_v33 = vld [vmem:[#allocation4 + $0x534] ss:$20 sps:$4 sm:$0xff]   ;;  %v8123_v43 = vld [vmem:[#allocation4 + $0x55c] ss:$20 sps:$4 sm:$0xff]  }
 0x15a   :  { %v8108_v25 = vld [vmem:[#allocation4 + $0x504] ss:$20 sps:$4 sm:$0xff]   ;;  %v8111_v26 = vld [vmem:[#allocation4 + $0x50c] ss:$20 sps:$4 sm:$0xff]   ;;  %v8120_v42 = vld [vmem:[#allocation4 + $0x554] ss:$20 sps:$4 sm:$0xff]  }
 0x15b   :  { %3077 = vmatpush1.bf16.msra.mxu1 %v8058_v27  ;;  %3249 = vmatpush1.bf16.msra.mxu0 %v8061_v28  ;;  %v8106_v27 = vld [vmem:[#allocation4 + $0x500] ss:$20 sps:$4 sm:$0xff]   ;;  %v8109_v28 = vld [vmem:[#allocation4 + $0x508] ss:$20 sps:$4 sm:$0xff]  }
 0x15c   :  { %3078 = vmatprep.subr.bf16.mxu1 %v8066_v40  ;;  %3250 = vmatprep.subr.bf16.mxu0 %v8069_v41  ;;  %v8114_v30 = vld [vmem:[#allocation4 + $0x52c] ss:$20 sps:$4 sm:$0xff]   ;;  %v8112_v40 = vld [vmem:[#allocation4 + $0x528] ss:$20 sps:$4 sm:$0xff]   ;;  %v8115_v41 = vld [vmem:[#allocation4 + $0x530] ss:$20 sps:$4 sm:$0xff]  }
 0x15d   :  { %v8126_v46 = vld [vmem:[#allocation4 + $0x57c] ss:$20 sps:$4 sm:$0xff]  }
 0x15f   :  { %3079 = vmatpush1.bf16.msra.mxu1 %v8064_v44  ;;  %3251 = vmatpush1.bf16.msra.mxu0 %v8067_v45  ;;  %v8118_v44 = vld [vmem:[#allocation4 + $0x550] ss:$20 sps:$4 sm:$0xff]   ;;  %v8121_v45 = vld [vmem:[#allocation4 + $0x558] ss:$20 sps:$4 sm:$0xff]  }
 0x160   :  { %3080 = vmatprep.subr.bf16.mxu1 %v8072_v47  ;;  %3252 = vmatprep.subr.bf16.mxu0 %v8075_v50  ;;  %v8129_v47 = vld [vmem:[#allocation4 + $0x584] ss:$20 sps:$4 sm:$0xff]  }
 0x161   :  { %v959_v57 = vpop.f32.mrb[12].mxu0  ;;  %v8124_v50 = vld [vmem:[#allocation4 + $0x578] ss:$20 sps:$4 sm:$0xff]  }
 0x162   :  { %v1195_v59 = vmax.f32 %v959_v57, 0.0  ;;  %v961_v61 = vpop.f32.mrb[13].mxu0  ;;  %v8135_v57 = vld [vmem:[#allocation4 + $0x5ac] ss:$20 sps:$4 sm:$0xff]  }
 0x163   :  { %3081 = vmatpush1.bf16.msra.mxu1 %v8070_v51  ;;  %3253 = vmatpush1.bf16.msra.mxu0 %v8073_v52  ;;  %v1196_v62 = vmax.f32 %v961_v61, 0.0  ;;  %v963_v63 = vpop.f32.mrb[14].mxu0  ;;  %v8127_v51 = vld [vmem:[#allocation4 + $0x580] ss:$20 sps:$4 sm:$0xff]   ;;  %v8133_v61 = vld [vmem:[#allocation4 + $0x5a8] ss:$20 sps:$4 sm:$0xff]  }
 0x164   :  { %3082 = vmatprep.subr.bf16.mxu1 %v8078_v53  ;;  %3254 = vmatprep.subr.bf16.mxu0 %v8081_v54  ;;  %v1209_v3 = vmax.f32 %v963_v63, 0.0  ;;  %v965_v4 = vpop.f32.mrb[15].mxu0  ;;  %v8132_v53 = vld [vmem:[#allocation4 + $0x5a4] ss:$20 sps:$4 sm:$0xff]   ;;  %v8138_v63 = vld [vmem:[#allocation4 + $0x5cc] ss:$20 sps:$4 sm:$0xff]  }
 0x165   :  { %v1210_v7 = vmax.f32 %v965_v4, 0.0 }
 0x166   :  { %v9048_v10 = vpack.c.bf16 %v1209_v3, %v1195_v59  ;;  %v8130_v59 = vld [vmem:[#allocation4 + $0x5a0] ss:$20 sps:$4 sm:$0xff]  }
 0x167   :  { %3083 = vmatpush1.bf16.msra.mxu1 %v8076_v56  ;;  %3255 = vmatpush1.bf16.msra.mxu0 %v8079_v58  ;;  %v9050_v11 = vpack.c.bf16 %v1210_v7, %v1196_v62  ;;  %v8141_v3 = vld [vmem:[#allocation4 + $0x5d4] ss:$20 sps:$4 sm:$0xff]   ;;  %v8139_v7 = vld [vmem:[#allocation4 + $0x5d0] ss:$20 sps:$4 sm:$0xff]  }
 0x168   :  { %3084 = vmatprep.subr.bf16.mxu1 %v8084_v1  ;;  %3256 = vmatprep.subr.bf16.mxu0 %v8087_v2 }
 0x16b   :  { %3085 = vmatpush1.bf16.msra.mxu1 %v8082_v6  ;;  %3257 = vmatpush1.bf16.msra.mxu0 %v8085_v9  ;;  %v8136_v6 = vld [vmem:[#allocation4 + $0x5c8] ss:$20 sps:$4 sm:$0xff]  }
 0x16c   :  { %3086 = vmatprep.subr.bf16.mxu1 %v8090_v12  ;;  %3258 = vmatprep.subr.bf16.mxu0 %v8093_v13  ;;  %v8144_v9 = vld [vmem:[#allocation4 + $0x5f4] ss:$20 sps:$4 sm:$0xff]   ;;  %v8147_v12 = vld [vmem:[#allocation4 + $0x5fc] ss:$20 sps:$4 sm:$0xff]  }
 0x16d   :  { %v8142_v13 = vld [vmem:[#allocation4 + $0x5f0] ss:$20 sps:$4 sm:$0xff]  }
 0x16f   :  { %3087 = vmatpush1.bf16.msra.mxu1 %v8088_v14  ;;  %3259 = vmatpush1.bf16.msra.mxu0 %v8091_v15  ;;  %v8145_v14 = vld [vmem:[#allocation4 + $0x5f8] ss:$20 sps:$4 sm:$0xff]   ;;  %v8150_v15 = vld [vmem:[#allocation4 + $0x61c] ss:$20 sps:$4 sm:$0xff]  }
 0x170   :  { %3088 = vmatprep.subr.bf16.mxu1 %v8096_v16  ;;  %3260 = vmatprep.subr.bf16.mxu0 %v8099_v17  ;;  %v8153_v16 = vld [vmem:[#allocation4 + $0x624] ss:$20 sps:$4 sm:$0xff]  }
 0x171   :  { %v8148_v17 = vld [vmem:[#allocation4 + $0x618] ss:$20 sps:$4 sm:$0xff]  }
 0x173   :  { %3089 = vmatpush1.bf16.msra.mxu1 %v8094_v18  ;;  %3261 = vmatpush1.bf16.msra.mxu0 %v8097_v19  ;;  %v9052_v29 = vpop.f32.mrb[16].mxu1  ;;  %v8151_v18 = vld [vmem:[#allocation4 + $0x620] ss:$20 sps:$4 sm:$0xff]   ;;  %v8156_v19 = vld [vmem:[#allocation4 + $0x644] ss:$20 sps:$4 sm:$0xff]  }
 0x174   :  { %3090 = vmatprep.subr.bf16.mxu1 %v8102_v20  ;;  %3262 = vmatprep.subr.bf16.mxu0 %v8105_v22  ;;  %v9054_v35 = vpop.f32.mrb[17].mxu1  ;;  %v8159_v20 = vld [vmem:[#allocation4 + $0x64c] ss:$20 sps:$4 sm:$0xff]  }
 0x175   :  { %v9056_v37 = vpop.f32.mrb[18].mxu1  ;;  %v8154_v22 = vld [vmem:[#allocation4 + $0x640] ss:$20 sps:$4 sm:$0xff]  }
 0x176   :  { %v9058_v38 = vpop.f32.mrb[19].mxu1 }
 0x177   :  { %3091 = vmatpush1.bf16.msra.mxu1 %v8100_v23  ;;  %3263 = vmatpush1.bf16.msra.mxu0 %v8103_v24  ;;  %v8157_v23 = vld [vmem:[#allocation4 + $0x648] ss:$20 sps:$4 sm:$0xff]   ;;  %v8162_v24 = vld [vmem:[#allocation4 + $0x66c] ss:$20 sps:$4 sm:$0xff]  }
 0x178   :  { %3103 = vmatprep.subr.bf16.mxu1 %v8108_v25  ;;  %3275 = vmatprep.subr.bf16.mxu0 %v8111_v26  ;;  %v8165_v25 = vld [vmem:[#allocation4 + $0x674] ss:$20 sps:$4 sm:$0xff]  }
 0x179   :  { %v8160_v26 = vld [vmem:[#allocation4 + $0x668] ss:$20 sps:$4 sm:$0xff]  }
 0x17a   :  { %3093 = vmatmul.mubr.bf16.vlgmr.msra.gmra.mrb[12].mxu1 %v9026_v31  ;;  %3265 = vmatmul.mubr.bf16.vlgmr.msra.gmra.mrb[16].mxu0 %v9026_v31 }
 0x17b   :  { %3104 = vmatpush1.bf16.msra.mxu1 %v8106_v27  ;;  %3276 = vmatpush1.bf16.msra.mxu0 %v8109_v28  ;;  %v8163_v27 = vld [vmem:[#allocation4 + $0x670] ss:$20 sps:$4 sm:$0xff]   ;;  %v8168_v28 = vld [vmem:[#allocation4 + $0x694] ss:$20 sps:$4 sm:$0xff]  }
 0x17c   :  { %3105 = vmatprep.subr.bf16.mxu1 %v8114_v30  ;;  %3277 = vmatprep.subr.bf16.mxu0 %v8117_v33  ;;  %v8171_v30 = vld [vmem:[#allocation4 + $0x69c] ss:$20 sps:$4 sm:$0xff]  }
 0x17d   :  { %3135 = vmatprep.mubr.bf16.mxu1 %v9034_v60  ;;  %3307 = vmatprep.mubr.bf16.mxu0 %v9034_v60  ;;  %v8166_v33 = vld [vmem:[#allocation4 + $0x690] ss:$20 sps:$4 sm:$0xff]  }
 0x17f   :  { %3106 = vmatpush1.bf16.msra.mxu1 %v8112_v40  ;;  %3278 = vmatpush1.bf16.msra.mxu0 %v8115_v41  ;;  %v8169_v40 = vld [vmem:[#allocation4 + $0x698] ss:$20 sps:$4 sm:$0xff]   ;;  %v8174_v41 = vld [vmem:[#allocation4 + $0x6bc] ss:$20 sps:$4 sm:$0xff]  }
 0x180   :  { %3107 = vmatprep.subr.bf16.mxu1 %v8120_v42  ;;  %3279 = vmatprep.subr.bf16.mxu0 %v8123_v43  ;;  %v8177_v42 = vld [vmem:[#allocation4 + $0x6c4] ss:$20 sps:$4 sm:$0xff]  }
 0x181   :  { %v9064_v52 = vpop.f32.mrb[20].mxu0  ;;  %v8172_v43 = vld [vmem:[#allocation4 + $0x6b8] ss:$20 sps:$4 sm:$0xff]  }
 0x182   :  { %v9066_v54 = vpop.f32.mrb[21].mxu0 }
 0x183   :  { %3108 = vmatpush1.bf16.msra.mxu1 %v8118_v44  ;;  %3280 = vmatpush1.bf16.msra.mxu0 %v8121_v45  ;;  %v9068_v56 = vpop.f32.mrb[22].mxu0  ;;  %v9072_v62 = vpop.f32.mrb[20].mxu1  ;;  %v8175_v44 = vld [vmem:[#allocation4 + $0x6c0] ss:$20 sps:$4 sm:$0xff]   ;;  %v8180_v45 = vld [vmem:[#allocation4 + $0x6e4] ss:$20 sps:$4 sm:$0xff]  }
 0x184   :  { %3109 = vmatprep.subr.bf16.mxu1 %v8126_v46  ;;  %3281 = vmatprep.subr.bf16.mxu0 %v8129_v47  ;;  %v9070_v58 = vpop.f32.mrb[23].mxu0  ;;  %v9074_v1 = vpop.f32.mrb[21].mxu1  ;;  %v8183_v46 = vld [vmem:[#allocation4 + $0x6ec] ss:$20 sps:$4 sm:$0xff]  }
 0x185   :  { %v9076_v2 = vpop.f32.mrb[22].mxu1  ;;  %v8178_v47 = vld [vmem:[#allocation4 + $0x6e0] ss:$20 sps:$4 sm:$0xff]  }
 0x186   :  { %v9078_v4 = vpop.f32.mrb[23].mxu1 }
 0x187   :  { %3110 = vmatpush1.bf16.msra.mxu1 %v8124_v50  ;;  %3282 = vmatpush1.bf16.msra.mxu0 %v8127_v51  ;;  %v8181_v50 = vld [vmem:[#allocation4 + $0x6e8] ss:$20 sps:$4 sm:$0xff]   ;;  %v8186_v51 = vld [vmem:[#allocation4 + $0x70c] ss:$20 sps:$4 sm:$0xff]  }
 0x188   :  { %3111 = vmatprep.subr.bf16.mxu1 %v8132_v53  ;;  %3283 = vmatprep.subr.bf16.mxu0 %v8135_v57  ;;  %v8189_v53 = vld [vmem:[#allocation4 + $0x714] ss:$20 sps:$4 sm:$0xff]  }
 0x189   :  { %v8184_v57 = vld [vmem:[#allocation4 + $0x708] ss:$20 sps:$4 sm:$0xff]  }
 0x18b   :  { %3112 = vmatpush1.bf16.msra.mxu1 %v8130_v59  ;;  %3284 = vmatpush1.bf16.msra.mxu0 %v8133_v61  ;;  %v8187_v59 = vld [vmem:[#allocation4 + $0x710] ss:$20 sps:$4 sm:$0xff]   ;;  %v8192_v61 = vld [vmem:[#allocation4 + $0x734] ss:$20 sps:$4 sm:$0xff]  }
 0x18c   :  { %3113 = vmatprep.subr.bf16.mxu1 %v8138_v63  ;;  %3285 = vmatprep.subr.bf16.mxu0 %v8141_v3  ;;  %v8195_v63 = vld [vmem:[#allocation4 + $0x73c] ss:$20 sps:$4 sm:$0xff]  }
 0x18d   :  { %v8190_v3 = vld [vmem:[#allocation4 + $0x730] ss:$20 sps:$4 sm:$0xff]  }
 0x18f   :  { %3114 = vmatpush1.bf16.msra.mxu1 %v8136_v6  ;;  %3286 = vmatpush1.bf16.msra.mxu0 %v8139_v7  ;;  %v8193_v6 = vld [vmem:[#allocation4 + $0x738] ss:$20 sps:$4 sm:$0xff]   ;;  %v8198_v7 = vld [vmem:[#allocation4 + $0x75c] ss:$20 sps:$4 sm:$0xff]  }
 0x190   :  { %3115 = vmatprep.subr.bf16.mxu1 %v8144_v9  ;;  %3287 = vmatprep.subr.bf16.mxu0 %v8147_v12  ;;  %v8201_v9 = vld [vmem:[#allocation4 + $0x764] ss:$20 sps:$4 sm:$0xff]  }
 0x191   :  { %v8196_v12 = vld [vmem:[#allocation4 + $0x758] ss:$20 sps:$4 sm:$0xff]  }
 0x193   :  { %3116 = vmatpush1.bf16.msra.mxu1 %v8142_v13  ;;  %3288 = vmatpush1.bf16.msra.mxu0 %v8145_v14  ;;  %v8199_v13 = vld [vmem:[#allocation4 + $0x760] ss:$20 sps:$4 sm:$0xff]   ;;  %v8204_v14 = vld [vmem:[#allocation4 + $0x784] ss:$20 sps:$4 sm:$0xff]  }
 0x194   :  { %3117 = vmatprep.subr.bf16.mxu1 %v8150_v15  ;;  %3289 = vmatprep.subr.bf16.mxu0 %v8153_v16  ;;  %v8207_v15 = vld [vmem:[#allocation4 + $0x78c] ss:$20 sps:$4 sm:$0xff]  }
 0x195   :  { %v8202_v16 = vld [vmem:[#allocation4 + $0x780] ss:$20 sps:$4 sm:$0xff]  }
 0x197   :  { %3118 = vmatpush1.bf16.msra.mxu1 %v8148_v17  ;;  %3290 = vmatpush1.bf16.msra.mxu0 %v8151_v18  ;;  %v8205_v17 = vld [vmem:[#allocation4 + $0x788] ss:$20 sps:$4 sm:$0xff]   ;;  %v8210_v18 = vld [vmem:[#allocation4 + $0x7ac] ss:$20 sps:$4 sm:$0xff]  }
 0x198   :  { %3119 = vmatprep.subr.bf16.mxu1 %v8156_v19  ;;  %3291 = vmatprep.subr.bf16.mxu0 %v8159_v20  ;;  %v8213_v19 = vld [vmem:[#allocation4 + $0x7b4] ss:$20 sps:$4 sm:$0xff]  }
 0x199   :  { %v8208_v20 = vld [vmem:[#allocation4 + $0x7a8] ss:$20 sps:$4 sm:$0xff]  }
 0x19b   :  { %3120 = vmatpush1.bf16.msra.mxu1 %v8154_v22  ;;  %3292 = vmatpush1.bf16.msra.mxu0 %v8157_v23  ;;  %v8211_v22 = vld [vmem:[#allocation4 + $0x7b0] ss:$20 sps:$4 sm:$0xff]   ;;  %v8216_v23 = vld [vmem:[#allocation4 + $0x7d4] ss:$20 sps:$4 sm:$0xff]  }
 0x19c   :  { %3121 = vmatprep.subr.bf16.mxu1 %v8162_v24  ;;  %3293 = vmatprep.subr.bf16.mxu0 %v8165_v25  ;;  %v8219_v24 = vld [vmem:[#allocation4 + $0x7dc] ss:$20 sps:$4 sm:$0xff]  }
 0x19d   :  { %v8214_v25 = vld [vmem:[#allocation4 + $0x7d0] ss:$20 sps:$4 sm:$0xff]  }
 0x19f   :  { %3122 = vmatpush1.bf16.msra.mxu1 %v8160_v26  ;;  %3294 = vmatpush1.bf16.msra.mxu0 %v8163_v27  ;;  %v8217_v26 = vld [vmem:[#allocation4 + $0x7d8] ss:$20 sps:$4 sm:$0xff]   ;;  %v8222_v27 = vld [vmem:[#allocation4 + $0x7fc] ss:$20 sps:$4 sm:$0xff]  }
 0x1a0   :  { %3123 = vmatprep.subr.bf16.mxu1 %v8168_v28  ;;  %3295 = vmatprep.subr.bf16.mxu0 %v8171_v30  ;;  %v8225_v28 = vld [vmem:[#allocation4 + $0x804] ss:$20 sps:$4 sm:$0xff]  }
 0x1a1   :  { %v8220_v30 = vld [vmem:[#allocation4 + $0x7f8] ss:$20 sps:$4 sm:$0xff]  }
 0x1a3   :  { %3124 = vmatpush1.bf16.msra.mxu1 %v8166_v33  ;;  %3296 = vmatpush1.bf16.msra.mxu0 %v8169_v40  ;;  %v8223_v33 = vld [vmem:[#allocation4 + $0x800] ss:$20 sps:$4 sm:$0xff]   ;;  %v8228_v40 = vld [vmem:[#allocation4 + $0x824] ss:$20 sps:$4 sm:$0xff]  }
 0x1a4   :  { %3125 = vmatprep.subr.bf16.mxu1 %v8174_v41  ;;  %3297 = vmatprep.subr.bf16.mxu0 %v8177_v42  ;;  %v8231_v41 = vld [vmem:[#allocation4 + $0x82c] ss:$20 sps:$4 sm:$0xff]  }
 0x1a5   :  { %v8226_v42 = vld [vmem:[#allocation4 + $0x820] ss:$20 sps:$4 sm:$0xff]  }
 0x1a7   :  { %3126 = vmatpush1.bf16.msra.mxu1 %v8172_v43  ;;  %3298 = vmatpush1.bf16.msra.mxu0 %v8175_v44  ;;  %v8229_v43 = vld [vmem:[#allocation4 + $0x828] ss:$20 sps:$4 sm:$0xff]   ;;  %v8234_v44 = vld [vmem:[#allocation4 + $0x84c] ss:$20 sps:$4 sm:$0xff]  }
 0x1a8   :  { %3127 = vmatprep.subr.bf16.mxu1 %v8180_v45  ;;  %3299 = vmatprep.subr.bf16.mxu0 %v8183_v46  ;;  %v8237_v45 = vld [vmem:[#allocation4 + $0x854] ss:$20 sps:$4 sm:$0xff]  }
 0x1a9   :  { %v8232_v46 = vld [vmem:[#allocation4 + $0x848] ss:$20 sps:$4 sm:$0xff]  }
 0x1ab   :  { %3128 = vmatpush1.bf16.msra.mxu1 %v8178_v47  ;;  %3300 = vmatpush1.bf16.msra.mxu0 %v8181_v50  ;;  %v8235_v47 = vld [vmem:[#allocation4 + $0x850] ss:$20 sps:$4 sm:$0xff]   ;;  %v8240_v50 = vld [vmem:[#allocation4 + $0x874] ss:$20 sps:$4 sm:$0xff]  }
 0x1ac   :  { %3129 = vmatprep.subr.bf16.mxu1 %v8186_v51  ;;  %3301 = vmatprep.subr.bf16.mxu0 %v8189_v53  ;;  %v8243_v51 = vld [vmem:[#allocation4 + $0x87c] ss:$20 sps:$4 sm:$0xff]  }
 0x1ad   :  { %v8238_v53 = vld [vmem:[#allocation4 + $0x870] ss:$20 sps:$4 sm:$0xff]  }
 0x1af   :  { %3130 = vmatpush1.bf16.msra.mxu1 %v8184_v57  ;;  %3302 = vmatpush1.bf16.msra.mxu0 %v8187_v59  ;;  %v8241_v57 = vld [vmem:[#allocation4 + $0x878] ss:$20 sps:$4 sm:$0xff]   ;;  %v8246_v59 = vld [vmem:[#allocation4 + $0x89c] ss:$20 sps:$4 sm:$0xff]  }
 0x1b0   :  { %3131 = vmatprep.subr.bf16.mxu1 %v8192_v61  ;;  %3303 = vmatprep.subr.bf16.mxu0 %v8195_v63  ;;  %v8249_v61 = vld [vmem:[#allocation4 + $0x8a4] ss:$20 sps:$4 sm:$0xff]  }
 0x1b1   :  { %v8244_v63 = vld [vmem:[#allocation4 + $0x898] ss:$20 sps:$4 sm:$0xff]  }
 0x1b3   :  { %3132 = vmatpush1.bf16.msra.mxu1 %v8190_v3  ;;  %3304 = vmatpush1.bf16.msra.mxu0 %v8193_v6  ;;  %v8247_v3 = vld [vmem:[#allocation4 + $0x8a0] ss:$20 sps:$4 sm:$0xff]   ;;  %v8250_v6 = vld [vmem:[#allocation4 + $0x150] ss:$20 sps:$4 sm:$0xff]  }
 0x1b4   :  { %3133 = vmatprep.subr.bf16.mxu1 %v8198_v7  ;;  %3305 = vmatprep.subr.bf16.mxu0 %v8201_v9  ;;  %v8251_v7 = vld [vmem:[#allocation4 + $0x3d0] ss:$20 sps:$4 sm:$0xff]  }
 0x1b5   :  { %v8252_v9 = vld [vmem:[#allocation4 + $0x10] ss:$20 sps:$4 sm:$0xff]  }
 0x1b7   :  { %3134 = vmatpush1.bf16.msra.mxu1 %v8196_v12  ;;  %3306 = vmatpush1.bf16.msra.mxu0 %v8199_v13  ;;  %v8253_v12 = vld [vmem:[#allocation4 + $0x290] ss:$20 sps:$4 sm:$0xff]   ;;  %v8254_v13 = vld [vmem:[#allocation4 + $0x178] ss:$20 sps:$4 sm:$0xff]  }
 0x1b8   :  { %3146 = vmatprep.subr.bf16.mxu1 %v8204_v14  ;;  %3318 = vmatprep.subr.bf16.mxu0 %v8207_v15  ;;  %v8255_v14 = vld [vmem:[#allocation4 + $0x3f8] ss:$20 sps:$4 sm:$0xff]  }
 0x1b9   :  { %v8256_v15 = vld [vmem:[#allocation4 + $0x38] ss:$20 sps:$4 sm:$0xff]  }
 0x1ba   :  { %3136 = vmatmul.mubr.bf16.vlgmr.msra.gmra.mrb[12].mxu1 %v9032_v55  ;;  %3308 = vmatmul.mubr.bf16.vlgmr.msra.gmra.mrb[16].mxu0 %v9032_v55 }
 0x1bb   :  { %3147 = vmatpush1.bf16.msra.mxu1 %v8202_v16  ;;  %3319 = vmatpush1.bf16.msra.mxu0 %v8205_v17  ;;  %v8257_v16 = vld [vmem:[#allocation4 + $0x2b8] ss:$20 sps:$4 sm:$0xff]   ;;  %v8258_v17 = vld [vmem:[#allocation4 + $0x1a0] ss:$20 sps:$4 sm:$0xff]  }
 0x1bc   :  { %3148 = vmatprep.subr.bf16.mxu1 %v8210_v18  ;;  %3320 = vmatprep.subr.bf16.mxu0 %v8213_v19  ;;  %v8259_v18 = vld [vmem:[#allocation4 + $0x420] ss:$20 sps:$4 sm:$0xff]  }
 0x1bd   :  { %3178 = vmatprep.mubr.bf16.mxu1 %v8880_v0  ;;  %3350 = vmatprep.mubr.bf16.mxu0 %v8880_v0  ;;  %v8260_v19 = vld [vmem:[#allocation4 + $0x60] ss:$20 sps:$4 sm:$0xff]  }
 0x1bf   :  { %3149 = vmatpush1.bf16.msra.mxu1 %v8208_v20  ;;  %3321 = vmatpush1.bf16.msra.mxu0 %v8211_v22  ;;  %v8261_v20 = vld [vmem:[#allocation4 + $0x2e0] ss:$20 sps:$4 sm:$0xff]   ;;  %v8262_v22 = vld [vmem:[#allocation4 + $0x1c8] ss:$20 sps:$4 sm:$0xff]  }
 0x1c0   :  { %3150 = vmatprep.subr.bf16.mxu1 %v8216_v23  ;;  %3322 = vmatprep.subr.bf16.mxu0 %v8219_v24  ;;  %v8263_v23 = vld [vmem:[#allocation4 + $0x448] ss:$20 sps:$4 sm:$0xff]  }
 0x1c1   :  { %v8264_v24 = vld [vmem:[#allocation4 + $0x88] ss:$20 sps:$4 sm:$0xff]  }
 0x1c3   :  { %3151 = vmatpush1.bf16.msra.mxu1 %v8214_v25  ;;  %3323 = vmatpush1.bf16.msra.mxu0 %v8217_v26  ;;  %v8266_v25 = vld [vmem:[#allocation4 + $0x1f0] ss:$20 sps:$4 sm:$0xff]  }
 0x1c4   :  { %3152 = vmatprep.subr.bf16.mxu1 %v8222_v27  ;;  %3324 = vmatprep.subr.bf16.mxu0 %v8225_v28  ;;  %v8267_v26 = vld [vmem:[#allocation4 + $0x470] ss:$20 sps:$4 sm:$0xff]   ;;  %v8270_v28 = vld [vmem:[#allocation4 + $0x218] ss:$20 sps:$4 sm:$0xff]  }
 0x1c5   :  { %v8269_v27 = vld [vmem:[#allocation4 + $0x330] ss:$20 sps:$4 sm:$0xff]  }
 0x1c7   :  { %3153 = vmatpush1.bf16.msra.mxu1 %v8220_v30  ;;  %3325 = vmatpush1.bf16.msra.mxu0 %v8223_v33  ;;  %v8271_v30 = vld [vmem:[#allocation4 + $0x498] ss:$20 sps:$4 sm:$0xff]  }
 0x1c8   :  { %3154 = vmatprep.subr.bf16.mxu1 %v8228_v40  ;;  %3326 = vmatprep.subr.bf16.mxu0 %v8231_v41  ;;  %v8272_v33 = vld [vmem:[#allocation4 + $0xd8] ss:$20 sps:$4 sm:$0xff]   ;;  %v8274_v41 = vld [vmem:[#allocation4 + $0x240] ss:$20 sps:$4 sm:$0xff]  }
 0x1c9   :  { %v8273_v40 = vld [vmem:[#allocation4 + $0x358] ss:$20 sps:$4 sm:$0xff]  }
 0x1cb   :  { %3155 = vmatpush1.bf16.msra.mxu1 %v8226_v42  ;;  %3327 = vmatpush1.bf16.msra.mxu0 %v8229_v43  ;;  %v8275_v42 = vld [vmem:[#allocation4 + $0x4c0] ss:$20 sps:$4 sm:$0xff]  }
 0x1cc   :  { %3156 = vmatprep.subr.bf16.mxu1 %v8234_v44  ;;  %3328 = vmatprep.subr.bf16.mxu0 %v8237_v45  ;;  %v8276_v43 = vld [vmem:[#allocation4 + $0x100] ss:$20 sps:$4 sm:$0xff]   ;;  %v8278_v45 = vld [vmem:[#allocation4 + $0x268] ss:$20 sps:$4 sm:$0xff]  }
 0x1cd   :  { %v8277_v44 = vld [vmem:[#allocation4 + $0x380] ss:$20 sps:$4 sm:$0xff]  }
 0x1cf   :  { %3157 = vmatpush1.bf16.msra.mxu1 %v8232_v46  ;;  %3329 = vmatpush1.bf16.msra.mxu0 %v8235_v47  ;;  %v8279_v46 = vld [vmem:[#allocation4 + $0x4e8] ss:$20 sps:$4 sm:$0xff]  }
 0x1d0   :  { %3158 = vmatprep.subr.bf16.mxu1 %v8240_v50  ;;  %3330 = vmatprep.subr.bf16.mxu0 %v8243_v51  ;;  %v8280_v47 = vld [vmem:[#allocation4 + $0x128] ss:$20 sps:$4 sm:$0xff]   ;;  %v8282_v51 = vld [vmem:[#allocation4 + $0x650] ss:$20 sps:$4 sm:$0xff]  }
 0x1d1   :  { %v8281_v50 = vld [vmem:[#allocation4 + $0x3a8] ss:$20 sps:$4 sm:$0xff]  }
 0x1d3   :  { %3159 = vmatpush1.bf16.msra.mxu1 %v8238_v53  ;;  %3331 = vmatpush1.bf16.msra.mxu0 %v8241_v57  ;;  %v8283_v53 = vld [vmem:[#allocation4 + $0x510] ss:$20 sps:$4 sm:$0xff]  }
 0x1d4   :  { %3160 = vmatprep.subr.bf16.mxu1 %v8246_v59  ;;  %3332 = vmatprep.subr.bf16.mxu0 %v8249_v61  ;;  %v8284_v57 = vld [vmem:[#allocation4 + $0x790] ss:$20 sps:$4 sm:$0xff]   ;;  %v8285_v59 = vld [vmem:[#allocation4 + $0x678] ss:$20 sps:$4 sm:$0xff]   ;;  %v8881_v61 = vmov 0.0  }
 0x1d7   :  { %3161 = vmatpush1.bf16.msra.mxu1 %v8244_v63  ;;  %3333 = vmatpush1.bf16.msra.mxu0 %v8247_v3  ;;  %v8286_v63 = vld [vmem:[#allocation4 + $0x538] ss:$20 sps:$4 sm:$0xff]  }
 0x1d8   :  { %7510 = vmatprep.subr.bf16.mxu0 %v8250_v6  ;;  %7532 = vmatprep.subr.bf16.mxu1 %v8251_v7  ;;  %v8287_v3 = vld [vmem:[#allocation4 + $0x7b8] ss:$20 sps:$4 sm:$0xff]   ;;  %v8288_v6 = vld [vmem:[#allocation4 + $0x6a0] ss:$20 sps:$4 sm:$0xff]  }
 0x1d9   :  { %v8289_v7 = vld [vmem:[#allocation4 + $0x560] ss:$20 sps:$4 sm:$0xff]  }
 0x1da   :  { %3179 = vmatmul.mubr.bf16.vlgmr.msra.gmra.mrb[12].mxu1 %v9036_v5  ;;  %3351 = vmatmul.mubr.bf16.vlgmr.msra.gmra.mrb[16].mxu0 %v9036_v5 }
 0x1db   :  { %7511 = vmatpush3.bf16.msra.mxu0 %v8252_v9  ;;  %3393 = vmatprep.mubr.bf16.mxu0 %v9020_v39  ;;  %v8265_v39 = vld [vmem:[#allocation4 + $0x308] ss:$20 sps:$4 sm:$0xff]  }
 0x1dc   :  { %7533 = vmatpush3.bf16.msra.mxu1 %v8253_v12  ;;  %3434 = vmatprep.mubr.bf16.mxu1 %v9028_v34  ;;  %v8268_v34 = vld [vmem:[#allocation4 + $0xb0] ss:$20 sps:$4 sm:$0xff]   ;;  %v8291_v9 = vld [vmem:[#allocation4 + $0x6c8] ss:$20 sps:$4 sm:$0xff]  }
 0x1dd   :  { %7512 = vmatprep.subr.bf16.mxu0 %v8254_v13  ;;  %7534 = vmatprep.subr.bf16.mxu1 %v8255_v14  ;;  %v8294_v12 = vld [vmem:[#allocation4 + $0x6f0] ss:$20 sps:$4 sm:$0xff]  }
 0x1de   :  { %v8295_v13 = vld [vmem:[#allocation4 + $0x5b0] ss:$20 sps:$4 sm:$0xff]  }
 0x1df   :  { %7513 = vmatpush3.bf16.msra.mxu0 %v8256_v15  ;;  %v8296_v14 = vld [vmem:[#allocation4 + $0x830] ss:$20 sps:$4 sm:$0xff]   ;;  %v8297_v15 = vld [vmem:[#allocation4 + $0x718] ss:$20 sps:$4 sm:$0xff]  }
 0x1e0   :  { %7535 = vmatpush3.bf16.msra.mxu1 %v8257_v16  ;;  %7514 = vmatprep.subr.bf16.mxu0 %v8258_v17  ;;  %v8298_v16 = vld [vmem:[#allocation4 + $0x5d8] ss:$20 sps:$4 sm:$0xff]  }
 0x1e1   :  { %7536 = vmatprep.subr.bf16.mxu1 %v8259_v18  ;;  %v8299_v17 = vld [vmem:[#allocation4 + $0x858] ss:$20 sps:$4 sm:$0xff]   ;;  %v8300_v18 = vld [vmem:[#allocation4 + $0x740] ss:$20 sps:$4 sm:$0xff]  }
 0x1e3   :  { %7515 = vmatpush3.bf16.msra.mxu0 %v8260_v19  ;;  %v8301_v19 = vld [vmem:[#allocation4 + $0x600] ss:$20 sps:$4 sm:$0xff]  }
 0x1e4   :  { %7537 = vmatpush3.bf16.msra.mxu1 %v8261_v20  ;;  %7516 = vmatprep.subr.bf16.mxu0 %v8262_v22  ;;  %v8302_v20 = vld [vmem:[#allocation4 + $0x880] ss:$20 sps:$4 sm:$0xff]   ;;  %v8303_v22 = vld [vmem:[#allocation4 + $0x768] ss:$20 sps:$4 sm:$0xff]  }
 0x1e5   :  { %7538 = vmatprep.subr.bf16.mxu1 %v8263_v23  ;;  %v8304_v23 = vld [vmem:[#allocation4 + $0x628] ss:$20 sps:$4 sm:$0xff]  }
 0x1e7   :  { %7517 = vmatpush3.bf16.msra.mxu0 %v8264_v24  ;;  %v8305_v24 = vld [vmem:[#allocation4 + $0x8a8] ss:$20 sps:$4 sm:$0xff]  }
 0x1e8   :  { %7539 = vmatpush3.bf16.msra.mxu1 %v8265_v39  ;;  %7518 = vmatprep.subr.bf16.mxu0 %v8266_v25  ;;  %v8308_v39 = vld [vmem:[#allocation6 + $0x4] ss:$20 sps:$4 sm:$0xff]  }
 0x1e9   :  { %7540 = vmatprep.subr.bf16.mxu1 %v8267_v26  ;;  %v8311_v25 = vld [vmem:[#allocation6 + $0x284] ss:$20 sps:$4 sm:$0xff]   ;;  %v8306_v26 = vld [vmem:[#allocation6] ss:$20 sps:$4 sm:$0xff]  }
 0x1eb   :  { %7519 = vmatpush3.bf16.msra.mxu0 %v8268_v34  ;;  %v8309_v34 = vld [vmem:[#allocation6 + $0x280] ss:$20 sps:$4 sm:$0xff]  }
 0x1ec   :  { %7541 = vmatpush3.bf16.msra.mxu1 %v8269_v27  ;;  %7520 = vmatprep.subr.bf16.mxu0 %v8270_v28  ;;  %v8314_v27 = vld [vmem:[#allocation6 + $0x2c] ss:$20 sps:$4 sm:$0xff]  }
 0x1ed   :  { %7542 = vmatprep.subr.bf16.mxu1 %v8271_v30  ;;  %v8317_v28 = vld [vmem:[#allocation6 + $0x2ac] ss:$20 sps:$4 sm:$0xff]   ;;  %v8312_v30 = vld [vmem:[#allocation6 + $0x28] ss:$20 sps:$4 sm:$0xff]  }
 0x1ef   :  { %7521 = vmatpush3.bf16.msra.mxu0 %v8272_v33  ;;  %v8315_v33 = vld [vmem:[#allocation6 + $0x2a8] ss:$20 sps:$4 sm:$0xff]  }
 0x1f0   :  { %7543 = vmatpush3.bf16.msra.mxu1 %v8273_v40  ;;  %7522 = vmatprep.subr.bf16.mxu0 %v8274_v41  ;;  %v8320_v40 = vld [vmem:[#allocation6 + $0x54] ss:$20 sps:$4 sm:$0xff]  }
 0x1f1   :  { %7544 = vmatprep.subr.bf16.mxu1 %v8275_v42  ;;  %v8323_v41 = vld [vmem:[#allocation6 + $0x2d4] ss:$20 sps:$4 sm:$0xff]   ;;  %v8318_v42 = vld [vmem:[#allocation6 + $0x50] ss:$20 sps:$4 sm:$0xff]  }
 0x1f3   :  { %7523 = vmatpush3.bf16.msra.mxu0 %v8276_v43  ;;  %v8326_v43 = vld [vmem:[#allocation6 + $0x7c] ss:$20 sps:$4 sm:$0xff]  }
 0x1f4   :  { %7545 = vmatpush3.bf16.msra.mxu1 %v8277_v44  ;;  %7524 = vmatprep.subr.bf16.mxu0 %v8278_v45  ;;  %v8324_v44 = vld [vmem:[#allocation6 + $0x78] ss:$20 sps:$4 sm:$0xff]  }
 0x1f5   :  { %7546 = vmatprep.subr.bf16.mxu1 %v8279_v46  ;;  %v8327_v45 = vld [vmem:[#allocation6 + $0x2f8] ss:$20 sps:$4 sm:$0xff]  }
 0x1f6   :  { %v8332_v46 = vld [vmem:[#allocation6 + $0xa4] ss:$20 sps:$4 sm:$0xff]  }
 0x1f7   :  { %7525 = vmatpush3.bf16.msra.mxu0 %v8280_v47  ;;  %v8335_v47 = vld [vmem:[#allocation6 + $0x324] ss:$20 sps:$4 sm:$0xff]  }
 0x1f8   :  { %7547 = vmatpush3.bf16.msra.mxu1 %v8281_v50  ;;  %7554 = vmatprep.subr.bf16.mxu0 %v8282_v51  ;;  %v8330_v50 = vld [vmem:[#allocation6 + $0xa0] ss:$20 sps:$4 sm:$0xff]  }
 0x1f9   :  { %7766 = vmatprep.subr.bf16.mxu1 %v8881_v61  ;;  %v8333_v51 = vld [vmem:[#allocation6 + $0x320] ss:$20 sps:$4 sm:$0xff]  }
 0x1fa   :  { %3394 = vmatmul.mubr.bf16.vlgmr.msra.gmra.mrb[24].mxu0 %v9018_v21  ;;  %v8290_v21 = vld [vmem:[#allocation4 + $0x7e0] ss:$20 sps:$4 sm:$0xff]  }
 0x1fb   :  { %3435 = vmatmul.mubr.bf16.vlgmr.msra.gmra.mrb[24].mxu1 %v9026_v31  ;;  %7555 = vmatpush3.bf16.msra.mxu0 %v8283_v53  ;;  %v8292_v31 = vld [vmem:[#allocation4 + $0x588] ss:$20 sps:$4 sm:$0xff]   ;;  %v8338_v53 = vld [vmem:[#allocation6 + $0xcc] ss:$20 sps:$4 sm:$0xff]  }
 0x1fc   :  { %3475 = vmatprep.mubr.bf16.mxu0 %v9034_v60  ;;  %7767 = vmatpush3.bf16.msra.mxu1 %v8284_v57  ;;  %v8293_v60 = vld [vmem:[#allocation4 + $0x808] ss:$20 sps:$4 sm:$0xff]   ;;  %v8341_v57 = vld [vmem:[#allocation6 + $0x34c] ss:$20 sps:$4 sm:$0xff]  }
 0x1fd   :  { %7556 = vmatprep.subr.bf16.mxu0 %v8285_v59  ;;  %7768 = vmatprep.subr.bf16.mxu1 %v8881_v61  ;;  %v8336_v59 = vld [vmem:[#allocation6 + $0xc8] ss:$20 sps:$4 sm:$0xff]  }
 0x1fe   :  { %7782 = vmatprep.mubr.msk.bf16.mxu1 %vm8882_vm1, %v8881_v61 }
 0x1ff   :  { %7557 = vmatpush3.bf16.msra.mxu0 %v8286_v63  ;;  %v8339_v63 = vld [vmem:[#allocation6 + $0x348] ss:$20 sps:$4 sm:$0xff]  }
 0x200   :  { %7769 = vmatpush3.bf16.msra.mxu1 %v8287_v3  ;;  %7558 = vmatprep.subr.bf16.mxu0 %v8288_v6  ;;  %v8344_v3 = vld [vmem:[#allocation6 + $0xf4] ss:$20 sps:$4 sm:$0xff]  }
 0x201   :  { %7770 = vmatprep.subr.bf16.mxu1 %v8881_v61  ;;  %v8347_v6 = vld [vmem:[#allocation6 + $0x374] ss:$20 sps:$4 sm:$0xff]  }
 0x203   :  { %7559 = vmatpush3.bf16.msra.mxu0 %v8289_v7  ;;  %v8342_v7 = vld [vmem:[#allocation6 + $0xf0] ss:$20 sps:$4 sm:$0xff]  }
 0x204   :  { %7771 = vmatpush3.bf16.msra.mxu1 %v8290_v21  ;;  %7560 = vmatprep.subr.bf16.mxu0 %v8291_v9  ;;  %v8345_v21 = vld [vmem:[#allocation6 + $0x370] ss:$20 sps:$4 sm:$0xff]  }
 0x205   :  { %7772 = vmatprep.subr.bf16.mxu1 %v8881_v61  ;;  %v8350_v9 = vld [vmem:[#allocation6 + $0x11c] ss:$20 sps:$4 sm:$0xff]  }
 0x207   :  { %7561 = vmatpush3.bf16.msra.mxu0 %v8292_v31  ;;  %v8353_v31 = vld [vmem:[#allocation6 + $0x39c] ss:$20 sps:$4 sm:$0xff]  }
 0x208   :  { %7773 = vmatpush3.bf16.msra.mxu1 %v8293_v60  ;;  %7562 = vmatprep.subr.bf16.mxu0 %v8294_v12  ;;  %v8348_v60 = vld [vmem:[#allocation6 + $0x118] ss:$20 sps:$4 sm:$0xff]  }
 0x209   :  { %7774 = vmatprep.subr.bf16.mxu1 %v8881_v61  ;;  %v8351_v12 = vld [vmem:[#allocation6 + $0x398] ss:$20 sps:$4 sm:$0xff]  }
 0x20b   :  { %7563 = vmatpush3.bf16.msra.mxu0 %v8295_v13  ;;  %v8356_v13 = vld [vmem:[#allocation6 + $0x144] ss:$20 sps:$4 sm:$0xff]  }
 0x20c   :  { %7775 = vmatpush3.bf16.msra.mxu1 %v8296_v14  ;;  %7564 = vmatprep.subr.bf16.mxu0 %v8297_v15  ;;  %v8359_v14 = vld [vmem:[#allocation6 + $0x3c4] ss:$20 sps:$4 sm:$0xff]   ;;  %v8354_v15 = vld [vmem:[#allocation6 + $0x140] ss:$20 sps:$4 sm:$0xff]  }
 0x20d   :  { %7776 = vmatprep.subr.bf16.mxu1 %v8881_v61 }
 0x20f   :  { %7565 = vmatpush3.bf16.msra.mxu0 %v8298_v16  ;;  %v8357_v16 = vld [vmem:[#allocation6 + $0x3c0] ss:$20 sps:$4 sm:$0xff]  }
 0x210   :  { %7777 = vmatpush3.bf16.msra.mxu1 %v8299_v17  ;;  %7566 = vmatprep.subr.bf16.mxu0 %v8300_v18  ;;  %v8362_v17 = vld [vmem:[#allocation6 + $0x16c] ss:$20 sps:$4 sm:$0xff]  }
 0x211   :  { %7778 = vmatprep.subr.bf16.mxu1 %v8881_v61  ;;  %v8365_v18 = vld [vmem:[#allocation6 + $0x3ec] ss:$20 sps:$4 sm:$0xff]  }
 0x213   :  { %7567 = vmatpush3.bf16.msra.mxu0 %v8301_v19  ;;  %v8360_v19 = vld [vmem:[#allocation6 + $0x168] ss:$20 sps:$4 sm:$0xff]  }
 0x214   :  { %7779 = vmatpush3.bf16.msra.mxu1 %v8302_v20  ;;  %7568 = vmatprep.subr.bf16.mxu0 %v8303_v22  ;;  %v8363_v20 = vld [vmem:[#allocation6 + $0x3e8] ss:$20 sps:$4 sm:$0xff]  }
 0x215   :  { %7780 = vmatprep.subr.bf16.mxu1 %v8881_v61  ;;  %v8368_v22 = vld [vmem:[#allocation6 + $0x194] ss:$20 sps:$4 sm:$0xff]  }
 0x217   :  { %7569 = vmatpush3.bf16.msra.mxu0 %v8304_v23  ;;  %v8371_v23 = vld [vmem:[#allocation6 + $0x414] ss:$20 sps:$4 sm:$0xff]  }
 0x218   :  { %7781 = vmatpush3.bf16.msra.mxu1 %v8305_v24  ;;  %5332 = vmatprep.subr.bf16.mxu0 %v8308_v39  ;;  %v8366_v24 = vld [vmem:[#allocation6 + $0x190] ss:$20 sps:$4 sm:$0xff]  }
 0x219   :  { %5375 = vmatprep.subr.bf16.mxu1 %v8311_v25  ;;  %v8369_v39 = vld [vmem:[#allocation6 + $0x410] ss:$20 sps:$4 sm:$0xff]  }
 0x21a   :  { %3476 = vmatmul.mubr.bf16.vlgmr.msra.gmra.mrb[28].mxu0 %v9032_v55  ;;  %v8321_v55 = vld [vmem:[#allocation6 + $0x2d0] ss:$20 sps:$4 sm:$0xff]  }
 0x21b   :  { %7783 = vmatmul.mubr.bf16.vlgmr.msra.gmra.mrb[28].mxu1 %v9036_v5  ;;  %5333 = vmatpush1.bf16.msra.mxu0 %v8306_v26  ;;  %v8329_v5 = vld [vmem:[#allocation6 + $0x2fc] ss:$20 sps:$4 sm:$0xff]  }
 0x21c   :  { %5364 = vmatprep.mubr.bf16.mxu0 %v9040_v32  ;;  %5376 = vmatpush1.bf16.msra.mxu1 %v8309_v34  ;;  %v8374_v25 = vld [vmem:[#allocation6 + $0x1bc] ss:$20 sps:$4 sm:$0xff]   ;;  %v8372_v34 = vld [vmem:[#allocation6 + $0x1b8] ss:$20 sps:$4 sm:$0xff]  }
 0x21d   :  { %5407 = vmatprep.mubr.bf16.mxu1 %v9044_v48  ;;  %5334 = vmatprep.subr.bf16.mxu0 %v8314_v27  ;;  %v8377_v26 = vld [vmem:[#allocation6 + $0x43c] ss:$20 sps:$4 sm:$0xff]   ;;  %v8375_v27 = vld [vmem:[#allocation6 + $0x438] ss:$20 sps:$4 sm:$0xff]  }
 0x21e   :  { %5377 = vmatprep.subr.bf16.mxu1 %v8317_v28  ;;  %v8380_v28 = vld [vmem:[#allocation6 + $0x1e4] ss:$20 sps:$4 sm:$0xff]  }
 0x21f   :  { %5335 = vmatpush1.bf16.msra.mxu0 %v8312_v30  ;;  %v8383_v30 = vld [vmem:[#allocation6 + $0x464] ss:$20 sps:$4 sm:$0xff]  }
 0x220   :  { %5378 = vmatpush1.bf16.msra.mxu1 %v8315_v33  ;;  %5336 = vmatprep.subr.bf16.mxu0 %v8320_v40  ;;  %v8378_v33 = vld [vmem:[#allocation6 + $0x1e0] ss:$20 sps:$4 sm:$0xff]  }
 0x221   :  { %5379 = vmatprep.subr.bf16.mxu1 %v8323_v41  ;;  %v8381_v40 = vld [vmem:[#allocation6 + $0x460] ss:$20 sps:$4 sm:$0xff]  }
 0x222   :  { %v8386_v41 = vld [vmem:[#allocation6 + $0x20c] ss:$20 sps:$4 sm:$0xff]  }
 0x223   :  { %5337 = vmatpush1.bf16.msra.mxu0 %v8318_v42  ;;  %v8389_v42 = vld [vmem:[#allocation6 + $0x48c] ss:$20 sps:$4 sm:$0xff]  }
 0x224   :  { %5380 = vmatpush1.bf16.msra.mxu1 %v8321_v55  ;;  %5338 = vmatprep.subr.bf16.mxu0 %v8326_v43  ;;  %v8384_v55 = vld [vmem:[#allocation6 + $0x208] ss:$20 sps:$4 sm:$0xff]  }
 0x225   :  { %5381 = vmatprep.subr.bf16.mxu1 %v8329_v5  ;;  %v8387_v43 = vld [vmem:[#allocation6 + $0x488] ss:$20 sps:$4 sm:$0xff]  }
 0x226   :  { %v8392_v5 = vld [vmem:[#allocation6 + $0x234] ss:$20 sps:$4 sm:$0xff]  }
 0x227   :  { %5339 = vmatpush1.bf16.msra.mxu0 %v8324_v44  ;;  %v8395_v44 = vld [vmem:[#allocation6 + $0x4b4] ss:$20 sps:$4 sm:$0xff]  }
 0x228   :  { %5382 = vmatpush1.bf16.msra.mxu1 %v8327_v45  ;;  %5340 = vmatprep.subr.bf16.mxu0 %v8332_v46  ;;  %v8390_v45 = vld [vmem:[#allocation6 + $0x230] ss:$20 sps:$4 sm:$0xff]  }
 0x229   :  { %5383 = vmatprep.subr.bf16.mxu1 %v8335_v47  ;;  %v8393_v46 = vld [vmem:[#allocation6 + $0x4b0] ss:$20 sps:$4 sm:$0xff]  }
 0x22a   :  { %v8398_v47 = vld [vmem:[#allocation6 + $0x25c] ss:$20 sps:$4 sm:$0xff]  }
 0x22b   :  { %5341 = vmatpush1.bf16.msra.mxu0 %v8330_v50  ;;  %v8401_v50 = vld [vmem:[#allocation6 + $0x4dc] ss:$20 sps:$4 sm:$0xff]  }
 0x22c   :  { %5384 = vmatpush1.bf16.msra.mxu1 %v8333_v51  ;;  %5342 = vmatprep.subr.bf16.mxu0 %v8338_v53  ;;  %v8396_v51 = vld [vmem:[#allocation6 + $0x258] ss:$20 sps:$4 sm:$0xff]  }
 0x22d   :  { %5385 = vmatprep.subr.bf16.mxu1 %v8341_v57  ;;  %v8399_v53 = vld [vmem:[#allocation6 + $0x4d8] ss:$20 sps:$4 sm:$0xff]  }
 0x22e   :  { %v8407_v57 = vld [vmem:[#allocation6 + $0xc] ss:$20 sps:$4 sm:$0xff]  }
 0x22f   :  { %5343 = vmatpush1.bf16.msra.mxu0 %v8336_v59  ;;  %v8404_v59 = vld [vmem:[#allocation6 + $0x504] ss:$20 sps:$4 sm:$0xff]  }
 0x230   :  { %5386 = vmatpush1.bf16.msra.mxu1 %v8339_v63  ;;  %5344 = vmatprep.subr.bf16.mxu0 %v8344_v3  ;;  %v8405_v63 = vld [vmem:[#allocation6 + $0x8] ss:$20 sps:$4 sm:$0xff]   ;;  %v8402_v3 = vld [vmem:[#allocation6 + $0x500] ss:$20 sps:$4 sm:$0xff]  }
 0x231   :  { %5387 = vmatprep.subr.bf16.mxu1 %v8347_v6  ;;  %v8410_v6 = vld [vmem:[#allocation6 + $0x52c] ss:$20 sps:$4 sm:$0xff]  }
 0x233   :  { %5345 = vmatpush1.bf16.msra.mxu0 %v8342_v7  ;;  %v8413_v7 = vld [vmem:[#allocation6 + $0x34] ss:$20 sps:$4 sm:$0xff]  }
 0x234   :  { %5388 = vmatpush1.bf16.msra.mxu1 %v8345_v21  ;;  %5346 = vmatprep.subr.bf16.mxu0 %v8350_v9  ;;  %v8411_v21 = vld [vmem:[#allocation6 + $0x30] ss:$20 sps:$4 sm:$0xff]   ;;  %v8408_v9 = vld [vmem:[#allocation6 + $0x528] ss:$20 sps:$4 sm:$0xff]  }
 0x235   :  { %5389 = vmatprep.subr.bf16.mxu1 %v8353_v31  ;;  %v8419_v31 = vld [vmem:[#allocation6 + $0x5c] ss:$20 sps:$4 sm:$0xff]  }
 0x237   :  { %5347 = vmatpush1.bf16.msra.mxu0 %v8348_v60  ;;  %v8416_v60 = vld [vmem:[#allocation6 + $0x554] ss:$20 sps:$4 sm:$0xff]  }
 0x238   :  { %5390 = vmatpush1.bf16.msra.mxu1 %v8351_v12  ;;  %5348 = vmatprep.subr.bf16.mxu0 %v8356_v13  ;;  %v8417_v12 = vld [vmem:[#allocation6 + $0x58] ss:$20 sps:$4 sm:$0xff]   ;;  %v8414_v13 = vld [vmem:[#allocation6 + $0x550] ss:$20 sps:$4 sm:$0xff]  }
 0x239   :  { %5391 = vmatprep.subr.bf16.mxu1 %v8359_v14  ;;  %v8425_v14 = vld [vmem:[#allocation6 + $0x84] ss:$20 sps:$4 sm:$0xff]  }
 0x23b   :  { %5349 = vmatpush1.bf16.msra.mxu0 %v8354_v15  ;;  %v8422_v15 = vld [vmem:[#allocation6 + $0x57c] ss:$20 sps:$4 sm:$0xff]  }
 0x23c   :  { %5392 = vmatpush1.bf16.msra.mxu1 %v8357_v16  ;;  %5350 = vmatprep.subr.bf16.mxu0 %v8362_v17  ;;  %v8423_v16 = vld [vmem:[#allocation6 + $0x80] ss:$20 sps:$4 sm:$0xff]   ;;  %v8420_v17 = vld [vmem:[#allocation6 + $0x578] ss:$20 sps:$4 sm:$0xff]  }
 0x23d   :  { %5393 = vmatprep.subr.bf16.mxu1 %v8365_v18  ;;  %v8431_v18 = vld [vmem:[#allocation6 + $0xac] ss:$20 sps:$4 sm:$0xff]  }
 0x23f   :  { %5351 = vmatpush1.bf16.msra.mxu0 %v8360_v19  ;;  %v8428_v19 = vld [vmem:[#allocation6 + $0x5a4] ss:$20 sps:$4 sm:$0xff]  }
 0x240   :  { %5394 = vmatpush1.bf16.msra.mxu1 %v8363_v20  ;;  %5352 = vmatprep.subr.bf16.mxu0 %v8368_v22  ;;  %v8429_v20 = vld [vmem:[#allocation6 + $0xa8] ss:$20 sps:$4 sm:$0xff]   ;;  %v8426_v22 = vld [vmem:[#allocation6 + $0x5a0] ss:$20 sps:$4 sm:$0xff]  }
 0x241   :  { %5395 = vmatprep.subr.bf16.mxu1 %v8371_v23  ;;  %v8437_v23 = vld [vmem:[#allocation6 + $0xd4] ss:$20 sps:$4 sm:$0xff]  }
 0x243   :  { %5353 = vmatpush1.bf16.msra.mxu0 %v8366_v24  ;;  %v8434_v24 = vld [vmem:[#allocation6 + $0x5cc] ss:$20 sps:$4 sm:$0xff]  }
 0x244   :  { %5396 = vmatpush1.bf16.msra.mxu1 %v8369_v39  ;;  %5354 = vmatprep.subr.bf16.mxu0 %v8374_v25  ;;  %v8435_v39 = vld [vmem:[#allocation6 + $0xd0] ss:$20 sps:$4 sm:$0xff]   ;;  %v8432_v25 = vld [vmem:[#allocation6 + $0x5c8] ss:$20 sps:$4 sm:$0xff]  }
 0x245   :  { %5397 = vmatprep.subr.bf16.mxu1 %v8377_v26  ;;  %v8443_v26 = vld [vmem:[#allocation6 + $0xfc] ss:$20 sps:$4 sm:$0xff]  }
 0x247   :  { %5355 = vmatpush1.bf16.msra.mxu0 %v8372_v34  ;;  %v8440_v34 = vld [vmem:[#allocation6 + $0x5f4] ss:$20 sps:$4 sm:$0xff]  }
 0x248   :  { %5398 = vmatpush1.bf16.msra.mxu1 %v8375_v27  ;;  %5356 = vmatprep.subr.bf16.mxu0 %v8380_v28  ;;  %v8441_v27 = vld [vmem:[#allocation6 + $0xf8] ss:$20 sps:$4 sm:$0xff]   ;;  %v8438_v28 = vld [vmem:[#allocation6 + $0x5f0] ss:$20 sps:$4 sm:$0xff]  }
 0x249   :  { %5399 = vmatprep.subr.bf16.mxu1 %v8383_v30  ;;  %v8449_v30 = vld [vmem:[#allocation6 + $0x124] ss:$20 sps:$4 sm:$0xff]  }
 0x24b   :  { %5357 = vmatpush1.bf16.msra.mxu0 %v8378_v33  ;;  %v8446_v33 = vld [vmem:[#allocation6 + $0x61c] ss:$20 sps:$4 sm:$0xff]  }
 0x24c   :  { %5400 = vmatpush1.bf16.msra.mxu1 %v8381_v40  ;;  %5358 = vmatprep.subr.bf16.mxu0 %v8386_v41  ;;  %v8447_v40 = vld [vmem:[#allocation6 + $0x120] ss:$20 sps:$4 sm:$0xff]   ;;  %v8444_v41 = vld [vmem:[#allocation6 + $0x618] ss:$20 sps:$4 sm:$0xff]  }
 0x24d   :  { %5401 = vmatprep.subr.bf16.mxu1 %v8389_v42  ;;  %v8455_v42 = vld [vmem:[#allocation6 + $0x14c] ss:$20 sps:$4 sm:$0xff]  }
 0x24f   :  { %5359 = vmatpush1.bf16.msra.mxu0 %v8384_v55  ;;  %v8452_v55 = vld [vmem:[#allocation6 + $0x644] ss:$20 sps:$4 sm:$0xff]  }
 0x250   :  { %5402 = vmatpush1.bf16.msra.mxu1 %v8387_v43  ;;  %5360 = vmatprep.subr.bf16.mxu0 %v8392_v5  ;;  %v8453_v43 = vld [vmem:[#allocation6 + $0x148] ss:$20 sps:$4 sm:$0xff]   ;;  %v8450_v5 = vld [vmem:[#allocation6 + $0x640] ss:$20 sps:$4 sm:$0xff]  }
 0x251   :  { %5403 = vmatprep.subr.bf16.mxu1 %v8395_v44  ;;  %v8461_v44 = vld [vmem:[#allocation6 + $0x174] ss:$20 sps:$4 sm:$0xff]  }
 0x253   :  { %5361 = vmatpush1.bf16.msra.mxu0 %v8390_v45  ;;  %v8458_v45 = vld [vmem:[#allocation6 + $0x66c] ss:$20 sps:$4 sm:$0xff]  }
 0x254   :  { %5404 = vmatpush1.bf16.msra.mxu1 %v8393_v46  ;;  %5362 = vmatprep.subr.bf16.mxu0 %v8398_v47  ;;  %v8459_v46 = vld [vmem:[#allocation6 + $0x170] ss:$20 sps:$4 sm:$0xff]   ;;  %v8456_v47 = vld [vmem:[#allocation6 + $0x668] ss:$20 sps:$4 sm:$0xff]  }
 0x255   :  { %5405 = vmatprep.subr.bf16.mxu1 %v8401_v50  ;;  %v8467_v50 = vld [vmem:[#allocation6 + $0x19c] ss:$20 sps:$4 sm:$0xff]  }
 0x257   :  { %5363 = vmatpush1.bf16.msra.mxu0 %v8396_v51  ;;  %v8464_v51 = vld [vmem:[#allocation6 + $0x694] ss:$20 sps:$4 sm:$0xff]  }
 0x258   :  { %5406 = vmatpush1.bf16.msra.mxu1 %v8399_v53  ;;  %5504 = vmatprep.subr.bf16.mxu0 %v8407_v57  ;;  %v8465_v53 = vld [vmem:[#allocation6 + $0x198] ss:$20 sps:$4 sm:$0xff]   ;;  %v8462_v57 = vld [vmem:[#allocation6 + $0x690] ss:$20 sps:$4 sm:$0xff]  }
 0x259   :  { %5418 = vmatprep.subr.bf16.mxu1 %v8404_v59  ;;  %v8473_v59 = vld [vmem:[#allocation6 + $0x1c4] ss:$20 sps:$4 sm:$0xff]  }
 0x25a   :  { %5365 = vmatmul.mubr.bf16.vlgmr.msra.gmra.mrb[32].mxu0 %v9038_v8 }
 0x25b   :  { %5408 = vmatmul.mubr.bf16.vlgmr.msra.gmra.mrb[32].mxu1 %v9042_v36  ;;  %5505 = vmatpush1.bf16.msra.mxu0 %v8405_v63  ;;  %v8470_v63 = vld [vmem:[#allocation6 + $0x6bc] ss:$20 sps:$4 sm:$0xff]  }
 0x25c   :  { %5419 = vmatpush1.bf16.msra.mxu1 %v8402_v3  ;;  %5450 = vmatprep.mubr.bf16.mxu1 %v9048_v10  ;;  %v8471_v3 = vld [vmem:[#allocation6 + $0x1c0] ss:$20 sps:$4 sm:$0xff]  }
 0x25d   :  { %5536 = vmatprep.mubr.bf16.mxu0 %v9040_v32  ;;  %5420 = vmatprep.subr.bf16.mxu1 %v8410_v6  ;;  %v8468_v6 = vld [vmem:[#allocation6 + $0x6b8] ss:$20 sps:$4 sm:$0xff]  }
 0x25e   :  { %5506 = vmatprep.subr.bf16.mxu0 %v8413_v7  ;;  %v8479_v7 = vld [vmem:[#allocation6 + $0x1ec] ss:$20 sps:$4 sm:$0xff]  }
 0x25f   :  { %5507 = vmatpush1.bf16.msra.mxu0 %v8411_v21  ;;  %v8476_v21 = vld [vmem:[#allocation6 + $0x6e4] ss:$20 sps:$4 sm:$0xff]  }
 0x260   :  { %5421 = vmatpush1.bf16.msra.mxu1 %v8408_v9  ;;  %5508 = vmatprep.subr.bf16.mxu0 %v8419_v31  ;;  %v8477_v9 = vld [vmem:[#allocation6 + $0x1e8] ss:$20 sps:$4 sm:$0xff]   ;;  %v8474_v31 = vld [vmem:[#allocation6 + $0x6e0] ss:$20 sps:$4 sm:$0xff]  }
 0x261   :  { %5422 = vmatprep.subr.bf16.mxu1 %v8416_v60  ;;  %v8485_v60 = vld [vmem:[#allocation6 + $0x214] ss:$20 sps:$4 sm:$0xff]  }
 0x263   :  { %5509 = vmatpush1.bf16.msra.mxu0 %v8417_v12  ;;  %v8482_v12 = vld [vmem:[#allocation6 + $0x70c] ss:$20 sps:$4 sm:$0xff]  }
 0x264   :  { %5423 = vmatpush1.bf16.msra.mxu1 %v8414_v13  ;;  %5510 = vmatprep.subr.bf16.mxu0 %v8425_v14  ;;  %v8483_v13 = vld [vmem:[#allocation6 + $0x210] ss:$20 sps:$4 sm:$0xff]   ;;  %v8480_v14 = vld [vmem:[#allocation6 + $0x708] ss:$20 sps:$4 sm:$0xff]  }
 0x265   :  { %5424 = vmatprep.subr.bf16.mxu1 %v8422_v15  ;;  %v8491_v15 = vld [vmem:[#allocation6 + $0x23c] ss:$20 sps:$4 sm:$0xff]  }
 0x267   :  { %5511 = vmatpush1.bf16.msra.mxu0 %v8423_v16  ;;  %v8488_v16 = vld [vmem:[#allocation6 + $0x734] ss:$20 sps:$4 sm:$0xff]  }
 0x268   :  { %5425 = vmatpush1.bf16.msra.mxu1 %v8420_v17  ;;  %5512 = vmatprep.subr.bf16.mxu0 %v8431_v18  ;;  %v8489_v17 = vld [vmem:[#allocation6 + $0x238] ss:$20 sps:$4 sm:$0xff]   ;;  %v8486_v18 = vld [vmem:[#allocation6 + $0x730] ss:$20 sps:$4 sm:$0xff]  }
 0x269   :  { %5426 = vmatprep.subr.bf16.mxu1 %v8428_v19  ;;  %v8497_v19 = vld [vmem:[#allocation6 + $0x264] ss:$20 sps:$4 sm:$0xff]  }
 0x26b   :  { %5513 = vmatpush1.bf16.msra.mxu0 %v8429_v20  ;;  %v8494_v20 = vld [vmem:[#allocation6 + $0x75c] ss:$20 sps:$4 sm:$0xff]  }
 0x26c   :  { %5427 = vmatpush1.bf16.msra.mxu1 %v8426_v22  ;;  %5514 = vmatprep.subr.bf16.mxu0 %v8437_v23  ;;  %v8495_v22 = vld [vmem:[#allocation6 + $0x260] ss:$20 sps:$4 sm:$0xff]   ;;  %v8492_v23 = vld [vmem:[#allocation6 + $0x758] ss:$20 sps:$4 sm:$0xff]  }
 0x26d   :  { %5428 = vmatprep.subr.bf16.mxu1 %v8434_v24  ;;  %v8503_v24 = vld [vmem:[#allocation6 + $0x28c] ss:$20 sps:$4 sm:$0xff]  }
 0x26f   :  { %5515 = vmatpush1.bf16.msra.mxu0 %v8435_v39  ;;  %v8500_v39 = vld [vmem:[#allocation6 + $0x784] ss:$20 sps:$4 sm:$0xff]  }
 0x270   :  { %5429 = vmatpush1.bf16.msra.mxu1 %v8432_v25  ;;  %5516 = vmatprep.subr.bf16.mxu0 %v8443_v26  ;;  %v8501_v25 = vld [vmem:[#allocation6 + $0x288] ss:$20 sps:$4 sm:$0xff]   ;;  %v8498_v26 = vld [vmem:[#allocation6 + $0x780] ss:$20 sps:$4 sm:$0xff]  }
 0x271   :  { %5430 = vmatprep.subr.bf16.mxu1 %v8440_v34  ;;  %v8506_v34 = vld [vmem:[#allocation6 + $0x7ac] ss:$20 sps:$4 sm:$0xff]  }
 0x273   :  { %5517 = vmatpush1.bf16.msra.mxu0 %v8441_v27  ;;  %v8509_v27 = vld [vmem:[#allocation6 + $0x2b4] ss:$20 sps:$4 sm:$0xff]  }
 0x274   :  { %5431 = vmatpush1.bf16.msra.mxu1 %v8438_v28  ;;  %5518 = vmatprep.subr.bf16.mxu0 %v8449_v30  ;;  %v8507_v28 = vld [vmem:[#allocation6 + $0x2b0] ss:$20 sps:$4 sm:$0xff]   ;;  %v8504_v30 = vld [vmem:[#allocation6 + $0x7a8] ss:$20 sps:$4 sm:$0xff]  }
 0x275   :  { %5432 = vmatprep.subr.bf16.mxu1 %v8446_v33  ;;  %v8515_v33 = vld [vmem:[#allocation6 + $0x2dc] ss:$20 sps:$4 sm:$0xff]  }
 0x277   :  { %5519 = vmatpush1.bf16.msra.mxu0 %v8447_v40  ;;  %v8512_v40 = vld [vmem:[#allocation6 + $0x7d4] ss:$20 sps:$4 sm:$0xff]  }
 0x278   :  { %5433 = vmatpush1.bf16.msra.mxu1 %v8444_v41  ;;  %5520 = vmatprep.subr.bf16.mxu0 %v8455_v42  ;;  %v8513_v41 = vld [vmem:[#allocation6 + $0x2d8] ss:$20 sps:$4 sm:$0xff]   ;;  %v8510_v42 = vld [vmem:[#allocation6 + $0x7d0] ss:$20 sps:$4 sm:$0xff]  }
 0x279   :  { %5434 = vmatprep.subr.bf16.mxu1 %v8452_v55  ;;  %v8521_v55 = vld [vmem:[#allocation6 + $0x304] ss:$20 sps:$4 sm:$0xff]  }
 0x27b   :  { %5521 = vmatpush1.bf16.msra.mxu0 %v8453_v43  ;;  %v8518_v43 = vld [vmem:[#allocation6 + $0x7fc] ss:$20 sps:$4 sm:$0xff]  }
 0x27c   :  { %5435 = vmatpush1.bf16.msra.mxu1 %v8450_v5  ;;  %5522 = vmatprep.subr.bf16.mxu0 %v8461_v44  ;;  %v8519_v5 = vld [vmem:[#allocation6 + $0x300] ss:$20 sps:$4 sm:$0xff]   ;;  %v8516_v44 = vld [vmem:[#allocation6 + $0x7f8] ss:$20 sps:$4 sm:$0xff]  }
 0x27d   :  { %5436 = vmatprep.subr.bf16.mxu1 %v8458_v45  ;;  %v8527_v45 = vld [vmem:[#allocation6 + $0x32c] ss:$20 sps:$4 sm:$0xff]  }
 0x27f   :  { %5523 = vmatpush1.bf16.msra.mxu0 %v8459_v46  ;;  %v8524_v46 = vld [vmem:[#allocation6 + $0x824] ss:$20 sps:$4 sm:$0xff]  }
 0x280   :  { %5437 = vmatpush1.bf16.msra.mxu1 %v8456_v47  ;;  %5524 = vmatprep.subr.bf16.mxu0 %v8467_v50  ;;  %v8525_v47 = vld [vmem:[#allocation6 + $0x328] ss:$20 sps:$4 sm:$0xff]   ;;  %v8522_v50 = vld [vmem:[#allocation6 + $0x820] ss:$20 sps:$4 sm:$0xff]  }
 0x281   :  { %5438 = vmatprep.subr.bf16.mxu1 %v8464_v51  ;;  %v8533_v51 = vld [vmem:[#allocation6 + $0x354] ss:$20 sps:$4 sm:$0xff]  }
 0x283   :  { %5525 = vmatpush1.bf16.msra.mxu0 %v8465_v53  ;;  %v8530_v53 = vld [vmem:[#allocation6 + $0x84c] ss:$20 sps:$4 sm:$0xff]  }
 0x284   :  { %5439 = vmatpush1.bf16.msra.mxu1 %v8462_v57  ;;  %5526 = vmatprep.subr.bf16.mxu0 %v8473_v59  ;;  %v8531_v57 = vld [vmem:[#allocation6 + $0x350] ss:$20 sps:$4 sm:$0xff]   ;;  %v8528_v59 = vld [vmem:[#allocation6 + $0x848] ss:$20 sps:$4 sm:$0xff]  }
 0x285   :  { %5440 = vmatprep.subr.bf16.mxu1 %v8470_v63  ;;  %v8539_v63 = vld [vmem:[#allocation6 + $0x37c] ss:$20 sps:$4 sm:$0xff]  }
 0x287   :  { %5527 = vmatpush1.bf16.msra.mxu0 %v8471_v3 }
 0x288   :  { %5441 = vmatpush1.bf16.msra.mxu1 %v8468_v6  ;;  %5528 = vmatprep.subr.bf16.mxu0 %v8479_v7  ;;  %v8536_v7 = vld [vmem:[#allocation6 + $0x874] ss:$20 sps:$4 sm:$0xff]  }
 0x289   :  { %5442 = vmatprep.subr.bf16.mxu1 %v8476_v21 }
 0x28b   :  { %5529 = vmatpush1.bf16.msra.mxu0 %v8477_v9 }
 0x28c   :  { %5443 = vmatpush1.bf16.msra.mxu1 %v8474_v31  ;;  %5530 = vmatprep.subr.bf16.mxu0 %v8485_v60  ;;  %v8534_v31 = vld [vmem:[#allocation6 + $0x870] ss:$20 sps:$4 sm:$0xff]  }
 0x28d   :  { %5444 = vmatprep.subr.bf16.mxu1 %v8482_v12 }
 0x28f   :  { %5531 = vmatpush1.bf16.msra.mxu0 %v8483_v13  ;;  %v8537_v13 = vld [vmem:[#allocation6 + $0x378] ss:$20 sps:$4 sm:$0xff]  }
 0x290   :  { %5445 = vmatpush1.bf16.msra.mxu1 %v8480_v14  ;;  %5532 = vmatprep.subr.bf16.mxu0 %v8491_v15  ;;  %v8545_v14 = vld [vmem:[#allocation6 + $0x3a4] ss:$20 sps:$4 sm:$0xff]  }
 0x291   :  { %5446 = vmatprep.subr.bf16.mxu1 %v8488_v16 }
 0x293   :  { %5533 = vmatpush1.bf16.msra.mxu0 %v8489_v17 }
 0x294   :  { %5447 = vmatpush1.bf16.msra.mxu1 %v8486_v18  ;;  %5534 = vmatprep.subr.bf16.mxu0 %v8497_v19 }
 0x295   :  { %5448 = vmatprep.subr.bf16.mxu1 %v8494_v20 }
 0x297   :  { %5535 = vmatpush1.bf16.msra.mxu0 %v8495_v22 }
 0x298   :  { %5449 = vmatpush1.bf16.msra.mxu1 %v8492_v23  ;;  %5547 = vmatprep.subr.bf16.mxu0 %v8503_v24 }
 0x299   :  { %5461 = vmatprep.subr.bf16.mxu1 %v8500_v39 }
 0x29a   :  { %5537 = vmatmul.mubr.bf16.vlgmr.msra.gmra.mrb[36].mxu0 %v9038_v8 }
 0x29b   :  { %5451 = vmatmul.mubr.bf16.vlgmr.msra.gmra.mrb[32].mxu1 %v9046_v49  ;;  %5548 = vmatpush1.bf16.msra.mxu0 %v8501_v25  ;;  %v8542_v25 = vld [vmem:[#allocation6 + $0x89c] ss:$20 sps:$4 sm:$0xff]  }
 0x29c   :  { %5462 = vmatpush1.bf16.msra.mxu1 %v8498_v26  ;;  %5579 = vmatprep.mubr.bf16.mxu0 %v9044_v48 }
 0x29d   :  { %5463 = vmatprep.subr.bf16.mxu1 %v8506_v34  ;;  %5549 = vmatprep.subr.bf16.mxu0 %v8509_v27 }
 0x29e   :  { %5493 = vmatprep.mubr.bf16.mxu1 %v8880_v0 }
 0x29f   :  { %5550 = vmatpush1.bf16.msra.mxu0 %v8507_v28 }
 0x2a0   :  { %5464 = vmatpush1.bf16.msra.mxu1 %v8504_v30  ;;  %5551 = vmatprep.subr.bf16.mxu0 %v8515_v33  ;;  %v8543_v30 = vld [vmem:[#allocation6 + $0x3a0] ss:$20 sps:$4 sm:$0xff]   ;;  %v8540_v33 = vld [vmem:[#allocation6 + $0x898] ss:$20 sps:$4 sm:$0xff]  }
 0x2a1   :  { %5465 = vmatprep.subr.bf16.mxu1 %v8512_v40  ;;  %v8548_v40 = vld [vmem:[#allocation6 + $0x3cc] ss:$20 sps:$4 sm:$0xff]  }
 0x2a3   :  { %5552 = vmatpush1.bf16.msra.mxu0 %v8513_v41  ;;  %v8549_v41 = vld [vmem:[#allocation6 + $0x150] ss:$20 sps:$4 sm:$0xff]  }
 0x2a4   :  { %5466 = vmatpush1.bf16.msra.mxu1 %v8510_v42  ;;  %5553 = vmatprep.subr.bf16.mxu0 %v8521_v55  ;;  %v8546_v42 = vld [vmem:[#allocation6 + $0x3c8] ss:$20 sps:$4 sm:$0xff]   ;;  %v8550_v55 = vld [vmem:[#allocation6 + $0x10] ss:$20 sps:$4 sm:$0xff]  }
 0x2a5   :  { %5467 = vmatprep.subr.bf16.mxu1 %v8518_v43  ;;  %v8553_v43 = vld [vmem:[#allocation6 + $0x3f4] ss:$20 sps:$4 sm:$0xff]  }
 0x2a7   :  { %5554 = vmatpush1.bf16.msra.mxu0 %v8519_v5  ;;  %v8554_v5 = vld [vmem:[#allocation6 + $0x178] ss:$20 sps:$4 sm:$0xff]  }
 0x2a8   :  { %5468 = vmatpush1.bf16.msra.mxu1 %v8516_v44  ;;  %5555 = vmatprep.subr.bf16.mxu0 %v8527_v45  ;;  %v8551_v44 = vld [vmem:[#allocation6 + $0x3f0] ss:$20 sps:$4 sm:$0xff]   ;;  %v8555_v45 = vld [vmem:[#allocation6 + $0x38] ss:$20 sps:$4 sm:$0xff]  }
 0x2a9   :  { %5469 = vmatprep.subr.bf16.mxu1 %v8524_v46  ;;  %v8558_v46 = vld [vmem:[#allocation6 + $0x41c] ss:$20 sps:$4 sm:$0xff]  }
 0x2ab   :  { %5556 = vmatpush1.bf16.msra.mxu0 %v8525_v47  ;;  %v8559_v47 = vld [vmem:[#allocation6 + $0x1a0] ss:$20 sps:$4 sm:$0xff]  }
 0x2ac   :  { %5470 = vmatpush1.bf16.msra.mxu1 %v8522_v50  ;;  %5557 = vmatprep.subr.bf16.mxu0 %v8533_v51  ;;  %v8556_v50 = vld [vmem:[#allocation6 + $0x418] ss:$20 sps:$4 sm:$0xff]   ;;  %v8560_v51 = vld [vmem:[#allocation6 + $0x60] ss:$20 sps:$4 sm:$0xff]  }
 0x2ad   :  { %v3180_v3 = vpop.f32.mrb[12].mxu1  ;;  %v3352_v6 = vpop.f32.mrb[16].mxu0  ;;  %5471 = vmatprep.subr.bf16.mxu1 %v8530_v53  ;;  %v8563_v53 = vld [vmem:[#allocation6 + $0x444] ss:$20 sps:$4 sm:$0xff]  }
 0x2ae   :  { %v3182_v21 = vpop.f32.mrb[13].mxu1  ;;  %v3354_v9 = vpop.f32.mrb[17].mxu0  ;;  %v3525_v15 = vmax.f32 %v3180_v3, 0.0  ;;  %v3527_v16 = vmax.f32 %v3352_v6, 0.0  ;;  %v8568_v3 = vld [vmem:[#allocation6 + $0x46c] ss:$20 sps:$4 sm:$0xff]  }
 0x2af   :  { %v3184_v60 = vpop.f32.mrb[14].mxu1  ;;  %v3356_v12 = vpop.f32.mrb[18].mxu0  ;;  %5558 = vmatpush1.bf16.msra.mxu0 %v8531_v57  ;;  %v3526_v22 = vmax.f32 %v3182_v21, 0.0  ;;  %v3528_v23 = vmax.f32 %v3354_v9, 0.0  ;;  %v8564_v57 = vld [vmem:[#allocation6 + $0x1c8] ss:$20 sps:$4 sm:$0xff]  }
 0x2b0   :  { %v3530_v17 = vmax.f32 %v3184_v60, 0.0  ;;  %v3532_v18 = vmax.f32 %v3356_v12, 0.0  ;;  %5472 = vmatpush1.bf16.msra.mxu1 %v8528_v59  ;;  %v3186_v19 = vpop.f32.mrb[15].mxu1  ;;  %v3358_v20 = vpop.f32.mrb[19].mxu0  ;;  %5559 = vmatprep.subr.bf16.mxu0 %v8539_v63  ;;  %v8561_v59 = vld [vmem:[#allocation6 + $0x440] ss:$20 sps:$4 sm:$0xff]  }
 0x2b1   :  { %v3531_v24 = vmax.f32 %v3186_v19, 0.0  ;;  %v3533_v39 = vmax.f32 %v3358_v20, 0.0  ;;  %5473 = vmatprep.subr.bf16.mxu1 %v8536_v7  ;;  %v8565_v63 = vld [vmem:[#allocation6 + $0x88] ss:$20 sps:$4 sm:$0xff]   ;;  %v8570_v7 = vld [vmem:[#allocation6 + $0xb0] ss:$20 sps:$4 sm:$0xff]  }
 0x2b2   :  { %v9113_v26 = vpack.c.bf16 %v3530_v17, %v3525_v15  ;;  %v9115_v34 = vpack.c.bf16 %v3532_v18, %v3527_v16  ;;  %v8566_v6 = vld [vmem:[#allocation6 + $0x468] ss:$20 sps:$4 sm:$0xff]   ;;  %v8574_v9 = vld [vmem:[#allocation6 + $0x218] ss:$20 sps:$4 sm:$0xff]  }
 0x2b3   :  { %v9117_v27 = vpack.c.bf16 %v3531_v24, %v3526_v22  ;;  %v9119_v28 = vpack.c.bf16 %v3533_v39, %v3528_v23  ;;  %5560 = vmatpush1.bf16.msra.mxu0 %v8537_v13  ;;  %v8573_v21 = vld [vmem:[#allocation6 + $0x494] ss:$20 sps:$4 sm:$0xff]   ;;  %v8575_v60 = vld [vmem:[#allocation6 + $0xd8] ss:$20 sps:$4 sm:$0xff]   ;;  %v8578_v12 = vld [vmem:[#allocation6 + $0x4bc] ss:$20 sps:$4 sm:$0xff]  }
 0x2b4   :  { %5474 = vmatpush1.bf16.msra.mxu1 %v8534_v31  ;;  %5561 = vmatprep.subr.bf16.mxu0 %v8545_v14  ;;  %v8571_v31 = vld [vmem:[#allocation6 + $0x490] ss:$20 sps:$4 sm:$0xff]   ;;  %v8579_v14 = vld [vmem:[#allocation6 + $0x240] ss:$20 sps:$4 sm:$0xff]   ;;  %v8576_v20 = vld [vmem:[#allocation6 + $0x4b8] ss:$20 sps:$4 sm:$0xff]  }
 0x2b5   :  { %5475 = vmatprep.subr.bf16.mxu1 %v8542_v25  ;;  %v8580_v39 = vld [vmem:[#allocation6 + $0x100] ss:$20 sps:$4 sm:$0xff]   ;;  %v8583_v25 = vld [vmem:[#allocation6 + $0x4e4] ss:$20 sps:$4 sm:$0xff]  }
 0x2b7   :  { %5562 = vmatpush1.bf16.msra.mxu0 %v8543_v30 }
 0x2b8   :  { %5476 = vmatpush1.bf16.msra.mxu1 %v8540_v33  ;;  %5563 = vmatprep.subr.bf16.mxu0 %v8548_v40 }
 0x2b9   :  { %7585 = vmatprep.subr.bf16.mxu1 %v8549_v41  ;;  %v8584_v41 = vld [vmem:[#allocation6 + $0x268] ss:$20 sps:$4 sm:$0xff]  }
 0x2bb   :  { %5494 = vmatmul.mubr.bf16.vlgmr.msra.gmra.mrb[32].mxu1 %v9050_v11  ;;  %5564 = vmatpush1.bf16.msra.mxu0 %v8546_v42 }
 0x2bc   :  { %7586 = vmatpush3.bf16.msra.mxu1 %v8550_v55  ;;  %5708 = vmatprep.mubr.bf16.mxu1 %v9040_v32  ;;  %v8569_v32 = vld [vmem:[#allocation6 + $0x1f0] ss:$20 sps:$4 sm:$0xff]  }
 0x2bd   :  { %5565 = vmatprep.subr.bf16.mxu0 %v8553_v43  ;;  %7587 = vmatprep.subr.bf16.mxu1 %v8554_v5  ;;  %v8581_v5 = vld [vmem:[#allocation6 + $0x4e0] ss:$20 sps:$4 sm:$0xff]  }
 0x2bf   :  { %5566 = vmatpush1.bf16.msra.mxu0 %v8551_v44  ;;  %v8585_v44 = vld [vmem:[#allocation6 + $0x128] ss:$20 sps:$4 sm:$0xff]  }
 0x2c0   :  { %7588 = vmatpush3.bf16.msra.mxu1 %v8555_v45  ;;  %5567 = vmatprep.subr.bf16.mxu0 %v8558_v46  ;;  %v8588_v45 = vld [vmem:[#allocation6 + $0x50c] ss:$20 sps:$4 sm:$0xff]  }
 0x2c1   :  { %7589 = vmatprep.subr.bf16.mxu1 %v8559_v47  ;;  %v8589_v47 = vld [vmem:[#allocation6 + $0x3d0] ss:$20 sps:$4 sm:$0xff]  }
 0x2c3   :  { %5568 = vmatpush1.bf16.msra.mxu0 %v8556_v50  ;;  %v8590_v50 = vld [vmem:[#allocation6 + $0x290] ss:$20 sps:$4 sm:$0xff]  }
 0x2c4   :  { %7590 = vmatpush3.bf16.msra.mxu1 %v8560_v51  ;;  %5569 = vmatprep.subr.bf16.mxu0 %v8563_v53  ;;  %v8593_v51 = vld [vmem:[#allocation6 + $0x534] ss:$20 sps:$4 sm:$0xff]   ;;  %v8591_v53 = vld [vmem:[#allocation6 + $0x530] ss:$20 sps:$4 sm:$0xff]  }
 0x2c5   :  { %7591 = vmatprep.subr.bf16.mxu1 %v8564_v57  ;;  %v8595_v57 = vld [vmem:[#allocation6 + $0x2b8] ss:$20 sps:$4 sm:$0xff]  }
 0x2c7   :  { %5570 = vmatpush1.bf16.msra.mxu0 %v8561_v59  ;;  %v8598_v59 = vld [vmem:[#allocation6 + $0x55c] ss:$20 sps:$4 sm:$0xff]  }
 0x2c8   :  { %7592 = vmatpush3.bf16.msra.mxu1 %v8565_v63  ;;  %5571 = vmatprep.subr.bf16.mxu0 %v8568_v3  ;;  %v8599_v63 = vld [vmem:[#allocation6 + $0x420] ss:$20 sps:$4 sm:$0xff]   ;;  %v8596_v3 = vld [vmem:[#allocation6 + $0x558] ss:$20 sps:$4 sm:$0xff]  }
 0x2c9   :  { %7593 = vmatprep.subr.bf16.mxu1 %v8569_v32  ;;  %v8600_v32 = vld [vmem:[#allocation6 + $0x2e0] ss:$20 sps:$4 sm:$0xff]  }
 0x2cb   :  { %5572 = vmatpush1.bf16.msra.mxu0 %v8566_v6  ;;  %v8603_v6 = vld [vmem:[#allocation6 + $0x584] ss:$20 sps:$4 sm:$0xff]  }
 0x2cc   :  { %7594 = vmatpush3.bf16.msra.mxu1 %v8570_v7  ;;  %5573 = vmatprep.subr.bf16.mxu0 %v8573_v21  ;;  %v8601_v7 = vld [vmem:[#allocation6 + $0x580] ss:$20 sps:$4 sm:$0xff]   ;;  %v8605_v21 = vld [vmem:[#allocation6 + $0x308] ss:$20 sps:$4 sm:$0xff]  }
 0x2cd   :  { %v7526_v13 = vpop.f32.mrb[24].mxu0  ;;  %7595 = vmatprep.subr.bf16.mxu1 %v8574_v9  ;;  %v8608_v9 = vld [vmem:[#allocation6 + $0x5ac] ss:$20 sps:$4 sm:$0xff]  }
 0x2ce   :  { %v7548_v15 = vpop.f32.mrb[24].mxu1  ;;  %v7527_v16 = vpop.f32.mrb[25].mxu0 }
 0x2cf   :  { %v7528_v17 = vadd.f32 %v7527_v16, %v7526_v13  ;;  %v7549_v18 = vpop.f32.mrb[25].mxu1  ;;  %v7529_v19 = vpop.f32.mrb[26].mxu0  ;;  %5574 = vmatpush1.bf16.msra.mxu0 %v8571_v31  ;;  %v8609_v31 = vld [vmem:[#allocation6 + $0x470] ss:$20 sps:$4 sm:$0xff]   ;;  %v8614_v13 = vld [vmem:[#allocation6 + $0x498] ss:$20 sps:$4 sm:$0xff]  }
 0x2d0   :  { %v7550_v22 = vadd.f32 %v7549_v18, %v7548_v15  ;;  %v7551_v23 = vpop.f32.mrb[26].mxu1  ;;  %7596 = vmatpush3.bf16.msra.mxu1 %v8575_v60  ;;  %v7530_v24 = vpop.f32.mrb[27].mxu0  ;;  %5575 = vmatprep.subr.bf16.mxu0 %v8578_v12  ;;  %v8610_v60 = vld [vmem:[#allocation6 + $0x330] ss:$20 sps:$4 sm:$0xff]   ;;  %v8613_v12 = vld [vmem:[#allocation6 + $0x5d4] ss:$20 sps:$4 sm:$0xff]  }
 0x2d1   :  { %v3396_v30 = vadd.f32 %v7528_v17, %v9052_v29  ;;  %v7531_v33 = vadd.f32 %v7530_v24, %v7529_v19  ;;  %v7552_v40 = vpop.f32.mrb[27].mxu1  ;;  %7597 = vmatprep.subr.bf16.mxu1 %v8579_v14  ;;  %v8586_v29 = vld [vmem:[#allocation6 + $0x508] ss:$20 sps:$4 sm:$0xff]   ;;  %v8611_v14 = vld [vmem:[#allocation6 + $0x5d0] ss:$20 sps:$4 sm:$0xff]  }
 0x2d2   :  { %v7553_v42 = vadd.f32 %v7552_v40, %v7551_v23  ;;  %v8615_v15 = vld [vmem:[#allocation6 + $0x358] ss:$20 sps:$4 sm:$0xff]   ;;  %v8618_v16 = vld [vmem:[#allocation6 + $0x5fc] ss:$20 sps:$4 sm:$0xff]   ;;  %v8619_v18 = vld [vmem:[#allocation6 + $0x4c0] ss:$20 sps:$4 sm:$0xff]  }
 0x2d3   :  { %v9124_v55 = vadd.f32 %v7550_v22, %v3396_v30  ;;  %v3399_v43 = vadd.f32 %v7531_v33, %v9056_v37  ;;  %5576 = vmatpush1.bf16.msra.mxu0 %v8576_v20  ;;  %v8594_v37 = vld [vmem:[#allocation6 + $0x3f8] ss:$20 sps:$4 sm:$0xff]   ;;  %v8620_v33 = vld [vmem:[#allocation6 + $0x380] ss:$20 sps:$4 sm:$0xff]  }
 0x2d4   :  { %7598 = vmatpush3.bf16.msra.mxu1 %v8580_v39  ;;  %5577 = vmatprep.subr.bf16.mxu0 %v8583_v25  ;;  %v8616_v39 = vld [vmem:[#allocation6 + $0x5f8] ss:$20 sps:$4 sm:$0xff]  }
 0x2d5   :  { %v9127_v46 = vadd.f32 %v7553_v42, %v3399_v43  ;;  %7599 = vmatprep.subr.bf16.mxu1 %v8584_v41  ;;  %v8623_v40 = vld [vmem:[#allocation6 + $0x624] ss:$20 sps:$4 sm:$0xff]  }
 0x2d7   :  { %5578 = vmatpush1.bf16.msra.mxu0 %v8581_v5  ;;  %v8624_v5 = vld [vmem:[#allocation6 + $0x4e8] ss:$20 sps:$4 sm:$0xff]  }
 0x2d8   :  { %7600 = vmatpush3.bf16.msra.mxu1 %v8585_v44  ;;  %5590 = vmatprep.subr.bf16.mxu0 %v8588_v45 }
 0x2d9   :  { %7607 = vmatprep.subr.bf16.mxu1 %v8589_v47  ;;  %v8621_v47 = vld [vmem:[#allocation6 + $0x620] ss:$20 sps:$4 sm:$0xff]  }
 0x2da   :  { %5580 = vmatmul.mubr.bf16.vlgmr.msra.gmra.mrb[40].mxu0 %v9042_v36 }
 0x2db   :  { %5709 = vmatmul.mubr.bf16.vlgmr.msra.gmra.mrb[36].mxu1 %v9038_v8  ;;  %5591 = vmatpush1.bf16.msra.mxu0 %v8586_v29  ;;  %v8604_v8 = vld [vmem:[#allocation6 + $0x448] ss:$20 sps:$4 sm:$0xff]  }
 0x2dc   :  { %5622 = vmatprep.mubr.bf16.mxu0 %v9048_v10  ;;  %7608 = vmatpush3.bf16.msra.mxu1 %v8590_v50  ;;  %v8625_v29 = vld [vmem:[#allocation6 + $0x3a8] ss:$20 sps:$4 sm:$0xff]   ;;  %v8628_v50 = vld [vmem:[#allocation6 + $0x64c] ss:$20 sps:$4 sm:$0xff]  }
 0x2dd   :  { %5749 = vmatprep.mubr.bf16.mxu1 %v9044_v48  ;;  %5592 = vmatprep.subr.bf16.mxu0 %v8593_v51  ;;  %v8606_v48 = vld [vmem:[#allocation6 + $0x5a8] ss:$20 sps:$4 sm:$0xff]  }
 0x2de   :  { %7609 = vmatprep.subr.bf16.mxu1 %v8594_v37  ;;  %v8629_v37 = vld [vmem:[#allocation6 + $0x650] ss:$20 sps:$4 sm:$0xff]  }
 0x2df   :  { %5593 = vmatpush1.bf16.msra.mxu0 %v8591_v53 }
 0x2e0   :  { %7610 = vmatpush3.bf16.msra.mxu1 %v8595_v57  ;;  %5594 = vmatprep.subr.bf16.mxu0 %v8598_v59  ;;  %v8630_v59 = vld [vmem:[#allocation6 + $0x510] ss:$20 sps:$4 sm:$0xff]  }
 0x2e1   :  { %7611 = vmatprep.subr.bf16.mxu1 %v8599_v63 }
 0x2e3   :  { %5595 = vmatpush1.bf16.msra.mxu0 %v8596_v3  ;;  %v8634_v3 = vld [vmem:[#allocation6 + $0x678] ss:$20 sps:$4 sm:$0xff]  }
 0x2e4   :  { %7612 = vmatpush3.bf16.msra.mxu1 %v8600_v32  ;;  %5596 = vmatprep.subr.bf16.mxu0 %v8603_v6  ;;  %v8631_v32 = vld [vmem:[#allocation6 + $0x670] ss:$20 sps:$4 sm:$0xff]   ;;  %v8635_v6 = vld [vmem:[#allocation6 + $0x538] ss:$20 sps:$4 sm:$0xff]  }
 0x2e5   :  { %7613 = vmatprep.subr.bf16.mxu1 %v8604_v8  ;;  %v8638_v8 = vld [vmem:[#allocation6 + $0x69c] ss:$20 sps:$4 sm:$0xff]  }
 0x2e7   :  { %5597 = vmatpush1.bf16.msra.mxu0 %v8601_v7  ;;  %v8639_v7 = vld [vmem:[#allocation6 + $0x6a0] ss:$20 sps:$4 sm:$0xff]  }
 0x2e8   :  { %7614 = vmatpush3.bf16.msra.mxu1 %v8605_v21  ;;  %5598 = vmatprep.subr.bf16.mxu0 %v8608_v9  ;;  %v8636_v21 = vld [vmem:[#allocation6 + $0x698] ss:$20 sps:$4 sm:$0xff]   ;;  %v8640_v9 = vld [vmem:[#allocation6 + $0x560] ss:$20 sps:$4 sm:$0xff]  }
 0x2e9   :  { %7615 = vmatprep.subr.bf16.mxu1 %v8609_v31  ;;  %v8643_v31 = vld [vmem:[#allocation6 + $0x6c4] ss:$20 sps:$4 sm:$0xff]  }
 0x2eb   :  { %5599 = vmatpush1.bf16.msra.mxu0 %v8606_v48  ;;  %v8644_v48 = vld [vmem:[#allocation6 + $0x6c8] ss:$20 sps:$4 sm:$0xff]  }
 0x2ec   :  { %7616 = vmatpush3.bf16.msra.mxu1 %v8610_v60  ;;  %5600 = vmatprep.subr.bf16.mxu0 %v8613_v12  ;;  %v8645_v60 = vld [vmem:[#allocation6 + $0x588] ss:$20 sps:$4 sm:$0xff]   ;;  %v8648_v12 = vld [vmem:[#allocation6 + $0x6ec] ss:$20 sps:$4 sm:$0xff]  }
 0x2ed   :  { %v7570_v17 = vpop.f32.mrb[28].mxu0  ;;  %7617 = vmatprep.subr.bf16.mxu1 %v8614_v13  ;;  %v8646_v13 = vld [vmem:[#allocation6 + $0x6e8] ss:$20 sps:$4 sm:$0xff]  }
 0x2ee   :  { %v3518_v19 = vpop.f32.mrb[28].mxu1  ;;  %v7571_v20 = vpop.f32.mrb[29].mxu0 }
 0x2ef   :  { %v7572_v22 = vadd.f32 %v7571_v20, %v7570_v17  ;;  %v7784_v23 = vpop.f32.mrb[29].mxu1  ;;  %v7573_v24 = vpop.f32.mrb[30].mxu0  ;;  %5601 = vmatpush1.bf16.msra.mxu0 %v8611_v14  ;;  %v8650_v14 = vld [vmem:[#allocation6 + $0x5b0] ss:$20 sps:$4 sm:$0xff]   ;;  %v8659_v20 = vld [vmem:[#allocation6 + $0x740] ss:$20 sps:$4 sm:$0xff]  }
 0x2f0   :  { %v3521_v25 = vpop.f32.mrb[30].mxu1  ;;  %7618 = vmatpush3.bf16.msra.mxu1 %v8615_v15  ;;  %v7574_v30 = vpop.f32.mrb[31].mxu0  ;;  %5602 = vmatprep.subr.bf16.mxu0 %v8618_v16  ;;  %v8653_v15 = vld [vmem:[#allocation6 + $0x714] ss:$20 sps:$4 sm:$0xff]   ;;  %v8654_v16 = vld [vmem:[#allocation6 + $0x718] ss:$20 sps:$4 sm:$0xff]  }
 0x2f1   :  { %v3478_v41 = vadd.f32 %v7572_v22, %v9124_v55  ;;  %v7575_v42 = vadd.f32 %v7574_v30, %v7573_v24  ;;  %v7785_v43 = vpop.f32.mrb[31].mxu1  ;;  %7619 = vmatprep.subr.bf16.mxu1 %v8619_v18  ;;  %v8626_v55 = vld [vmem:[#allocation6 + $0x648] ss:$20 sps:$4 sm:$0xff]   ;;  %v8651_v17 = vld [vmem:[#allocation6 + $0x710] ss:$20 sps:$4 sm:$0xff]  }
 0x2f2   :  { %v8655_v18 = vld [vmem:[#allocation6 + $0x5d8] ss:$20 sps:$4 sm:$0xff]   ;;  %v8660_v23 = vld [vmem:[#allocation6 + $0x600] ss:$20 sps:$4 sm:$0xff]   ;;  %v8665_v30 = vld [vmem:[#allocation6 + $0x628] ss:$20 sps:$4 sm:$0xff]  }
 0x2f3   :  { %v3519_v44 = vadd.f32 %v3518_v19, %v3478_v41  ;;  %v3481_v45 = vadd.f32 %v7575_v42, %v9127_v46  ;;  %5603 = vmatpush1.bf16.msra.mxu0 %v8616_v39  ;;  %v8633_v46 = vld [vmem:[#allocation6 + $0x674] ss:$20 sps:$4 sm:$0xff]   ;;  %v8658_v19 = vld [vmem:[#allocation6 + $0x73c] ss:$20 sps:$4 sm:$0xff]   ;;  %v8656_v22 = vld [vmem:[#allocation6 + $0x738] ss:$20 sps:$4 sm:$0xff]  }
 0x2f4   :  { %7620 = vmatpush3.bf16.msra.mxu1 %v8620_v33  ;;  %5604 = vmatprep.subr.bf16.mxu0 %v8623_v40  ;;  %v8663_v24 = vld [vmem:[#allocation6 + $0x764] ss:$20 sps:$4 sm:$0xff]   ;;  %v8664_v39 = vld [vmem:[#allocation6 + $0x768] ss:$20 sps:$4 sm:$0xff]   ;;  %v8668_v33 = vld [vmem:[#allocation6 + $0x78c] ss:$20 sps:$4 sm:$0xff]  }
 0x2f5   :  { %v3522_v51 = vadd.f32 %v3521_v25, %v3481_v45  ;;  %7621 = vmatprep.subr.bf16.mxu1 %v8624_v5  ;;  %v3529_v53 = vmax.f32 %v3519_v44, 0.0  ;;  %v8661_v25 = vld [vmem:[#allocation6 + $0x760] ss:$20 sps:$4 sm:$0xff]   ;;  %v8666_v40 = vld [vmem:[#allocation6 + $0x788] ss:$20 sps:$4 sm:$0xff]  }
 0x2f6   :  { %v8669_v41 = vld [vmem:[#allocation6 + $0x790] ss:$20 sps:$4 sm:$0xff]   ;;  %v8672_v42 = vld [vmem:[#allocation6 + $0x7b4] ss:$20 sps:$4 sm:$0xff]   ;;  %v8673_v5 = vld [vmem:[#allocation6 + $0x7b8] ss:$20 sps:$4 sm:$0xff]  }
 0x2f7   :  { %v3534_v57 = vmax.f32 %v3522_v51, 0.0  ;;  %5605 = vmatpush1.bf16.msra.mxu0 %v8621_v47  ;;  %v8670_v43 = vld [vmem:[#allocation6 + $0x7b0] ss:$20 sps:$4 sm:$0xff]   ;;  %v8674_v45 = vld [vmem:[#allocation6 + $0x7d8] ss:$20 sps:$4 sm:$0xff]  }
 0x2f8   :  { %7622 = vmatpush3.bf16.msra.mxu1 %v8625_v29  ;;  %5606 = vmatprep.subr.bf16.mxu0 %v8628_v50  ;;  %v8676_v44 = vld [vmem:[#allocation6 + $0x7dc] ss:$20 sps:$4 sm:$0xff]   ;;  %v8677_v47 = vld [vmem:[#allocation6 + $0x7e0] ss:$20 sps:$4 sm:$0xff]   ;;  %v8680_v29 = vld [vmem:[#allocation6 + $0x804] ss:$20 sps:$4 sm:$0xff]  }
 0x2f9   :  { %v9135_v63 = vpack.c.bf16 %v3534_v57, %v3529_v53  ;;  %7629 = vmatprep.subr.bf16.mxu1 %v8629_v37  ;;  %v8681_v50 = vld [vmem:[#allocation6 + $0x808] ss:$20 sps:$4 sm:$0xff]   ;;  %v8684_v51 = vld [vmem:[#allocation6 + $0x82c] ss:$20 sps:$4 sm:$0xff]   ;;  %v8685_v37 = vld [vmem:[#allocation6 + $0x830] ss:$20 sps:$4 sm:$0xff]  }
 0x2fa   :  { %v8688_v53 = vld [vmem:[#allocation6 + $0x854] ss:$20 sps:$4 sm:$0xff]   ;;  %v8686_v57 = vld [vmem:[#allocation6 + $0x850] ss:$20 sps:$4 sm:$0xff]  }
 0x2fb   :  { %5750 = vmatmul.mubr.bf16.vlgmr.msra.gmra.mrb[40].mxu1 %v9042_v36  ;;  %5607 = vmatpush1.bf16.msra.mxu0 %v8626_v55  ;;  %v8641_v36 = vld [vmem:[#allocation6 + $0x6c0] ss:$20 sps:$4 sm:$0xff]   ;;  %v8689_v55 = vld [vmem:[#allocation6 + $0x858] ss:$20 sps:$4 sm:$0xff]  }
 0x2fc   :  { %7630 = vmatpush3.bf16.msra.mxu1 %v8630_v59  ;;  %5790 = vmatprep.mubr.bf16.mxu1 %v9048_v10  ;;  %v8649_v10 = vld [vmem:[#allocation6 + $0x6f0] ss:$20 sps:$4 sm:$0xff]  }
 0x2fd   :  { %5608 = vmatprep.subr.bf16.mxu0 %v8633_v46  ;;  %7631 = vmatprep.subr.bf16.mxu1 %v8634_v3  ;;  %v8692_v59 = vld [vmem:[#allocation6 + $0x87c] ss:$20 sps:$4 sm:$0xff]  }
 0x2ff   :  { %5609 = vmatpush1.bf16.msra.mxu0 %v8631_v32 }
 0x300   :  { %7632 = vmatpush3.bf16.msra.mxu1 %v8635_v6  ;;  %5610 = vmatprep.subr.bf16.mxu0 %v8638_v8 }
 0x301   :  { %7633 = vmatprep.subr.bf16.mxu1 %v8639_v7  ;;  %v8690_v7 = vld [vmem:[#allocation6 + $0x878] ss:$20 sps:$4 sm:$0xff]  }
 0x303   :  { %5611 = vmatpush1.bf16.msra.mxu0 %v8636_v21 }
 0x304   :  { %7634 = vmatpush3.bf16.msra.mxu1 %v8640_v9  ;;  %5612 = vmatprep.subr.bf16.mxu0 %v8643_v31  ;;  %v8693_v31 = vld [vmem:[#allocation6 + $0x880] ss:$20 sps:$4 sm:$0xff]  }
 0x305   :  { %7635 = vmatprep.subr.bf16.mxu1 %v8644_v48  ;;  %v8696_v48 = vld [vmem:[#allocation6 + $0x8a4] ss:$20 sps:$4 sm:$0xff]  }
 0x307   :  { %5613 = vmatpush1.bf16.msra.mxu0 %v8641_v36 }
 0x308   :  { %7636 = vmatpush3.bf16.msra.mxu1 %v8645_v60  ;;  %5614 = vmatprep.subr.bf16.mxu0 %v8648_v12  ;;  %v8699_v60 = vld [vmem:[%s9464_s5] sm:$0xff]   ;;  %v8701_v12 = vld [vmem:[%s9464_s5 + $0x8] sm:$0xff]  }
 0x309   :  { %7637 = vmatprep.subr.bf16.mxu1 %v8649_v10  ;;  %v8702_v10 = vld [vmem:[%s9464_s5 + $0x50] sm:$0xff]  }
 0x30b   :  { %5615 = vmatpush1.bf16.msra.mxu0 %v8646_v13  ;;  %v8703_v13 = vld [vmem:[%s9464_s5 + $0x10] sm:$0xff]  }
 0x30c   :  { %7638 = vmatpush3.bf16.msra.mxu1 %v8650_v14  ;;  %5616 = vmatprep.subr.bf16.mxu0 %v8653_v15  ;;  %v8705_v14 = vld [vmem:[%s9464_s5 + $0x18] sm:$0xff]   ;;  %v8706_v15 = vld [vmem:[%s9464_s5 + $0x60] sm:$0xff]  }
 0x30d   :  { %7639 = vmatprep.subr.bf16.mxu1 %v8654_v16  ;;  %v8707_v16 = vld [vmem:[%s9464_s5 + $0x20] sm:$0xff]  }
 0x30f   :  { %5617 = vmatpush1.bf16.msra.mxu0 %v8651_v17  ;;  %v8708_v17 = vld [vmem:[%s9464_s5 + $0x68] sm:$0xff]  }
 0x310   :  { %7640 = vmatpush3.bf16.msra.mxu1 %v8655_v18  ;;  %5618 = vmatprep.subr.bf16.mxu0 %v8658_v19  ;;  %v8709_v18 = vld [vmem:[%s9464_s5 + $0x28] sm:$0xff]   ;;  %v8710_v19 = vld [vmem:[%s9464_s5 + $0x70] sm:$0xff]  }
 0x311   :  { %7641 = vmatprep.subr.bf16.mxu1 %v8659_v20  ;;  %v8711_v20 = vld [vmem:[%s9464_s5 + $0x30] sm:$0xff]  }
 0x313   :  { %5619 = vmatpush1.bf16.msra.mxu0 %v8656_v22  ;;  %v8712_v22 = vld [vmem:[%s9464_s5 + $0x78] sm:$0xff]  }
 0x314   :  { %7642 = vmatpush3.bf16.msra.mxu1 %v8660_v23  ;;  %5620 = vmatprep.subr.bf16.mxu0 %v8663_v24  ;;  %v8713_v23 = vld [vmem:[%s9464_s5 + $0x38] sm:$0xff]  }
 0x315   :  { %7643 = vmatprep.subr.bf16.mxu1 %v8664_v39 }
 0x317   :  { %5621 = vmatpush1.bf16.msra.mxu0 %v8661_v25 }
 0x318   :  { %7644 = vmatpush3.bf16.msra.mxu1 %v8665_v30  ;;  %5633 = vmatprep.subr.bf16.mxu0 %v8668_v33 }
 0x319   :  { %7786 = vmatprep.subr.bf16.mxu1 %v8881_v61 }
 0x31a   :  { %5623 = vmatmul.mubr.bf16.vlgmr.msra.gmra.mrb[40].mxu0 %v9046_v49 }
 0x31b   :  { %5791 = vmatmul.mubr.bf16.vlgmr.msra.gmra.mrb[44].mxu1 %v9046_v49  ;;  %5634 = vmatpush1.bf16.msra.mxu0 %v8666_v40  ;;  %v8678_v49 = vld [vmem:[#allocation6 + $0x800] ss:$20 sps:$4 sm:$0xff]  }
 0x31c   :  { %7787 = vmatpush3.bf16.msra.mxu1 %v8669_v41  ;;  %5635 = vmatprep.subr.bf16.mxu0 %v8672_v42 }
 0x31d   :  { %7788 = vmatprep.subr.bf16.mxu1 %v8881_v61  ;;  %5665 = vmatprep.mubr.bf16.mxu0 %v8880_v0  ;;  %v8682_v0 = vld [vmem:[#allocation6 + $0x828] ss:$20 sps:$4 sm:$0xff]  }
 0x31e   :  { %7802 = vmatprep.mubr.msk.bf16.mxu1 %vm8882_vm1, %v8881_v61 }
 0x31f   :  { %5636 = vmatpush1.bf16.msra.mxu0 %v8670_v43  ;;  %v8715_v43 = vld [vmem:[%s9464_s5 + $0xc0] sm:$0xff]  }
 0x320   :  { %7789 = vmatpush3.bf16.msra.mxu1 %v8673_v5  ;;  %5637 = vmatprep.subr.bf16.mxu0 %v8676_v44  ;;  %v8722_v5 = vld [vmem:[%s9464_s5 + $0x90] sm:$0xff]   ;;  %v8724_v44 = vld [vmem:[%s9464_s5 + $0xd8] sm:$0xff]  }
 0x321   :  { %7790 = vmatprep.subr.bf16.mxu1 %v8881_v61 }
 0x323   :  { %5638 = vmatpush1.bf16.msra.mxu0 %v8674_v45  ;;  %v8725_v45 = vld [vmem:[%s9464_s5 + $0x98] sm:$0xff]  }
 0x324   :  { %7791 = vmatpush3.bf16.msra.mxu1 %v8677_v47  ;;  %5639 = vmatprep.subr.bf16.mxu0 %v8680_v29  ;;  %v8727_v47 = vld [vmem:[%s9464_s5 + $0xe0] sm:$0xff]  }
 0x325   :  { %7792 = vmatprep.subr.bf16.mxu1 %v8881_v61  ;;  %v8728_v29 = vld [vmem:[%s9464_s5 + $0xa0] sm:$0xff]  }
 0x327   :  { %5640 = vmatpush1.bf16.msra.mxu0 %v8678_v49  ;;  %v8730_v49 = vld [vmem:[%s9464_s5 + $0xe8] sm:$0xff]  }
 0x328   :  { %7793 = vmatpush3.bf16.msra.mxu1 %v8681_v50  ;;  %5641 = vmatprep.subr.bf16.mxu0 %v8684_v51  ;;  %v8731_v50 = vld [vmem:[%s9464_s5 + $0xa8] sm:$0xff]  }
 0x329   :  { %7794 = vmatprep.subr.bf16.mxu1 %v8881_v61 }
 0x32b   :  { %5642 = vmatpush1.bf16.msra.mxu0 %v8682_v0 }
 0x32c   :  { %7795 = vmatpush3.bf16.msra.mxu1 %v8685_v37  ;;  %5643 = vmatprep.subr.bf16.mxu0 %v8688_v53  ;;  %v8733_v53 = vld [vmem:[%s9464_s5 + $0xf0] sm:$0xff]  }
 0x32d   :  { %v5366_v46 = vpop.f32.mrb[32].mxu0  ;;  %7796 = vmatprep.subr.bf16.mxu1 %v8881_v61 }
 0x32e   :  { %v9151_v3 = vadd.f32 %v5366_v46, %v9054_v35  ;;  %v5368_v32 = vpop.f32.mrb[33].mxu0  ;;  %v8694_v35 = vld [vmem:[#allocation6 + $0x8a0] ss:$20 sps:$4 sm:$0xff]  }
 0x32f   :  { %v9154_v6 = vadd.f32 %v5368_v32, %v9064_v52  ;;  %v5370_v8 = vpop.f32.mrb[34].mxu0  ;;  %5644 = vmatpush1.bf16.msra.mxu0 %v8686_v57  ;;  %v8697_v52 = vld [vmem:[#allocation6 + $0x8a8] ss:$20 sps:$4 sm:$0xff]  }
 0x330   :  { %v9157_v21 = vadd.f32 %v5370_v8, %v9058_v38  ;;  %7797 = vmatpush3.bf16.msra.mxu1 %v8689_v55  ;;  %v5372_v9 = vpop.f32.mrb[35].mxu0  ;;  %5645 = vmatprep.subr.bf16.mxu0 %v8692_v59  ;;  %v8698_v38 = vld [vmem:[%s9464_s5 + $0x40] sm:$0xff]   ;;  %v8734_v59 = vld [vmem:[%s9464_s5 + $0xb0] sm:$0xff]  }
 0x331   :  { %v9160_v36 = vadd.f32 %v5372_v9, %v9068_v56  ;;  %7798 = vmatprep.subr.bf16.mxu1 %v8881_v61  ;;  %v8700_v56 = vld [vmem:[%s9464_s5 + $0x48] sm:$0xff]   ;;  %v8736_v9 = vld [vmem:[%s9464_s5 + $0xf8] sm:$0xff]  }
 0x333   :  { %5646 = vmatpush1.bf16.msra.mxu0 %v8690_v7 }
 0x334   :  { %7799 = vmatpush3.bf16.msra.mxu1 %v8693_v31  ;;  %5647 = vmatprep.subr.bf16.mxu0 %v8696_v48  ;;  %v8737_v48 = vld [vmem:[%s9464_s5 + $0xb8] sm:$0xff]  }
 0x335   :  { %7800 = vmatprep.subr.bf16.mxu1 %v8881_v61 }
 0x337   :  { %5648 = vmatpush1.bf16.msra.mxu0 %v8694_v35 }
 0x338   :  { %7801 = vmatpush3.bf16.msra.mxu1 %v8697_v52  ;;  %7660 = vmatprep.subr.bf16.mxu0 %v8698_v38  ;;  %v8740_v52 = vld [vmem:[%s9463_s4 + $0x40] sm:$0xff]   ;;  %v8717_v38 = vld [vmem:[%s9464_s5 + $0x108] sm:$0xff]  }
 0x339   :  { %7682 = vmatprep.subr.bf16.mxu1 %v8715_v43 }
 0x33a   :  { %5666 = vmatmul.mubr.bf16.vlgmr.msra.gmra.mrb[40].mxu0 %v9050_v11 }
 0x33b   :  { %7803 = vmatmul.mubr.bf16.vlgmr.msra.gmra.mrb[48].mxu1 %v9050_v11  ;;  %7661 = vmatpush3.bf16.msra.mxu0 %v8699_v60  ;;  %v8704_v11 = vld [vmem:[%s9464_s5 + $0x58] sm:$0xff]   ;;  %v8720_v60 = vld [vmem:[%s9464_s5 + $0x110] sm:$0xff]  }
 0x33c   :  { %7662 = vmatprep.subr.bf16.mxu0 %v8700_v56  ;;  %v8723_v56 = vld [vmem:[%s9464_s5 + $0x118] sm:$0xff]  }
 0x33f   :  { %7663 = vmatpush3.bf16.msra.mxu0 %v8701_v12  ;;  %v8726_v12 = vld [vmem:[%s9464_s5 + $0x120] sm:$0xff]  }
 0x340   :  { %7664 = vmatprep.subr.bf16.mxu0 %v8702_v10  ;;  %v8729_v10 = vld [vmem:[%s9464_s5 + $0x128] sm:$0xff]  }
 0x343   :  { %7665 = vmatpush3.bf16.msra.mxu0 %v8703_v13 }
 0x344   :  { %7666 = vmatprep.subr.bf16.mxu0 %v8704_v11  ;;  %v8732_v11 = vld [vmem:[%s9464_s5 + $0x130] sm:$0xff]  }
 0x347   :  { %7667 = vmatpush3.bf16.msra.mxu0 %v8705_v14 }
 0x348   :  { %7668 = vmatprep.subr.bf16.mxu0 %v8706_v15 }
 0x34b   :  { %7669 = vmatpush3.bf16.msra.mxu0 %v8707_v16 }
 0x34c   :  { %7670 = vmatprep.subr.bf16.mxu0 %v8708_v17 }
 0x34f   :  { %7671 = vmatpush3.bf16.msra.mxu0 %v8709_v18 }
 0x350   :  { %7672 = vmatprep.subr.bf16.mxu0 %v8710_v19 }
 0x353   :  { %7673 = vmatpush3.bf16.msra.mxu0 %v8711_v20  ;;  %v8735_v20 = vld [vmem:[%s9464_s5 + $0x138] sm:$0xff]  }
 0x354   :  { %7674 = vmatprep.subr.bf16.mxu0 %v8712_v22  ;;  %v8738_v22 = vld [vmem:[%s9463_s4 + $0xc0] sm:$0xff]  }
 0x357   :  { %7675 = vmatpush3.bf16.msra.mxu0 %v8713_v23 }
 0x358   :  { %7806 = vmatprep.subr.bf16.mxu0 %v8881_v61 }
 0x36d   :  { %v5538_v24 = vpop.f32.mrb[36].mxu0 }
 0x36e   :  { %v9216_v39 = vadd.f32 %v5538_v24, %v9066_v54  ;;  %v5540_v25 = vpop.f32.mrb[37].mxu0  ;;  %v8716_v54 = vld [vmem:[%s9464_s5 + $0x80] sm:$0xff]  }
 0x36f   :  { %v9219_v30 = vadd.f32 %v5540_v25, %v9072_v62  ;;  %v5542_v33 = vpop.f32.mrb[38].mxu0  ;;  %v8718_v62 = vld [vmem:[%s9464_s5 + $0xc8] sm:$0xff]   ;;  %7683 = vmatpush3.bf16.msra.mxu1 %v8716_v54 }
 0x370   :  { %v9222_v40 = vadd.f32 %v5542_v33, %v9070_v58  ;;  %v5544_v41 = vpop.f32.mrb[39].mxu0  ;;  %v8719_v58 = vld [vmem:[%s9464_s5 + $0x88] sm:$0xff]   ;;  %7684 = vmatprep.subr.bf16.mxu1 %v8718_v62 }
 0x371   :  { %v9225_v42 = vadd.f32 %v5544_v41, %v9076_v2  ;;  %v8721_v2 = vld [vmem:[%s9464_s5 + $0xd0] sm:$0xff]  }
 0x373   :  { %7685 = vmatpush3.bf16.msra.mxu1 %v8719_v58 }
 0x374   :  { %7686 = vmatprep.subr.bf16.mxu1 %v8721_v2 }
 0x377   :  { %7687 = vmatpush3.bf16.msra.mxu1 %v8722_v5 }
 0x378   :  { %7688 = vmatprep.subr.bf16.mxu1 %v8724_v44 }
 0x37b   :  { %7689 = vmatpush3.bf16.msra.mxu1 %v8725_v45 }
 0x37c   :  { %7690 = vmatprep.subr.bf16.mxu1 %v8727_v47 }
 0x37f   :  { %7691 = vmatpush3.bf16.msra.mxu1 %v8728_v29 }
 0x380   :  { %7692 = vmatprep.subr.bf16.mxu1 %v8730_v49 }
 0x383   :  { %7693 = vmatpush3.bf16.msra.mxu1 %v8731_v50 }
 0x384   :  { %7694 = vmatprep.subr.bf16.mxu1 %v8733_v53 }
 0x387   :  { %7695 = vmatpush3.bf16.msra.mxu1 %v8734_v59 }
 0x388   :  { %7696 = vmatprep.subr.bf16.mxu1 %v8736_v9 }
 0x38b   :  { %7697 = vmatpush3.bf16.msra.mxu1 %v8737_v48 }
 0x38c   :  { %7713 = vmatprep.subr.bf16.mxu1 %v8740_v52 }
 0x38e   :  { %v5495_v51 = vpop.f32.mrb[32].mxu1 }
 0x38f   :  { %v7846_v0 = vadd.f32 %v5495_v51, %v9151_v3  ;;  %v5497_v37 = vpop.f32.mrb[33].mxu1 }
 0x390   :  { %v7847_v57 = vadd.f32 %v5497_v37, %v9154_v6  ;;  %v5499_v55 = vpop.f32.mrb[34].mxu1 }
 0x391   :  { %v7848_v46 = vadd.f32 %v5499_v55, %v9157_v21  ;;  %v5501_v32 = vpop.f32.mrb[35].mxu1  ;;  %v5840_v3 = vmax.f32 %v7846_v0, 0.0 }
 0x392   :  { %v7849_v8 = vadd.f32 %v5501_v32, %v9160_v36  ;;  %v5841_v31 = vmax.f32 %v7847_v57, 0.0  ;;  %v8714_v36 = vld [vmem:[%s9464_s5 + $0x100] sm:$0xff]  }
 0x393   :  { %v5845_v7 = vmax.f32 %v7848_v46, 0.0 }
 0x394   :  { %v5846_v6 = vmax.f32 %v7849_v8, 0.0 }
 0x395   :  { %v5850_v35 = vpack.c.bf16 %v5845_v7, %v5840_v3 }
 0x396   :  { %v5851_v21 = vpack.c.bf16 %v5846_v6, %v5841_v31 }
 0x398   :  { %6287 = vmatprep.mubr.bf16.mxu0 %v5851_v21 }
 0x399   :  { %6288 = vmatmul.mubr.bf16.vlgmr.msra.gmra.mrb[44].mxu0 %v5850_v35 }
 0x39a   :  { %7807 = vmatpush3.bf16.msra.mxu0 %v8714_v36  ;;  %7822 = vmatprep.mubr.msk.bf16.mxu0 %vm8882_vm1, %v8881_v61 }
 0x39b   :  { %7808 = vmatprep.subr.bf16.mxu0 %v8881_v61 }
 0x39e   :  { %7809 = vmatpush3.bf16.msra.mxu0 %v8717_v38  ;;  %v8744_v38 = vld [vmem:[%s9463_s4 + $0x48] sm:$0xff]  }
 0x39f   :  { %7810 = vmatprep.subr.bf16.mxu0 %v8881_v61 }
 0x3a2   :  { %7811 = vmatpush3.bf16.msra.mxu0 %v8720_v60  ;;  %v8743_v60 = vld [vmem:[%s9463_s4 + $0x88] sm:$0xff]  }
 0x3a3   :  { %7812 = vmatprep.subr.bf16.mxu0 %v8881_v61 }
 0x3a6   :  { %7813 = vmatpush3.bf16.msra.mxu0 %v8723_v56  ;;  %v8746_v56 = vld [vmem:[%s9463_s4 + $0xd0] sm:$0xff]  }
 0x3a7   :  { %7814 = vmatprep.subr.bf16.mxu0 %v8881_v61 }
 0x3aa   :  { %7815 = vmatpush3.bf16.msra.mxu0 %v8726_v12  ;;  %v8745_v12 = vld [vmem:[%s9463_s4 + $0x8] sm:$0xff]  }
 0x3ab   :  { %7816 = vmatprep.subr.bf16.mxu0 %v8881_v61 }
 0x3ae   :  { %v7601_v13 = vpop.f32.mrb[36].mxu1  ;;  %7817 = vmatpush3.bf16.msra.mxu0 %v8729_v10  ;;  %v8747_v10 = vld [vmem:[%s9463_s4 + $0x90] sm:$0xff]  }
 0x3af   :  { %v7602_v14 = vpop.f32.mrb[37].mxu1  ;;  %7818 = vmatprep.subr.bf16.mxu0 %v8881_v61 }
 0x3b0   :  { %v7603_v15 = vadd.f32 %v7602_v14, %v7601_v13  ;;  %v7604_v16 = vpop.f32.mrb[38].mxu1  ;;  %v8750_v13 = vld [vmem:[%s9463_s4 + $0xd8] sm:$0xff]  }
 0x3b1   :  { %v7605_v17 = vpop.f32.mrb[39].mxu1  ;;  %v8751_v14 = vld [vmem:[%s9463_s4 + $0x98] sm:$0xff]  }
 0x3b2   :  { %v5711_v18 = vadd.f32 %v7603_v15, %v9074_v1  ;;  %v7606_v19 = vadd.f32 %v7605_v17, %v7604_v16  ;;  %7819 = vmatpush3.bf16.msra.mxu0 %v8732_v11  ;;  %v8752_v11 = vld [vmem:[%s9463_s4 + $0x58] sm:$0xff]   ;;  %v8754_v15 = vld [vmem:[%s9463_s4 + $0xe0] sm:$0xff]  }
 0x3b3   :  { %7820 = vmatprep.subr.bf16.mxu0 %v8881_v61  ;;  %v8753_v16 = vld [vmem:[%s9463_s4 + $0x18] sm:$0xff]   ;;  %v8756_v17 = vld [vmem:[%s9463_s4 + $0x60] sm:$0xff]  }
 0x3b4   :  { %v5714_v23 = vadd.f32 %v7606_v19, %v9078_v4  ;;  %v8758_v19 = vld [vmem:[%s9463_s4 + $0xe8] sm:$0xff]  }
 0x3b6   :  { %7821 = vmatpush3.bf16.msra.mxu0 %v8735_v20  ;;  %v8757_v20 = vld [vmem:[%s9463_s4 + $0x20] sm:$0xff]  }
 0x3b7   :  { %7735 = vmatprep.subr.bf16.mxu0 %v8738_v22  ;;  %v8760_v22 = vld [vmem:[%s9463_s4 + $0x68] sm:$0xff]  }
 0x3ce   :  { %v7623_v24 = vpop.f32.mrb[40].mxu1 }
 0x3cf   :  { %v7624_v25 = vpop.f32.mrb[41].mxu1 }
 0x3d0   :  { %v7625_v33 = vadd.f32 %v7624_v25, %v7623_v24  ;;  %v7626_v1 = vpop.f32.mrb[42].mxu1  ;;  %v8762_v24 = vld [vmem:[%s9463_s4 + $0xf0] sm:$0xff]   ;;  %v8761_v25 = vld [vmem:[%s9463_s4 + $0x28] sm:$0xff]  }
 0x3d1   :  { %v7627_v41 = vpop.f32.mrb[43].mxu1 }
 0x3d2   :  { %v5752_v43 = vadd.f32 %v7625_v33, %v5711_v18  ;;  %v7628_v54 = vadd.f32 %v7627_v41, %v7626_v1  ;;  %v8755_v18 = vld [vmem:[%s9463_s4 + $0xa0] sm:$0xff]   ;;  %v8764_v33 = vld [vmem:[%s9463_s4 + $0x70] sm:$0xff]   ;;  %v8766_v41 = vld [vmem:[%s9463_s4 + $0xf8] sm:$0xff]  }
 0x3d3   :  { %v8763_v1 = vld [vmem:[%s9463_s4 + $0xb0] sm:$0xff]  }
 0x3d4   :  { %v5755_v62 = vadd.f32 %v7628_v54, %v5714_v23  ;;  %v8759_v23 = vld [vmem:[%s9463_s4 + $0xa8] sm:$0xff]   ;;  %v8768_v54 = vld [vmem:[%s9463_s4 + $0x78] sm:$0xff]  }
 0x3ee   :  { %v7645_v58 = vpop.f32.mrb[44].mxu1 }
 0x3ef   :  { %v7646_v2 = vpop.f32.mrb[45].mxu1 }
 0x3f0   :  { %v7647_v5 = vadd.f32 %v7646_v2, %v7645_v58  ;;  %v7648_v44 = vpop.f32.mrb[46].mxu1  ;;  %v8769_v58 = vld [vmem:[%s9463_s4 + $0x38] sm:$0xff]   ;;  %v8770_v2 = vld [vmem:[%s9463_s4 + $0x100] sm:$0xff]  }
 0x3f1   :  { %v7649_v45 = vpop.f32.mrb[47].mxu1 }
 0x3f2   :  { %v7650_v47 = vadd.f32 %v7649_v45, %v7648_v44  ;;  %v5793_v29 = vadd.f32 %v7647_v5, %v5752_v43  ;;  %v8765_v43 = vld [vmem:[%s9463_s4 + $0x30] sm:$0xff]   ;;  %v8771_v5 = vld [vmem:[%s9463_s4 + $0x108] sm:$0xff]  }
 0x3f3   :  { %v8772_v44 = vld [vmem:[%s9463_s4 + $0x110] sm:$0xff]   ;;  %v8775_v45 = vld [vmem:[%s9463_s4 + $0x128] sm:$0xff]  }
 0x3f4   :  { %v5796_v49 = vadd.f32 %v7650_v47, %v5755_v62  ;;  %v8767_v62 = vld [vmem:[%s9463_s4 + $0xb8] sm:$0xff]   ;;  %v8776_v47 = vld [vmem:[%s9463_s4 + $0x130] sm:$0xff]  }
 0x40d   :  { %v5667_v50 = vpop.f32.mrb[40].mxu0 }
 0x40e   :  { %v7850_v4 = vadd.f32 %v5667_v50, %v9216_v39  ;;  %v5833_v51 = vpop.f32.mrb[48].mxu1  ;;  %v5669_v0 = vpop.f32.mrb[41].mxu0 }
 0x40f   :  { %v5834_v37 = vadd.f32 %v5833_v51, %v5793_v29  ;;  %v7851_v53 = vadd.f32 %v5669_v0, %v9219_v30  ;;  %v7804_v57 = vpop.f32.mrb[49].mxu1  ;;  %v5671_v55 = vpop.f32.mrb[42].mxu0  ;;  %v8739_v30 = vld [vmem:[%s9463_s4 + $0x80] sm:$0xff]   ;;  %v8777_v29 = vld [vmem:[%s9463_s4 + $0x138] sm:$0xff]  }
 0x410   :  { %v7852_v59 = vadd.f32 %v5671_v55, %v9222_v40  ;;  %v5836_v46 = vpop.f32.mrb[50].mxu1  ;;  %v5673_v32 = vpop.f32.mrb[43].mxu0  ;;  %v5842_v9 = vmax.f32 %v7850_v4, 0.0  ;;  %v8742_v40 = vld [vmem:[%s9463_s4 + $0xc8] sm:$0xff]  }
 0x411   :  { %v5837_v8 = vadd.f32 %v5836_v46, %v5796_v49  ;;  %v7853_v3 = vadd.f32 %v5673_v32, %v9225_v42  ;;  %v7805_v7 = vpop.f32.mrb[51].mxu1  ;;  %v5844_v6 = vmax.f32 %v5834_v37, 0.0  ;;  %v5843_v48 = vmax.f32 %v7851_v53, 0.0  ;;  %v8741_v42 = vld [vmem:[%s9463_s4] sm:$0xff]  }
 0x412   :  { %v5847_v31 = vmax.f32 %v7852_v59, 0.0 }
 0x413   :  { %v5849_v39 = vmax.f32 %v5837_v8, 0.0  ;;  %v5848_v35 = vmax.f32 %v7853_v3, 0.0 }
 0x414   :  { %v5852_v21 = vpack.c.bf16 %v5847_v31, %v5842_v9 }
 0x415   :  { %v5854_v36 = vpack.c.bf16 %v5849_v39, %v5844_v6  ;;  %v5853_v52 = vpack.c.bf16 %v5848_v35, %v5843_v48 }
 0x417   :  { %7823 = vmatmul.mubr.bf16.vlgmr.msra.gmra.mrb[48].mxu0 %v5854_v36  ;;  %6328 = vmatprep.mubr.bf16.mxu1 %v5853_v52 }
 0x418   :  { %7736 = vmatpush3.bf16.msra.mxu0 %v8739_v30  ;;  %6691 = vmatprep.mubr.bf16.mxu0 %v9119_v28  ;;  %v8748_v28 = vld [vmem:[%s9463_s4 + $0x50] sm:$0xff]  }
 0x419   :  { %6329 = vmatmul.mubr.bf16.vlgmr.msra.gmra.mrb[52].mxu1 %v5852_v21  ;;  %7737 = vmatprep.subr.bf16.mxu0 %v8742_v40 }
 0x41a   :  { %7714 = vmatpush3.bf16.msra.mxu1 %v8741_v42  ;;  %6650 = vmatprep.mubr.bf16.mxu1 %v9117_v27  ;;  %v8749_v27 = vld [vmem:[%s9463_s4 + $0x10] sm:$0xff]  }
 0x41b   :  { %7715 = vmatprep.subr.bf16.mxu1 %v8744_v38 }
 0x41c   :  { %7738 = vmatpush3.bf16.msra.mxu0 %v8743_v60 }
 0x41d   :  { %7739 = vmatprep.subr.bf16.mxu0 %v8746_v56 }
 0x41e   :  { %7716 = vmatpush3.bf16.msra.mxu1 %v8745_v12 }
 0x41f   :  { %7717 = vmatprep.subr.bf16.mxu1 %v8748_v28 }
 0x420   :  { %7740 = vmatpush3.bf16.msra.mxu0 %v8747_v10 }
 0x421   :  { %7741 = vmatprep.subr.bf16.mxu0 %v8750_v13 }
 0x422   :  { %7718 = vmatpush3.bf16.msra.mxu1 %v8749_v27 }
 0x423   :  { %7719 = vmatprep.subr.bf16.mxu1 %v8752_v11  ;;  %v7509_v11 = vld [vmem:[#allocation7] ss:$0 sm:$0xff] }
 0x424   :  { %7742 = vmatpush3.bf16.msra.mxu0 %v8751_v14 }
 0x425   :  { %7743 = vmatprep.subr.bf16.mxu0 %v8754_v15 }
 0x426   :  { %7720 = vmatpush3.bf16.msra.mxu1 %v8753_v16 }
 0x427   :  { %7721 = vmatprep.subr.bf16.mxu1 %v8756_v17 }
 0x428   :  { %7744 = vmatpush3.bf16.msra.mxu0 %v8755_v18 }
 0x429   :  { %7745 = vmatprep.subr.bf16.mxu0 %v8758_v19 }
 0x42a   :  { %7722 = vmatpush3.bf16.msra.mxu1 %v8757_v20 }
 0x42b   :  { %7723 = vmatprep.subr.bf16.mxu1 %v8760_v22 }
 0x42c   :  { %7746 = vmatpush3.bf16.msra.mxu0 %v8759_v23 }
 0x42d   :  { %7747 = vmatprep.subr.bf16.mxu0 %v8762_v24 }
 0x42e   :  { %7724 = vmatpush3.bf16.msra.mxu1 %v8761_v25 }
 0x42f   :  { %7725 = vmatprep.subr.bf16.mxu1 %v8764_v33 }
 0x430   :  { %7748 = vmatpush3.bf16.msra.mxu0 %v8763_v1 }
 0x431   :  { %7749 = vmatprep.subr.bf16.mxu0 %v8766_v41 }
 0x432   :  { %7726 = vmatpush3.bf16.msra.mxu1 %v8765_v43 }
 0x433   :  { %7727 = vmatprep.subr.bf16.mxu1 %v8768_v54 }
 0x434   :  { %7750 = vmatpush3.bf16.msra.mxu0 %v8767_v62 }
 0x436   :  { %7728 = vmatpush3.bf16.msra.mxu1 %v8769_v58 }
 0x437   :  { %6692 = vmatmul.mubr.bf16.vlgmr.msra.gmra.mrb[52].mxu0 %v9115_v34  ;;  %7826 = vmatprep.subr.bf16.mxu1 %v8881_v61  ;;  %v8774_v34 = vld [vmem:[%s9463_s4 + $0x120] sm:$0xff]  }
 0x439   :  { %6651 = vmatmul.mubr.bf16.vlgmr.msra.gmra.mrb[56].mxu1 %v9113_v26  ;;  %v8773_v26 = vld [vmem:[%s9463_s4 + $0x118] sm:$0xff]  }
 0x43a   :  { %7827 = vmatpush3.bf16.msra.mxu1 %v8770_v2  ;;  %7842 = vmatprep.mubr.msk.bf16.mxu1 %vm8882_vm1, %v8881_v61 }
 0x43b   :  { %7828 = vmatprep.subr.bf16.mxu1 %v8881_v61 }
 0x43e   :  { %7829 = vmatpush3.bf16.msra.mxu1 %v8771_v5 }
 0x43f   :  { %7830 = vmatprep.subr.bf16.mxu1 %v8881_v61 }
 0x442   :  { %7831 = vmatpush3.bf16.msra.mxu1 %v8772_v44 }
 0x443   :  { %7832 = vmatprep.subr.bf16.mxu1 %v8881_v61 }
 0x446   :  { %7833 = vmatpush3.bf16.msra.mxu1 %v8773_v26 }
 0x447   :  { %7834 = vmatprep.subr.bf16.mxu1 %v8881_v61 }
 0x44a   :  { %7835 = vmatpush3.bf16.msra.mxu1 %v8774_v34 }
 0x44b   :  { %7836 = vmatprep.subr.bf16.mxu1 %v8881_v61 }
 0x44e   :  { %7837 = vmatpush3.bf16.msra.mxu1 %v8775_v45 }
 0x44f   :  { %7838 = vmatprep.subr.bf16.mxu1 %v8881_v61 }
 0x452   :  { %7839 = vmatpush3.bf16.msra.mxu1 %v8776_v47 }
 0x453   :  { %7840 = vmatprep.subr.bf16.mxu1 %v8881_v61 }
 0x456   :  { %7841 = vmatpush3.bf16.msra.mxu1 %v8777_v29 }
 0x459   :  { %7843 = vmatmul.mubr.bf16.vlgmr.msra.gmra.mrb[60].mxu1 %v9135_v63 }
 0x46c   :  { %v7676_v49 = vpop.f32.mrb[44].mxu0 }
 0x46d   :  { %v7677_v50 = vpop.f32.mrb[45].mxu0 }
 0x46e   :  { %v7678_v4 = vadd.f32 %v7677_v50, %v7676_v49  ;;  %v7679_v51 = vpop.f32.mrb[46].mxu0 }
 0x46f   :  { %v7680_v0 = vpop.f32.mrb[47].mxu0 }
 0x470   :  { %v7681_v37 = vadd.f32 %v7680_v0, %v7679_v51 }
 0x4ea   :  { %v6371_v53 = vpop.f32.mrb[48].mxu0 }
 0x4eb   :  { %v7824_v57 = vpop.f32.mrb[49].mxu0 }
 0x4ec   :  { %v7698_v55 = vpop.f32.mrb[52].mxu1  ;;  %v6374_v59 = vpop.f32.mrb[50].mxu0 }
 0x4ed   :  { %v7699_v46 = vpop.f32.mrb[53].mxu1  ;;  %v7825_v32 = vpop.f32.mrb[51].mxu0 }
 0x4ee   :  { %v7700_v8 = vadd.f32 %v7699_v46, %v7698_v55  ;;  %v7701_v3 = vpop.f32.mrb[54].mxu1 }
 0x4ef   :  { %v7702_v7 = vpop.f32.mrb[55].mxu1 }
 0x4f0   :  { %v6331_v9 = vadd.f32 %v7700_v8, %v7678_v4  ;;  %v7703_v61 = vadd.f32 %v7702_v7, %v7701_v3 }
 0x4f2   :  { %v6334_v31 = vadd.f32 %v7703_v61, %v7681_v37  ;;  %v6372_v6 = vadd.f32 %v6371_v53, %v6331_v9 }
 0x4f4   :  { %v6375_v63 = vadd.f32 %v6374_v59, %v6334_v31 }
 0x50a   :  { %v7751_v48 = vpop.f32.mrb[52].mxu0 }
 0x50b   :  { %v7752_v39 = vpop.f32.mrb[53].mxu0 }
 0x50c   :  { %v7753_v35 = vadd.f32 %v7752_v39, %v7751_v48  ;;  %v7729_v21 = vpop.f32.mrb[56].mxu1  ;;  %v7754_v30 = vpop.f32.mrb[54].mxu0 }
 0x50d   :  { %v7730_v36 = vpop.f32.mrb[57].mxu1  ;;  %v7755_v52 = vpop.f32.mrb[55].mxu0 }
 0x50e   :  { %v7731_v40 = vadd.f32 %v7730_v36, %v7729_v21  ;;  %v7756_v42 = vadd.f32 %v7755_v52, %v7754_v30  ;;  %v7732_v38 = vpop.f32.mrb[58].mxu1 }
 0x50f   :  { %v7733_v60 = vpop.f32.mrb[59].mxu1 }
 0x510   :  { %v6653_v56 = vadd.f32 %v7731_v40, %v6372_v6  ;;  %v7734_v12 = vadd.f32 %v7733_v60, %v7732_v38 }
 0x512   :  { %v6656_v28 = vadd.f32 %v7734_v12, %v6375_v63  ;;  %v6694_v10 = vadd.f32 %v7753_v35, %v6653_v56 }
 0x514   :  { %v6697_v13 = vadd.f32 %v7756_v42, %v6656_v28 }
 0x52c   :  { %v6734_v27 = vpop.f32.mrb[60].mxu1 }
 0x52d   :  { %v6735_v14 = vadd.f32 %v6734_v27, %v6694_v10  ;;  %v7844_v15 = vpop.f32.mrb[61].mxu1 }
 0x52e   :  { %v6737_v16 = vpop.f32.mrb[62].mxu1 }
 0x52f   :  { %v6748_v17 = vadd.f32 %v7509_v11, %v6735_v14  ;;  %v6738_v18 = vadd.f32 %v6737_v16, %v6697_v13  ;;  %v7845_v19 = vpop.f32.mrb[63].mxu1 }
 0x531   :  { %6751 = vst.msk [vmem:[%s9466_s7] sm:$0xff] %vm6750_vm2, %v6748_v17  ;;  %v6749_v20 = vadd.f32 %v7509_v11, %v6738_v18 }
 0x533   :  { %6752 = vst.msk [vmem:[%s9466_s7 + $0x8] sm:$0xff] %vm6750_vm2, %v6749_v20 }
 0x534   :  { %6757 = vsyncpa [#allocation3], 1 }
 0x535   :  { %6758 = vsyncpa [#allocation5], 1 }
 0x536   :  { %6759 = vsyncpa [#allocation8], 1 }

</bundles_post_ra>
